<compile_context>
chip_gen: v7x
topology: tpu7x:2x2x1
jax: 0.10.0
libtpu: 0.0.40
codegen_flags: <defaults>
</compile_context>

<pallas_src>
import functools

import jax
import jax.numpy as jnp
from jax import lax
from jax.experimental import pallas as pl
from jax.experimental.pallas import tpu as pltpu

D = 512        # feature dim fixed by nn.Linear(512, 512)
LANES = 128    # TPU lane width
TM_MAX = 512   # row-tile size (VMEM-friendly on v7x, pipeline-friendly everywhere)


def _round_up(v, m):
    return ((v + m - 1) // m) * m


def _attractor_kernel(x_ref, w1_ref, w_up_ref, b_total_ref, o_ref, *, n_iters):
    # x_ref: (TM, D) tile; w1_ref: (D, D + Hpad) = [W_skip | W_down_pad];
    # w_up_ref: (Hpad, D); b_total_ref: (1, D).  Weights are VMEM-resident
    # across all row tiles (constant index_map).

    def flow(x):
        # One fused matmul produces both the skip path and the bottleneck
        # hidden activations; both slices are 128-lane aligned (no copy).
        y = jnp.dot(x, w1_ref[...], preferred_element_type=jnp.float32)
        skip = y[:, :D]
        hidden = y[:, D:]
        up = jnp.dot(hidden, w_up_ref[...], preferred_element_type=jnp.float32)
        # Single folded bias (b_skip + b_up + b_down @ W_up).
        return jnp.tanh(skip + up + b_total_ref[...])

    x = x_ref[...]
    if n_iters <= 8:
        # Static unroll for small N: full LLO scheduler visibility.
        for _ in range(n_iters):
            x = flow(x)
    else:
        # Partial unroll keeps scheduling visibility without code-size blowup.
        x = lax.fori_loop(0, n_iters, lambda _, xc: flow(xc), x, unroll=2)

    # Single lane/sublane-dense store of the whole tile.
    o_ref[...] = x


def prepare_attractor_params(params):
    """One-time weight prep (hoisted out of the per-forward path).

    params (PyTorch layouts):
      w_skip (512, 512), b_skip (512,), w_down (H, 512), b_down (H,),
      w_up (512, H), b_up (512,).
    Returns kernel-ready (w1, w_up_pad, b_total).
    """
    w_skip, b_skip, w_down, b_down, w_up, b_up = params
    H = w_down.shape[0]
    h_pad = _round_up(H, LANES)
    pad = h_pad - H

    # Transpose to (in, out) so each layer is a plain x @ W; zero-pad the
    # hidden dim to a lane-dense multiple of 128 (numerically exact).
    w_skip_k = jnp.transpose(w_skip, (1, 0)).astype(jnp.float32)            # (D, D)
    w_down_k = jnp.pad(jnp.transpose(w_down, (1, 0)).astype(jnp.float32),
                       ((0, 0), (0, pad)))                                   # (D, Hpad)
    w_up_k = jnp.pad(jnp.transpose(w_up, (1, 0)).astype(jnp.float32),
                     ((0, pad), (0, 0)))                                     # (Hpad, D)

    # Fuse skip + down into one matmul weight.
    w1 = jnp.concatenate([w_skip_k, w_down_k], axis=1)                       # (D, D+Hpad)

    # Fold all three biases into one (exact up to f32 reassociation):
    #   skip + up = x@W_skip + (x@W_down)@W_up + (b_skip + b_up + b_down@W_up)
    b_total = (b_skip.astype(jnp.float32)
               + b_up.astype(jnp.float32)
               + jnp.dot(b_down.astype(jnp.float32),
                         jnp.transpose(w_up, (1, 0)).astype(jnp.float32))
               ).reshape(1, D)                                               # (1, D)

    return w1, w_up_k, b_total


def attractor_forward(x, prepared, N=1):
    """Eval-mode forward of Attractor (dropout == identity).

    x: (..., 512); prepared = prepare_attractor_params(params).
    """
    w1, w_up_k, b_total = prepared
    h_pad = w_up_k.shape[0]

    lead = x.shape[:-1]
    x2 = x.reshape(-1, D).astype(jnp.float32)    # (M, D)
    M = x2.shape[0]

    # Row tiling: pick the tile, pad M so every tile is full and stores are
    # fully dense (at minimum a multiple of 8 sublanes).
    m_tile = min(TM_MAX, _round_up(max(M, 1), 8))
    m_pad = _round_up(M, m_tile)
    if m_pad != M:
        x2 = jnp.pad(x2, ((0, m_pad - M), (0, 0)))
    grid = (m_pad // m_tile,)

    # TODO(synk): training-mode dropout (random mask + 1/(1-p) scale) not implemented.

    kernel = functools.partial(_attractor_kernel, n_iters=int(N))
    out = pl.pallas_call(
        kernel,
        out_shape=jax.ShapeDtypeStruct((m_pad, D), jnp.float32),
        grid=grid,
        in_specs=[
            pl.BlockSpec((m_tile, D), lambda i: (i, 0)),          # x tile
            pl.BlockSpec((D, D + h_pad), lambda i: (0, 0)),       # W1 (resident)
            pl.BlockSpec((h_pad, D), lambda i: (0, 0)),           # W_up (resident)
            pl.BlockSpec((1, D), lambda i: (0, 0)),               # b_total (resident)
        ],
        out_specs=pl.BlockSpec((m_tile, D), lambda i: (i, 0)),
        compiler_params=pltpu.CompilerParams(
            dimension_semantics=("parallel",),       # shard row tiles on v7x's 2 TCs
            vmem_limit_bytes=32 * 1024 * 1024,       # safe on v7x's 64 MiB/TC
        ),
    )(x2, w1, w_up_k, b_total)

    if m_pad != M:
        out = out[:M]
    return out.reshape(*lead, D)


# ----------------------------- reference (pure JAX/XLA) -----------------------------
def _attractor_ref(x, params, N):
    w_skip, b_skip, w_down, b_down, w_up, b_up = params
    for _ in range(N):
        skip = x @ w_skip.T + b_skip
        hidden = x @ w_down.T + b_down
        up = hidden @ w_up.T + b_up
        x = jnp.tanh(skip + up)
    return x


if __name__ == "__main__":
    key = jax.random.PRNGKey(0)
    k_x, k_ws, k_bs, k_wd, k_bd, k_wu, k_bu = jax.random.split(key, 7)

    B, H, N_ITERS = 16, 100, 3   # feature dim 512 and hidden 100 come from the module
    x = jax.random.normal(k_x, (B, D), dtype=jnp.float32)

    # Deterministic PyTorch-style init: U(-1/sqrt(fan_in), 1/sqrt(fan_in)).
    def uinit(k, shape, fan_in):
        bound = 1.0 / float(fan_in) ** 0.5
        return jax.random.uniform(k, shape, jnp.float32, -bound, bound)

    w_skip = uinit(k_ws, (D, D), D)
    b_skip = uinit(k_bs, (D,), D)
    w_down = uinit(k_wd, (H, D), D)
    b_down = uinit(k_bd, (H,), D)
    w_up = uinit(k_wu, (D, H), H)
    b_up = uinit(k_bu, (D,), H)
    params = (w_skip, b_skip, w_down, b_down, w_up, b_up)

    prepared = prepare_attractor_params(params)   # one-time weight prep
    out = attractor_forward(x, prepared, N=N_ITERS)
    out = jax.block_until_ready(out)

    ref = jax.block_until_ready(_attractor_ref(x, params, N_ITERS))

    assert out.shape == (B, D) and out.dtype == jnp.float32
    max_err = jnp.max(jnp.abs(out - ref))
    assert jnp.allclose(out, ref, atol=1e-4, rtol=1e-4), \
        f"mismatch: max abs err = {max_err}"

    print("KERNEL_OK")
</pallas_src>

<mosaic_0001>
module attributes {stable_mosaic.version = 11 : i64} {
  func.func @_attractor_kernel(%arg0: i32, %arg1: memref<16x512xf32, #tpu.memory_space<vmem>>, %arg2: memref<512x640xf32, #tpu.memory_space<vmem>>, %arg3: memref<128x512xf32, #tpu.memory_space<vmem>>, %arg4: memref<1x512xf32, #tpu.memory_space<vmem>>, %arg5: memref<16x512xf32, #tpu.memory_space<vmem>>) attributes {dimension_semantics = [#tpu.dimension_semantics<parallel>], iteration_bounds = array<i64: 1>, scalar_prefetch = 0 : i64, scratch_operands = 0 : i64, tpu.core_type = #tpu.core_type<tc>, window_params = [{transform_indices = @transform_0, window_bounds = array<i64: 16, 512>}, {pipeline_mode = #tpu.pipeline_mode<synchronous>, transform_indices = @transform_1, window_bounds = array<i64: 512, 640>}, {pipeline_mode = #tpu.pipeline_mode<synchronous>, transform_indices = @transform_2, window_bounds = array<i64: 128, 512>}, {pipeline_mode = #tpu.pipeline_mode<synchronous>, transform_indices = @transform_3, window_bounds = array<i64: 1, 512>}, {transform_indices = @transform_4, window_bounds = array<i64: 16, 512>}]} {
    %c0 = arith.constant 0 : index
    %c0_0 = arith.constant 0 : index
    %0 = vector.load %arg1[%c0, %c0_0] : memref<16x512xf32, #tpu.memory_space<vmem>>, vector<16x512xf32>
    %c0_1 = arith.constant 0 : index
    %c0_2 = arith.constant 0 : index
    %1 = vector.load %arg2[%c0_1, %c0_2] : memref<512x640xf32, #tpu.memory_space<vmem>>, vector<512x640xf32>
    %cst = arith.constant dense<0.000000e+00> : vector<16x640xf32>
    %2 = tpu.matmul %0, %1, %cst {dimension_numbers = #tpu.dot_dimension_numbers<[1], [0], [0], [1], [0, 0, 1, 1], [], []>} : vector<16x512xf32>, vector<512x640xf32>, vector<16x640xf32> -> vector<16x640xf32>
    %3 = vector.extract_strided_slice %2 {offsets = [0, 0], sizes = [16, 512], strides = [1, 1]} : vector<16x640xf32> to vector<16x512xf32>
    %4 = vector.extract_strided_slice %2 {offsets = [0, 512], sizes = [16, 128], strides = [1, 1]} : vector<16x640xf32> to vector<16x128xf32>
    %c0_3 = arith.constant 0 : index
    %c0_4 = arith.constant 0 : index
    %5 = vector.load %arg3[%c0_3, %c0_4] : memref<128x512xf32, #tpu.memory_space<vmem>>, vector<128x512xf32>
    %cst_5 = arith.constant dense<0.000000e+00> : vector<16x512xf32>
    %6 = tpu.matmul %4, %5, %cst_5 {dimension_numbers = #tpu.dot_dimension_numbers<[1], [0], [0], [1], [0, 0, 1, 1], [], []>} : vector<16x128xf32>, vector<128x512xf32>, vector<16x512xf32> -> vector<16x512xf32>
    %7 = arith.addf %3, %6 : vector<16x512xf32>
    %c0_6 = arith.constant 0 : index
    %c0_7 = arith.constant 0 : index
    %8 = vector.load %arg4[%c0_6, %c0_7] : memref<1x512xf32, #tpu.memory_space<vmem>>, vector<1x512xf32>
    %9 = vector.broadcast %8 : vector<1x512xf32> to vector<16x512xf32>
    %10 = arith.addf %7, %9 : vector<16x512xf32>
    %11 = math.tanh %10 : vector<16x512xf32>
    %c0_8 = arith.constant 0 : index
    %c0_9 = arith.constant 0 : index
    %12 = vector.load %arg2[%c0_8, %c0_9] : memref<512x640xf32, #tpu.memory_space<vmem>>, vector<512x640xf32>
    %cst_10 = arith.constant dense<0.000000e+00> : vector<16x640xf32>
    %13 = tpu.matmul %11, %12, %cst_10 {dimension_numbers = #tpu.dot_dimension_numbers<[1], [0], [0], [1], [0, 0, 1, 1], [], []>} : vector<16x512xf32>, vector<512x640xf32>, vector<16x640xf32> -> vector<16x640xf32>
    %14 = vector.extract_strided_slice %13 {offsets = [0, 0], sizes = [16, 512], strides = [1, 1]} : vector<16x640xf32> to vector<16x512xf32>
    %15 = vector.extract_strided_slice %13 {offsets = [0, 512], sizes = [16, 128], strides = [1, 1]} : vector<16x640xf32> to vector<16x128xf32>
    %c0_11 = arith.constant 0 : index
    %c0_12 = arith.constant 0 : index
    %16 = vector.load %arg3[%c0_11, %c0_12] : memref<128x512xf32, #tpu.memory_space<vmem>>, vector<128x512xf32>
    %cst_13 = arith.constant dense<0.000000e+00> : vector<16x512xf32>
    %17 = tpu.matmul %15, %16, %cst_13 {dimension_numbers = #tpu.dot_dimension_numbers<[1], [0], [0], [1], [0, 0, 1, 1], [], []>} : vector<16x128xf32>, vector<128x512xf32>, vector<16x512xf32> -> vector<16x512xf32>
    %18 = arith.addf %14, %17 : vector<16x512xf32>
    %c0_14 = arith.constant 0 : index
    %c0_15 = arith.constant 0 : index
    %19 = vector.load %arg4[%c0_14, %c0_15] : memref<1x512xf32, #tpu.memory_space<vmem>>, vector<1x512xf32>
    %20 = vector.broadcast %19 : vector<1x512xf32> to vector<16x512xf32>
    %21 = arith.addf %18, %20 : vector<16x512xf32>
    %22 = math.tanh %21 : vector<16x512xf32>
    %c0_16 = arith.constant 0 : index
    %c0_17 = arith.constant 0 : index
    %23 = vector.load %arg2[%c0_16, %c0_17] : memref<512x640xf32, #tpu.memory_space<vmem>>, vector<512x640xf32>
    %cst_18 = arith.constant dense<0.000000e+00> : vector<16x640xf32>
    %24 = tpu.matmul %22, %23, %cst_18 {dimension_numbers = #tpu.dot_dimension_numbers<[1], [0], [0], [1], [0, 0, 1, 1], [], []>} : vector<16x512xf32>, vector<512x640xf32>, vector<16x640xf32> -> vector<16x640xf32>
    %25 = vector.extract_strided_slice %24 {offsets = [0, 0], sizes = [16, 512], strides = [1, 1]} : vector<16x640xf32> to vector<16x512xf32>
    %26 = vector.extract_strided_slice %24 {offsets = [0, 512], sizes = [16, 128], strides = [1, 1]} : vector<16x640xf32> to vector<16x128xf32>
    %c0_19 = arith.constant 0 : index
    %c0_20 = arith.constant 0 : index
    %27 = vector.load %arg3[%c0_19, %c0_20] : memref<128x512xf32, #tpu.memory_space<vmem>>, vector<128x512xf32>
    %cst_21 = arith.constant dense<0.000000e+00> : vector<16x512xf32>
    %28 = tpu.matmul %26, %27, %cst_21 {dimension_numbers = #tpu.dot_dimension_numbers<[1], [0], [0], [1], [0, 0, 1, 1], [], []>} : vector<16x128xf32>, vector<128x512xf32>, vector<16x512xf32> -> vector<16x512xf32>
    %29 = arith.addf %25, %28 : vector<16x512xf32>
    %c0_22 = arith.constant 0 : index
    %c0_23 = arith.constant 0 : index
    %30 = vector.load %arg4[%c0_22, %c0_23] : memref<1x512xf32, #tpu.memory_space<vmem>>, vector<1x512xf32>
    %31 = vector.broadcast %30 : vector<1x512xf32> to vector<16x512xf32>
    %32 = arith.addf %29, %31 : vector<16x512xf32>
    %33 = math.tanh %32 : vector<16x512xf32>
    %c0_24 = arith.constant 0 : index
    %c0_25 = arith.constant 0 : index
    %34 = vector.load %arg5[%c0_24, %c0_25] : memref<16x512xf32, #tpu.memory_space<vmem>>, vector<16x512xf32>
    tpu.vector_store %arg5[%c0_24, %c0_25], %33 {strides = array<i32>} : memref<16x512xf32, #tpu.memory_space<vmem>>, vector<16x512xf32>,
    return
  }
  func.func @transform_0(%arg0: i32) -> (i32, i32) {
    %c0_i32 = arith.constant 0 : i32
    %c0_i32_0 = arith.constant 0 : i32
    return %arg0, %c0_i32 : i32, i32
  }
  func.func @transform_1(%arg0: i32) -> (i32, i32) {
    %c0_i32 = arith.constant 0 : i32
    %c0_i32_0 = arith.constant 0 : i32
    %c0_i32_1 = arith.constant 0 : i32
    return %c0_i32, %c0_i32_0 : i32, i32
  }
  func.func @transform_2(%arg0: i32) -> (i32, i32) {
    %c0_i32 = arith.constant 0 : i32
    %c0_i32_0 = arith.constant 0 : i32
    %c0_i32_1 = arith.constant 0 : i32
    return %c0_i32, %c0_i32_0 : i32, i32
  }
  func.func @transform_3(%arg0: i32) -> (i32, i32) {
    %c0_i32 = arith.constant 0 : i32
    %c0_i32_0 = arith.constant 0 : i32
    %c0_i32_1 = arith.constant 0 : i32
    return %c0_i32, %c0_i32_0 : i32, i32
  }
  func.func @transform_4(%arg0: i32) -> (i32, i32) {
    %c0_i32 = arith.constant 0 : i32
    %c0_i32_0 = arith.constant 0 : i32
    return %arg0, %c0_i32 : i32, i32
  }
}

</mosaic_0001>

<bundles_post_ra>
// kernel: tpu_custom_call.1
= control target key start
LH: loop header
LB: loop body
LE: loop exit
PB: predicated region body
PF: predicated region fallthrough
CT: control target
= control target key end

     0   :  { %9 = vsyncpa [#allocation3], 0  ;;  %s5240_s0 = inlined_call_operand.hbm [shape: f32[16,512], index: 0, kind: input, shape index: {}]   ;;  %s5241_s1 = inlined_call_operand.hbm [shape: f32[512,640], index: 1, kind: input, shape index: {}]   ;;  %s5242_s2 = inlined_call_operand.hbm [shape: f32[128,512], index: 2, kind: input, shape index: {}]   ;;  %s5243_s3 = inlined_call_operand.hbm [shape: f32[1,512], index: 3, kind: input, shape index: {}]   ;;  %s5244_s4 = inlined_call_operand.hbm [shape: f32[16,512], index: 4, kind: output, shape index: {}]  }
   0x1   :  { %10 = vsyncpa [#allocation6], 0 }
   0x2   :  { %11 = vsyncpa [#allocation9], 0 }
   0x3   :  { %12 = vsyncpa [#allocation4], 0  ;;  %s4024_s15 = smov [#allocation5]   ;;  %s3906_s19 = scalar_lea.hbm %s5241_s1, 40960 }
   0x4   :  { %s30_s16 = sshll.u32 %s4024_s15, 4  ;;  %p3907_p0 = scmp.ne.s32.totalorder %s5241_s1, %s3906_s19  ;;  %s31_s16 = int_to_ptr.vmem [resolvable:$true] %s30_s16 }
   0x5   :  { %p3910_p1 = scmp.lt.u32.totalorder %s3906_s19, %s5241_s1 }
   0x7   :  { %p3912_p2 = pnand %p3910_p1, %p3907_p0 }
   0x9   :  { %3915 = shalt.err (!%p3912_p2)
}
   0xa   :  { %s3916_s24 = scalar_lea.vmem %s31_s16, 40960  ;;  %p3921_p4 = scmp.lt.s32.totalorder %s31_s16, %s31_s16 }
   0xb   :  { %p3917_p3 = scmp.ne.s32.totalorder %s31_s16, %s3916_s24  ;;  %p3922_p5 = scmp.lt.s32.totalorder %s3916_s24, %s3916_s24 }
   0xd   :  { %p3923_p6 = por %p3922_p5, %p3921_p4 }
   0xf   :  { %p3924_p7 = pnand %p3923_p6, %p3917_p3 }
  0x11   :  { %3927 = shalt.err (!%p3924_p7)
}
  0x12   :  { %s4025_s25 = smov 640   ;;  %s4026_s26 = smov 40  }
  0x13   :  { %36 = dma.hbm_to_vmem [thread:$0]  %s5241_s1, 40960, %s31_s16, [#allocation6], %s4025_s25, %s4025_s25, %s4026_s26  }
  0x14   :  { %s4027_s29 = smov [#allocation2]   ;;  %s3928_s7 = scalar_lea.hbm %s5240_s0, 1024 }
  0x15   :  { %s18_s30 = sshll.u32 %s4027_s29, 4  ;;  %p3929_p8 = scmp.ne.s32.totalorder %s5240_s0, %s3928_s7  ;;  %s19_s30 = int_to_ptr.vmem [resolvable:$true] %s18_s30 }
  0x16   :  { %p3932_p9 = scmp.lt.u32.totalorder %s3928_s7, %s5240_s0 }
  0x18   :  { %p3934_p10 = pnand %p3932_p9, %p3929_p8 }
  0x1a   :  { %3937 = shalt.err (!%p3934_p10)
}
  0x1b   :  { %s3938_s12 = scalar_lea.vmem %s19_s30, 1024  ;;  %p3943_p12 = scmp.lt.s32.totalorder %s19_s30, %s19_s30 }
  0x1c   :  { %p3939_p11 = scmp.ne.s32.totalorder %s19_s30, %s3938_s12  ;;  %p3944_p13 = scmp.lt.s32.totalorder %s3938_s12, %s3938_s12 }
  0x1e   :  { %p3945_p0 = por %p3944_p13, %p3943_p12 }
  0x20   :  { %p3946_p1 = pnand %p3945_p0, %p3939_p11 }
  0x22   :  { %3949 = shalt.err (!%p3946_p1)
}
  0x23   :  { %s4028_s1 = smov 512   ;;  %s4029_s13 = smov 32  }
  0x24   :  { %24 = dma.hbm_to_vmem [thread:$0]  %s5240_s0, 1024, %s19_s30, [#allocation3], %s4028_s1, %s4028_s1, %s4029_s13  }
  0x25   :  { %s4030_s16 = smov [#allocation7]   ;;  %s4031_s18 = smov [#allocation8]  }
  0x26   :  { %s42_s17 = sshll.u32 %s4030_s16, 4  ;;  %s55_s19 = sshll.u32 %s4031_s18, 4  ;;  %s43_s17 = int_to_ptr.vmem [resolvable:$true] %s42_s17  ;;  %s56_s19 = int_to_ptr.vmem [resolvable:$true] %s55_s19 }
  0x27   :  { %s3950_s22 = scalar_lea.hbm %s5242_s2, 8192 }
  0x28   :  { %p3951_p2 = scmp.ne.s32.totalorder %s5242_s2, %s3950_s22  ;;  %p3954_p3 = scmp.lt.u32.totalorder %s3950_s22, %s5242_s2 }
  0x2a   :  { %p3956_p4 = pnand %p3954_p3, %p3951_p2 }
  0x2c   :  { %3959 = shalt.err (!%p3956_p4)
}
  0x2d   :  { %s3960_s0 = scalar_lea.vmem %s43_s17, 8192  ;;  %p3965_p6 = scmp.lt.s32.totalorder %s43_s17, %s43_s17 }
  0x2e   :  { %p3961_p5 = scmp.ne.s32.totalorder %s43_s17, %s3960_s0  ;;  %p3966_p7 = scmp.lt.s32.totalorder %s3960_s0, %s3960_s0 }
  0x30   :  { %p3967_p8 = por %p3966_p7, %p3965_p6 }
  0x32   :  { %p3968_p9 = pnand %p3967_p8, %p3961_p5 }
  0x34   :  { %3971 = shalt.err (!%p3968_p9)
}
  0x35   :  { %48 = dma.hbm_to_vmem [thread:$0]  %s5242_s2, 8192, %s43_s17, [#allocation6], %s4028_s1, %s4028_s1, %s4029_s13  }
  0x36   :  { %s3972_s5 = scalar_lea.hbm %s5243_s3, 64 }
  0x37   :  { %p3973_p10 = scmp.ne.s32.totalorder %s5243_s3, %s3972_s5  ;;  %p3976_p11 = scmp.lt.u32.totalorder %s3972_s5, %s5243_s3 }
  0x39   :  { %p3978_p12 = pnand %p3976_p11, %p3973_p10 }
  0x3b   :  { %3981 = shalt.err (!%p3978_p12)
}
  0x3c   :  { %s3982_s10 = scalar_lea.vmem %s56_s19, 64  ;;  %p3987_p0 = scmp.lt.s32.totalorder %s56_s19, %s56_s19 }
  0x3d   :  { %p3983_p13 = scmp.ne.s32.totalorder %s56_s19, %s3982_s10  ;;  %p3988_p1 = scmp.lt.s32.totalorder %s3982_s10, %s3982_s10 }
  0x3f   :  { %p3989_p2 = por %p3988_p1, %p3987_p0 }
  0x41   :  { %p3990_p3 = pnand %p3989_p2, %p3983_p13 }
  0x43   :  { %3993 = shalt.err (!%p3990_p3)
}
  0x44   :  { %58 = dma.hbm_to_vmem [thread:$0]  %s5243_s3, 64, %s56_s19, [#allocation9]  }
  0x45   :  { %4016 = dma.done.wait [#allocation3], 1024  }
  0x46   :  { %4017 = vsyncadd [#allocation3], 4294966272 }
  0x47   :  { %4018 = dma.done.wait [#allocation6], 49152  }
  0x48   :  { %4019 = vsyncadd [#allocation6], 4294918144 }
  0x49   :  { %4020 = dma.done.wait [#allocation9], 64  }
  0x4a   :  { %4021 = vsyncadd [#allocation9], 4294967232  ;;  %v80_v0 = vld [vmem:[#allocation5 + $0x8] sm:$0xff]  ;;  %v85_v1 = vld [vmem:[#allocation5 + $0x30] sm:$0xff]  ;;  %s4033_s3 = smov [#allocation10]  }
  0x4b   :  { %v82_v2 = vld [vmem:[#allocation5 + $0x18] sm:$0xff]  ;;  %v4113_v3 = vpack.c.bf16 %v85_v1, %v80_v0  ;;  %v87_v4 = vld [vmem:[#allocation5 + $0x40] sm:$0xff]  ;;  %v84_v6 = vld [vmem:[#allocation5 + $0x28] sm:$0xff]  ;;  %s2406_s12 = sshll.u32 %s4033_s3, 4  ;;  %s2407_s12 = int_to_ptr.vmem [resolvable:$true] %s2406_s12 }
  0x4c   :  { %v79_v5 = vld [vmem:[#allocation5] sm:$0xff]  ;;  %v4115_v7 = vpack.c.bf16 %v87_v4, %v82_v2  ;;  %v81_v9 = vld [vmem:[#allocation5 + $0x10] sm:$0xff]  ;;  %v86_v10 = vld [vmem:[#allocation5 + $0x38] sm:$0xff]  ;;  %s3994_s14 = scalar_lea.vmem %s2407_s12, 1024  ;;  %p3999_p5 = scmp.lt.s32.totalorder %s2407_s12, %s2407_s12 }
  0x4d   :  { %5554 = vst [vmem:[#allocation15_spill] sm:$0xff] %v4113_v3  ;;  %v4117_v8 = vpack.c.bf16 %v84_v6, %v79_v5  ;;  %v90_v11 = vld [vmem:[#allocation5 + $0x58] sm:$0xff]  ;;  %2649 = vmatprep.subr.bf16.mxu0 %v4113_v3  ;;  %v4120_v12 = vpack.c.bf16 %v86_v10, %v81_v9  ;;  %v95_v13 = vld [vmem:[#allocation5 + $0x80] sm:$0xff]  ;;  %v92_v14 = vld [vmem:[#allocation5 + $0x68] sm:$0xff]  ;;  %p3995_p4 = scmp.ne.s32.totalorder %s2407_s12, %s3994_s14  ;;  %p4000_p6 = scmp.lt.s32.totalorder %s3994_s14, %s3994_s14 }
  0x4e   :  { %5555 = vst [vmem:[#allocation16_spill] sm:$0xff] %v4115_v7  ;;  %v97_v15 = vld [vmem:[#allocation5 + $0x90] sm:$0xff]  ;;  %2777 = vmatprep.subr.bf16.mxu1 %v4115_v7  ;;  %v4124_v16 = vpack.c.bf16 %v95_v13, %v90_v11  ;;  %v94_v19 = vld [vmem:[#allocation5 + $0x78] sm:$0xff]  ;;  %v91_v20 = vld [vmem:[#allocation5 + $0x60] sm:$0xff] }
  0x4f   :  { %2651 = vmatpush1.bf16.msra.mxu0 %v4117_v8  ;;  %v4126_v17 = vpack.c.bf16 %v97_v15, %v92_v14  ;;  %v89_v18 = vld [vmem:[#allocation5 + $0x50] sm:$0xff]  ;;  %2779 = vmatpush1.bf16.msra.mxu1 %v4120_v12  ;;  %v96_v22 = vld [vmem:[#allocation5 + $0x88] sm:$0xff]  ;;  %v102_v27 = vld [vmem:[#allocation5 + $0xb8] sm:$0xff]  ;;  %p4001_p7 = por %p4000_p6, %p3999_p5 }
  0x50   :  { %v4129_v21 = vpack.c.bf16 %v94_v19, %v89_v18  ;;  %v100_v23 = vld [vmem:[#allocation5 + $0xa8] sm:$0xff]  ;;  %v105_v24 = vld [vmem:[#allocation5 + $0xd0] sm:$0xff]  ;;  %2653 = vmatprep.subr.bf16.mxu0 %v4124_v16  ;;  %v4133_v25 = vpack.c.bf16 %v96_v22, %v91_v20  ;;  %v107_v28 = vld [vmem:[#allocation5 + $0xe0] sm:$0xff] }
  0x51   :  { %2781 = vmatprep.subr.bf16.mxu1 %v4126_v17  ;;  %v4135_v26 = vpack.c.bf16 %v105_v24, %v100_v23  ;;  %v99_v29 = vld [vmem:[#allocation5 + $0xa0] sm:$0xff]  ;;  %v4137_v30 = vpack.c.bf16 %v107_v28, %v102_v27  ;;  %v104_v31 = vld [vmem:[#allocation5 + $0xc8] sm:$0xff]  ;;  %v101_v32 = vld [vmem:[#allocation5 + $0xb0] sm:$0xff]  ;;  %p4002_p8 = pnand %p4001_p7, %p3995_p4 }
  0x52   :  { %v106_v33 = vld [vmem:[#allocation5 + $0xd8] sm:$0xff]  ;;  %v4140_v34 = vpack.c.bf16 %v104_v31, %v99_v29  ;;  %v115_v36 = vld [vmem:[#allocation5 + $0x120] sm:$0xff]  ;;  %v112_v37 = vld [vmem:[#allocation5 + $0x108] sm:$0xff] }
  0x53   :  { %2655 = vmatpush1.bf16.msra.mxu0 %v4129_v21  ;;  %v110_v35 = vld [vmem:[#allocation5 + $0xf8] sm:$0xff]  ;;  %2783 = vmatpush1.bf16.msra.mxu1 %v4133_v25  ;;  %v4144_v38 = vpack.c.bf16 %v106_v33, %v101_v32  ;;  %v117_v40 = vld [vmem:[#allocation5 + $0x130] sm:$0xff]  ;;  %v111_v44 = vld [vmem:[#allocation5 + $0x100] sm:$0xff] }
  0x54   :  { %2657 = vmatprep.subr.bf16.mxu0 %v4135_v26  ;;  %v4146_v39 = vpack.c.bf16 %v115_v36, %v110_v35  ;;  %v109_v41 = vld [vmem:[#allocation5 + $0xf0] sm:$0xff]  ;;  %v114_v42 = vld [vmem:[#allocation5 + $0x118] sm:$0xff]  ;;  %2785 = vmatprep.subr.bf16.mxu1 %v4137_v30  ;;  %v4149_v43 = vpack.c.bf16 %v117_v40, %v112_v37  ;;  %v116_v45 = vld [vmem:[#allocation5 + $0x128] sm:$0xff] }
  0x55   :  { %v120_v46 = vld [vmem:[#allocation5 + $0x148] sm:$0xff]  ;;  %v125_v47 = vld [vmem:[#allocation5 + $0x170] sm:$0xff]  ;;  %v122_v48 = vld [vmem:[#allocation5 + $0x158] sm:$0xff]  ;;  %v4152_v50 = vpack.c.bf16 %v114_v42, %v109_v41  ;;  %v4156_v51 = vpack.c.bf16 %v116_v45, %v111_v44 }
  0x56   :  { %v127_v49 = vld [vmem:[#allocation5 + $0x180] sm:$0xff]  ;;  %v4158_v52 = vpack.c.bf16 %v125_v47, %v120_v46  ;;  %v124_v54 = vld [vmem:[#allocation5 + $0x168] sm:$0xff]  ;;  %v121_v55 = vld [vmem:[#allocation5 + $0x150] sm:$0xff] }
  0x57   :  { %2659 = vmatpush1.bf16.msra.mxu0 %v4140_v34  ;;  %2787 = vmatpush1.bf16.msra.mxu1 %v4144_v38  ;;  %v119_v53 = vld [vmem:[#allocation5 + $0x140] sm:$0xff]  ;;  %v4161_v56 = vpack.c.bf16 %v127_v49, %v122_v48  ;;  %v126_v57 = vld [vmem:[#allocation5 + $0x178] sm:$0xff]  ;;  %v132_v60 = vld [vmem:[#allocation5 + $0x1a8] sm:$0xff] }
  0x58   :  { %2661 = vmatprep.subr.bf16.mxu0 %v4146_v39  ;;  %2789 = vmatprep.subr.bf16.mxu1 %v4149_v43  ;;  %v130_v58 = vld [vmem:[#allocation5 + $0x198] sm:$0xff]  ;;  %v135_v59 = vld [vmem:[#allocation5 + $0x1c0] sm:$0xff]  ;;  %v137_v61 = vld [vmem:[#allocation5 + $0x1d0] sm:$0xff]  ;;  %v4164_v62 = vpack.c.bf16 %v124_v54, %v119_v53  ;;  %v4168_v63 = vpack.c.bf16 %v126_v57, %v121_v55 }
  0x59   :  { %v4170_v0 = vpack.c.bf16 %v135_v59, %v130_v58  ;;  %v129_v1 = vld [vmem:[#allocation5 + $0x190] sm:$0xff]  ;;  %v134_v2 = vld [vmem:[#allocation5 + $0x1b8] sm:$0xff]  ;;  %v131_v4 = vld [vmem:[#allocation5 + $0x1a0] sm:$0xff]  ;;  %v4173_v5 = vpack.c.bf16 %v137_v61, %v132_v60 }
  0x5a   :  { %v136_v6 = vld [vmem:[#allocation5 + $0x1c8] sm:$0xff]  ;;  %v145_v10 = vld [vmem:[#allocation5 + $0x210] sm:$0xff]  ;;  %v142_v11 = vld [vmem:[#allocation5 + $0x1f8] sm:$0xff]  ;;  %v4176_v14 = vpack.c.bf16 %v134_v2, %v129_v1 }
  0x5b   :  { %2663 = vmatpush1.bf16.msra.mxu0 %v4152_v50  ;;  %2791 = vmatpush1.bf16.msra.mxu1 %v4156_v51  ;;  %v140_v9 = vld [vmem:[#allocation5 + $0x1e8] sm:$0xff]  ;;  %v147_v13 = vld [vmem:[#allocation5 + $0x220] sm:$0xff]  ;;  %v4180_v15 = vpack.c.bf16 %v136_v6, %v131_v4  ;;  %v141_v22 = vld [vmem:[#allocation5 + $0x1f0] sm:$0xff] }
  0x5c   :  { %2665 = vmatprep.subr.bf16.mxu0 %v4158_v52  ;;  %2793 = vmatprep.subr.bf16.mxu1 %v4161_v56  ;;  %v4182_v18 = vpack.c.bf16 %v145_v10, %v140_v9  ;;  %v139_v19 = vld [vmem:[#allocation5 + $0x1e0] sm:$0xff]  ;;  %v144_v20 = vld [vmem:[#allocation5 + $0x208] sm:$0xff]  ;;  %v4185_v23 = vpack.c.bf16 %v147_v13, %v142_v11  ;;  %v146_v24 = vld [vmem:[#allocation5 + $0x218] sm:$0xff] }
  0x5d   :  { %v150_v27 = vld [vmem:[#allocation5 + $0x238] sm:$0xff]  ;;  %v155_v28 = vld [vmem:[#allocation5 + $0x260] sm:$0xff]  ;;  %v152_v29 = vld [vmem:[#allocation5 + $0x248] sm:$0xff]  ;;  %v4188_v32 = vpack.c.bf16 %v144_v20, %v139_v19  ;;  %v4192_v33 = vpack.c.bf16 %v146_v24, %v141_v22 }
  0x5e   :  { %v157_v31 = vld [vmem:[#allocation5 + $0x270] sm:$0xff]  ;;  %v4194_v35 = vpack.c.bf16 %v155_v28, %v150_v27  ;;  %v154_v37 = vld [vmem:[#allocation5 + $0x258] sm:$0xff]  ;;  %v151_v40 = vld [vmem:[#allocation5 + $0x240] sm:$0xff] }
  0x5f   :  { %2667 = vmatpush1.bf16.msra.mxu0 %v4164_v62  ;;  %2795 = vmatpush1.bf16.msra.mxu1 %v4168_v63  ;;  %v149_v36 = vld [vmem:[#allocation5 + $0x230] sm:$0xff]  ;;  %v4197_v41 = vpack.c.bf16 %v157_v31, %v152_v29  ;;  %v156_v42 = vld [vmem:[#allocation5 + $0x268] sm:$0xff]  ;;  %v162_v46 = vld [vmem:[#allocation5 + $0x298] sm:$0xff] }
  0x60   :  { %2669 = vmatprep.subr.bf16.mxu0 %v4170_v0  ;;  %2797 = vmatprep.subr.bf16.mxu1 %v4173_v5  ;;  %v160_v44 = vld [vmem:[#allocation5 + $0x288] sm:$0xff]  ;;  %v165_v45 = vld [vmem:[#allocation5 + $0x2b0] sm:$0xff]  ;;  %v167_v47 = vld [vmem:[#allocation5 + $0x2c0] sm:$0xff]  ;;  %v4200_v48 = vpack.c.bf16 %v154_v37, %v149_v36  ;;  %v4204_v49 = vpack.c.bf16 %v156_v42, %v151_v40 }
  0x61   :  { %v4206_v53 = vpack.c.bf16 %v165_v45, %v160_v44  ;;  %v159_v54 = vld [vmem:[#allocation5 + $0x280] sm:$0xff]  ;;  %v164_v55 = vld [vmem:[#allocation5 + $0x2a8] sm:$0xff]  ;;  %v161_v57 = vld [vmem:[#allocation5 + $0x290] sm:$0xff]  ;;  %v4209_v58 = vpack.c.bf16 %v167_v47, %v162_v46 }
  0x62   :  { %5556 = vst [vmem:[#allocation17_spill] sm:$0xff] %v4200_v48  ;;  %5557 = vst [vmem:[#allocation18_spill] sm:$0xff] %v4204_v49  ;;  %v166_v59 = vld [vmem:[#allocation5 + $0x2b8] sm:$0xff]  ;;  %v175_v61 = vld [vmem:[#allocation5 + $0x300] sm:$0xff]  ;;  %v4212_v4 = vpack.c.bf16 %v164_v55, %v159_v54 }
  0x63   :  { %2671 = vmatpush1.bf16.msra.mxu0 %v4176_v14  ;;  %2799 = vmatpush1.bf16.msra.mxu1 %v4180_v15  ;;  %5558 = vst [vmem:[#allocation19_spill] sm:$0xff] %v4206_v53  ;;  %5559 = vst [vmem:[#allocation20_spill] sm:$0xff] %v4209_v58  ;;  %v170_v60 = vld [vmem:[#allocation5 + $0x2d8] sm:$0xff]  ;;  %v172_v1 = vld [vmem:[#allocation5 + $0x2e8] sm:$0xff]  ;;  %v4216_v6 = vpack.c.bf16 %v166_v59, %v161_v57 }
  0x64   :  { %2673 = vmatprep.subr.bf16.mxu0 %v4182_v18  ;;  %2801 = vmatprep.subr.bf16.mxu1 %v4185_v23  ;;  %v177_v2 = vld [vmem:[#allocation5 + $0x310] sm:$0xff]  ;;  %5560 = vst [vmem:[#allocation21_spill] sm:$0xff] %v4212_v4  ;;  %v4218_v9 = vpack.c.bf16 %v175_v61, %v170_v60  ;;  %v174_v11 = vld [vmem:[#allocation5 + $0x2f8] sm:$0xff]  ;;  %v171_v13 = vld [vmem:[#allocation5 + $0x2e0] sm:$0xff] }
  0x65   :  { %5561 = vst [vmem:[#allocation22_spill] sm:$0xff] %v4216_v6  ;;  %v169_v10 = vld [vmem:[#allocation5 + $0x2d0] sm:$0xff]  ;;  %v4221_v19 = vpack.c.bf16 %v177_v2, %v172_v1  ;;  %v176_v20 = vld [vmem:[#allocation5 + $0x308] sm:$0xff]  ;;  %v182_v27 = vld [vmem:[#allocation5 + $0x338] sm:$0xff] }
  0x66   :  { %5562 = vst [vmem:[#allocation23_spill] sm:$0xff] %v4218_v9  ;;  %v180_v22 = vld [vmem:[#allocation5 + $0x328] sm:$0xff]  ;;  %v185_v24 = vld [vmem:[#allocation5 + $0x350] sm:$0xff]  ;;  %v187_v28 = vld [vmem:[#allocation5 + $0x360] sm:$0xff]  ;;  %v4224_v29 = vpack.c.bf16 %v174_v11, %v169_v10  ;;  %v4228_v31 = vpack.c.bf16 %v176_v20, %v171_v13 }
  0x67   :  { %2675 = vmatpush1.bf16.msra.mxu0 %v4188_v32  ;;  %2803 = vmatpush1.bf16.msra.mxu1 %v4192_v33  ;;  %5563 = vst [vmem:[#allocation24_spill] sm:$0xff] %v4221_v19  ;;  %v4230_v36 = vpack.c.bf16 %v185_v24, %v180_v22  ;;  %v179_v37 = vld [vmem:[#allocation5 + $0x320] sm:$0xff]  ;;  %v184_v40 = vld [vmem:[#allocation5 + $0x348] sm:$0xff]  ;;  %v181_v42 = vld [vmem:[#allocation5 + $0x330] sm:$0xff]  ;;  %v4233_v44 = vpack.c.bf16 %v187_v28, %v182_v27 }
  0x68   :  { %2677 = vmatprep.subr.bf16.mxu0 %v4194_v35  ;;  %2805 = vmatprep.subr.bf16.mxu1 %v4197_v41  ;;  %5564 = vst [vmem:[#allocation25_spill] sm:$0xff] %v4224_v29  ;;  %5565 = vst [vmem:[#allocation26_spill] sm:$0xff] %v4228_v31  ;;  %v186_v45 = vld [vmem:[#allocation5 + $0x358] sm:$0xff]  ;;  %v195_v47 = vld [vmem:[#allocation5 + $0x3a0] sm:$0xff]  ;;  %v4236_v57 = vpack.c.bf16 %v184_v40, %v179_v37 }
  0x69   :  { %5566 = vst [vmem:[#allocation27_spill] sm:$0xff] %v4230_v36  ;;  %5567 = vst [vmem:[#allocation28_spill] sm:$0xff] %v4233_v44  ;;  %v190_v46 = vld [vmem:[#allocation5 + $0x378] sm:$0xff]  ;;  %v192_v54 = vld [vmem:[#allocation5 + $0x388] sm:$0xff]  ;;  %v4240_v60 = vpack.c.bf16 %v186_v45, %v181_v42 }
  0x6a   :  { %v197_v55 = vld [vmem:[#allocation5 + $0x3b0] sm:$0xff]  ;;  %5568 = vst [vmem:[#allocation29_spill] sm:$0xff] %v4236_v57  ;;  %v4242_v61 = vpack.c.bf16 %v195_v47, %v190_v46  ;;  %v194_v1 = vld [vmem:[#allocation5 + $0x398] sm:$0xff]  ;;  %v191_v2 = vld [vmem:[#allocation5 + $0x380] sm:$0xff] }
  0x6b   :  { %2679 = vmatpush1.bf16.msra.mxu0 %v4200_v48  ;;  %2807 = vmatpush1.bf16.msra.mxu1 %v4204_v49  ;;  %v189_v59 = vld [vmem:[#allocation5 + $0x370] sm:$0xff]  ;;  %5569 = vst [vmem:[#allocation30_spill] sm:$0xff] %v4240_v60  ;;  %v196_v10 = vld [vmem:[#allocation5 + $0x3a8] sm:$0xff]  ;;  %v4245_v11 = vpack.c.bf16 %v197_v55, %v192_v54  ;;  %v202_v24 = vld [vmem:[#allocation5 + $0x3d8] sm:$0xff] }
  0x6c   :  { %2681 = vmatprep.subr.bf16.mxu0 %v4206_v53  ;;  %2809 = vmatprep.subr.bf16.mxu1 %v4209_v58  ;;  %5570 = vst [vmem:[#allocation31_spill] sm:$0xff] %v4242_v61  ;;  %v200_v13 = vld [vmem:[#allocation5 + $0x3c8] sm:$0xff]  ;;  %v205_v20 = vld [vmem:[#allocation5 + $0x3f0] sm:$0xff]  ;;  %v207_v27 = vld [vmem:[#allocation5 + $0x400] sm:$0xff]  ;;  %v4252_v28 = vpack.c.bf16 %v194_v1, %v189_v59  ;;  %v4256_v37 = vpack.c.bf16 %v196_v10, %v191_v2 }
  0x6d   :  { %5571 = vst [vmem:[#allocation32_spill] sm:$0xff] %v4245_v11  ;;  %v4247_v22 = vld [vmem:[#allocation2 + $0x8] sm:$0xff]  ;;  %v4258_v40 = vpack.c.bf16 %v205_v20, %v200_v13  ;;  %v199_v42 = vld [vmem:[#allocation5 + $0x3c0] sm:$0xff]  ;;  %v201_v46 = vld [vmem:[#allocation5 + $0x3d0] sm:$0xff]  ;;  %v4261_v47 = vpack.c.bf16 %v207_v27, %v202_v24 }
  0x6e   :  { %463 = vmatprep.mubr.f32.mxu0 %v4247_v22  ;;  %617 = vmatprep.mubr.f32.mxu1 %v4247_v22  ;;  %5572 = vst [vmem:[#allocation33_spill] sm:$0xff] %v4252_v28  ;;  %5573 = vst [vmem:[#allocation34_spill] sm:$0xff] %v4256_v37  ;;  %v204_v45 = vld [vmem:[#allocation5 + $0x3e8] sm:$0xff]  ;;  %v206_v54 = vld [vmem:[#allocation5 + $0x3f8] sm:$0xff] }
  0x6f   :  { %2683 = vmatpush1.bf16.msra.mxu0 %v4212_v4  ;;  %2811 = vmatpush1.bf16.msra.mxu1 %v4216_v6  ;;  %5574 = vst [vmem:[#allocation35_spill] sm:$0xff] %v4258_v40  ;;  %5575 = vst [vmem:[#allocation36_spill] sm:$0xff] %v4261_v47  ;;  %v210_v55 = vld [vmem:[#allocation5 + $0x418] sm:$0xff]  ;;  %v212_v59 = vld [vmem:[#allocation5 + $0x428] sm:$0xff]  ;;  %v4268_v2 = vpack.c.bf16 %v206_v54, %v201_v46 }
  0x70   :  { %2685 = vmatprep.subr.bf16.mxu0 %v4218_v9  ;;  %2813 = vmatprep.subr.bf16.mxu1 %v4221_v19  ;;  %v217_v1 = vld [vmem:[#allocation5 + $0x450] sm:$0xff]  ;;  %v214_v20 = vld [vmem:[#allocation5 + $0x438] sm:$0xff]  ;;  %v211_v24 = vld [vmem:[#allocation5 + $0x420] sm:$0xff] }
  0x71   :  { %5577 = vst [vmem:[#allocation38_spill] sm:$0xff] %v4268_v2  ;;  %v209_v13 = vld [vmem:[#allocation5 + $0x410] sm:$0xff]  ;;  %v4273_v27 = vpack.c.bf16 %v217_v1, %v212_v59  ;;  %v219_v54 = vld [vmem:[#allocation5 + $0x460] sm:$0xff]  ;;  %v188_v19 = vld [vmem:[#allocation5 + $0x368] sm:$0xff] }
  0x72   :  { %v221_v59 = vld [vmem:[#allocation5 + $0x470] sm:$0xff] }
  0x73   :  { %2687 = vmatpush1.bf16.msra.mxu0 %v4224_v29  ;;  %2815 = vmatpush1.bf16.msra.mxu1 %v4228_v31  ;;  %5579 = vst [vmem:[#allocation40_spill] sm:$0xff] %v4273_v27  ;;  %v322_v31 = vld [vmem:[#allocation5 + $0x798] sm:$0xff]  ;;  %v353_v9 = vld [vmem:[#allocation5 + $0x890] sm:$0xff] }
  0x74   :  { %2689 = vmatprep.subr.bf16.mxu0 %v4230_v36  ;;  %2817 = vmatprep.subr.bf16.mxu1 %v4233_v44  ;;  %v265_v44 = vld [vmem:[#allocation5 + $0x5d0] sm:$0xff]  ;;  %v4375_v36 = vld [vmem:[#allocation2 + $0x28] sm:$0xff]  ;;  %v330_v29 = vld [vmem:[#allocation5 + $0x7d8] sm:$0xff] }
  0x77   :  { %2691 = vmatpush1.bf16.msra.mxu0 %v4236_v57  ;;  %2819 = vmatpush1.bf16.msra.mxu1 %v4240_v60  ;;  %v215_v57 = vld [vmem:[#allocation5 + $0x440] sm:$0xff]  ;;  %v4264_v60 = vpack.c.bf16 %v204_v45, %v199_v42  ;;  %v222_v42 = vld [vmem:[#allocation5 + $0x478] sm:$0xff] }
  0x78   :  { %2693 = vmatprep.subr.bf16.mxu0 %v4242_v61  ;;  %2821 = vmatprep.subr.bf16.mxu1 %v4245_v11  ;;  %v4270_v10 = vpack.c.bf16 %v215_v57, %v210_v55  ;;  %v216_v11 = vld [vmem:[#allocation5 + $0x448] sm:$0xff]  ;;  %v227_v45 = vld [vmem:[#allocation5 + $0x4a0] sm:$0xff] }
  0x79   :  { %5576 = vst [vmem:[#allocation37_spill] sm:$0xff] %v4264_v60  ;;  %v220_v61 = vld [vmem:[#allocation5 + $0x468] sm:$0xff]  ;;  %v4280_v57 = vpack.c.bf16 %v216_v11, %v211_v24  ;;  %v4285_v1 = vpack.c.bf16 %v227_v45, %v222_v42  ;;  %v234_v24 = vld [vmem:[#allocation5 + $0x4d8] sm:$0xff]  ;;  %v231_v42 = vld [vmem:[#allocation5 + $0x4c0] sm:$0xff] }
  0x7a   :  { %5578 = vst [vmem:[#allocation39_spill] sm:$0xff] %v4270_v10  ;;  %v224_v55 = vld [vmem:[#allocation5 + $0x488] sm:$0xff] }
  0x7b   :  { %2695 = vmatpush1.bf16.msra.mxu0 %v4252_v28  ;;  %2823 = vmatpush1.bf16.msra.mxu1 %v4256_v37  ;;  %v225_v28 = vld [vmem:[#allocation5 + $0x490] sm:$0xff]  ;;  %v4276_v37 = vpack.c.bf16 %v214_v20, %v209_v13  ;;  %5581 = vst [vmem:[#allocation42_spill] sm:$0xff] %v4280_v57  ;;  %5583 = vst [vmem:[#allocation44_spill] sm:$0xff] %v4285_v1  ;;  %v232_v13 = vld [vmem:[#allocation5 + $0x4c8] sm:$0xff] }
  0x7c   :  { %2697 = vmatprep.subr.bf16.mxu0 %v4258_v40  ;;  %2825 = vmatprep.subr.bf16.mxu1 %v4261_v47  ;;  %v4282_v46 = vpack.c.bf16 %v225_v28, %v220_v61  ;;  %v226_v47 = vld [vmem:[#allocation5 + $0x498] sm:$0xff]  ;;  %v237_v20 = vld [vmem:[#allocation5 + $0x4f0] sm:$0xff] }
  0x7d   :  { %5580 = vst [vmem:[#allocation41_spill] sm:$0xff] %v4276_v37  ;;  %v230_v40 = vld [vmem:[#allocation5 + $0x4b8] sm:$0xff]  ;;  %v4292_v61 = vpack.c.bf16 %v226_v47, %v221_v59  ;;  %v229_v28 = vld [vmem:[#allocation5 + $0x4b0] sm:$0xff]  ;;  %v4297_v45 = vpack.c.bf16 %v237_v20, %v232_v13  ;;  %v239_v47 = vld [vmem:[#allocation5 + $0x500] sm:$0xff] }
  0x7e   :  { %5582 = vst [vmem:[#allocation43_spill] sm:$0xff] %v4282_v46  ;;  %v244_v59 = vld [vmem:[#allocation5 + $0x528] sm:$0xff]  ;;  %v241_v13 = vld [vmem:[#allocation5 + $0x510] sm:$0xff] }
  0x7f   :  { %2699 = vmatpush1.bf16.msra.mxu0 %v4264_v60  ;;  %2827 = vmatpush1.bf16.msra.mxu1 %v4268_v2  ;;  %v235_v60 = vld [vmem:[#allocation5 + $0x4e0] sm:$0xff]  ;;  %v4288_v2 = vpack.c.bf16 %v224_v55, %v219_v54  ;;  %5585 = vst [vmem:[#allocation46_spill] sm:$0xff] %v4292_v61  ;;  %5587 = vst [vmem:[#allocation48_spill] sm:$0xff] %v4297_v45  ;;  %v242_v54 = vld [vmem:[#allocation5 + $0x518] sm:$0xff] }
  0x80   :  { %2701 = vmatprep.subr.bf16.mxu0 %v4270_v10  ;;  %2829 = vmatprep.subr.bf16.mxu1 %v4273_v27  ;;  %v4294_v11 = vpack.c.bf16 %v235_v60, %v230_v40  ;;  %v236_v27 = vld [vmem:[#allocation5 + $0x4e8] sm:$0xff]  ;;  %v247_v55 = vld [vmem:[#allocation5 + $0x540] sm:$0xff] }
  0x81   :  { %5584 = vst [vmem:[#allocation45_spill] sm:$0xff] %v4288_v2  ;;  %v240_v10 = vld [vmem:[#allocation5 + $0x508] sm:$0xff]  ;;  %v4304_v60 = vpack.c.bf16 %v236_v27, %v231_v42  ;;  %v4309_v20 = vpack.c.bf16 %v247_v55, %v242_v54  ;;  %v4314_v27 = vpack.c.bf16 %v244_v59, %v239_v47  ;;  %v249_v42 = vld [vmem:[#allocation5 + $0x550] sm:$0xff]  ;;  %v254_v54 = vld [vmem:[#allocation5 + $0x578] sm:$0xff] }
  0x82   :  { %5586 = vst [vmem:[#allocation47_spill] sm:$0xff] %v4294_v11  ;;  %v251_v55 = vld [vmem:[#allocation5 + $0x560] sm:$0xff]  ;;  %v262_v47 = vld [vmem:[#allocation5 + $0x5b8] sm:$0xff] }
  0x83   :  { %2703 = vmatpush1.bf16.msra.mxu0 %v4276_v37  ;;  %2831 = vmatpush1.bf16.msra.mxu1 %v4280_v57  ;;  %v245_v37 = vld [vmem:[#allocation5 + $0x530] sm:$0xff]  ;;  %v4300_v57 = vpack.c.bf16 %v234_v24, %v229_v28  ;;  %5589 = vst [vmem:[#allocation50_spill] sm:$0xff] %v4304_v60  ;;  %5591 = vst [vmem:[#allocation52_spill] sm:$0xff] %v4309_v20  ;;  %v252_v28 = vld [vmem:[#allocation5 + $0x568] sm:$0xff] }
  0x84   :  { %2705 = vmatprep.subr.bf16.mxu0 %v4282_v46  ;;  %2833 = vmatprep.subr.bf16.mxu1 %v4285_v1  ;;  %v4306_v40 = vpack.c.bf16 %v245_v37, %v240_v10  ;;  %v246_v1 = vld [vmem:[#allocation5 + $0x538] sm:$0xff]  ;;  %v257_v24 = vld [vmem:[#allocation5 + $0x590] sm:$0xff]  ;;  %5592 = vst [vmem:[#allocation53_spill] sm:$0xff] %v4314_v27  ;;  %v267_v59 = vld [vmem:[#allocation5 + $0x5e0] sm:$0xff] }
  0x85   :  { %5588 = vst [vmem:[#allocation49_spill] sm:$0xff] %v4300_v57  ;;  %v250_v46 = vld [vmem:[#allocation5 + $0x558] sm:$0xff]  ;;  %v4318_v37 = vpack.c.bf16 %v246_v1, %v241_v13  ;;  %v259_v13 = vld [vmem:[#allocation5 + $0x5a0] sm:$0xff] }
  0x86   :  { %5590 = vst [vmem:[#allocation51_spill] sm:$0xff] %v4306_v40 }
  0x87   :  { %2707 = vmatpush1.bf16.msra.mxu0 %v4288_v2  ;;  %2835 = vmatpush1.bf16.msra.mxu1 %v4292_v61  ;;  %v255_v2 = vld [vmem:[#allocation5 + $0x580] sm:$0xff]  ;;  %5593 = vst [vmem:[#allocation54_spill] sm:$0xff] %v4318_v37 }
  0x88   :  { %2709 = vmatprep.subr.bf16.mxu0 %v4294_v11  ;;  %2837 = vmatprep.subr.bf16.mxu1 %v4297_v45  ;;  %v4312_v61 = vld [vmem:[#allocation2] sm:$0xff]  ;;  %v4320_v10 = vpack.c.bf16 %v255_v2, %v250_v46  ;;  %v4323_v45 = vpack.c.bf16 %v257_v24, %v252_v28  ;;  %v260_v11 = vld [vmem:[#allocation5 + $0x5a8] sm:$0xff]  ;;  %v4328_v2 = vpack.c.bf16 %v254_v54, %v249_v42  ;;  %v261_v24 = vld [vmem:[#allocation5 + $0x5b0] sm:$0xff] }
  0x89   :  { %v4334_v1 = vpack.c.bf16 %v265_v44, %v260_v11  ;;  %v264_v28 = vld [vmem:[#allocation5 + $0x5c8] sm:$0xff]  ;;  %v277_v54 = vld [vmem:[#allocation5 + $0x630] sm:$0xff] }
  0x8a   :  { %5594 = vst [vmem:[#allocation55_spill] sm:$0xff] %v4320_v10  ;;  %5595 = vst [vmem:[#allocation56_spill] sm:$0xff] %v4323_v45  ;;  %v272_v42 = vld [vmem:[#allocation5 + $0x608] sm:$0xff]  ;;  %v269_v11 = vld [vmem:[#allocation5 + $0x5f0] sm:$0xff] }
  0x8b   :  { %2711 = vmatpush1.bf16.msra.mxu0 %v4300_v57  ;;  %2839 = vmatpush1.bf16.msra.mxu1 %v4304_v60  ;;  %v256_v57 = vld [vmem:[#allocation5 + $0x588] sm:$0xff]  ;;  %5596 = vst [vmem:[#allocation57_spill] sm:$0xff] %v4328_v2  ;;  %5598 = vst [vmem:[#allocation59_spill] sm:$0xff] %v4334_v1  ;;  %v275_v60 = vld [vmem:[#allocation5 + $0x620] sm:$0xff] }
  0x8c   :  { %2713 = vmatprep.subr.bf16.mxu0 %v4306_v40  ;;  %2841 = vmatprep.subr.bf16.mxu1 %v4309_v20  ;;  %v4332_v46 = vpack.c.bf16 %v256_v57, %v251_v55  ;;  %v4337_v20 = vpack.c.bf16 %v267_v59, %v262_v47  ;;  %v270_v40 = vld [vmem:[#allocation5 + $0x5f8] sm:$0xff]  ;;  %v271_v47 = vld [vmem:[#allocation5 + $0x600] sm:$0xff]  ;;  %v4349_v59 = vpack.c.bf16 %v277_v54, %v272_v42  ;;  %v281_v42 = vld [vmem:[#allocation5 + $0x650] sm:$0xff] }
  0x8d   :  { %v4346_v57 = vpack.c.bf16 %v275_v60, %v270_v40  ;;  %v274_v55 = vld [vmem:[#allocation5 + $0x618] sm:$0xff] }
  0x8e   :  { %464 = vmatmul.mubr.f32.vlgmr.msra.gmra.mrb[0].mxu0 %v4312_v61  ;;  %618 = vmatmul.mubr.f32.vlgmr.msra.gmra.mrb[0].mxu1 %v4312_v61  ;;  %5597 = vst [vmem:[#allocation58_spill] sm:$0xff] %v4332_v46  ;;  %5599 = vst [vmem:[#allocation60_spill] sm:$0xff] %v4337_v20 }
  0x8f   :  { %2715 = vmatpush1.bf16.msra.mxu0 %v4314_v27  ;;  %2843 = vmatpush1.bf16.msra.mxu1 %v4318_v37  ;;  %v266_v27 = vld [vmem:[#allocation5 + $0x5d8] sm:$0xff]  ;;  %v4340_v37 = vpack.c.bf16 %v264_v28, %v259_v13  ;;  %5602 = vst [vmem:[#allocation63_spill] sm:$0xff] %v4346_v57  ;;  %5603 = vst [vmem:[#allocation64_spill] sm:$0xff] %v4349_v59  ;;  %v287_v28 = vld [vmem:[#allocation5 + $0x680] sm:$0xff] }
  0x90   :  { %2717 = vmatprep.subr.bf16.mxu0 %v4320_v10  ;;  %2845 = vmatprep.subr.bf16.mxu1 %v4323_v45  ;;  %v4344_v44 = vpack.c.bf16 %v266_v27, %v261_v24  ;;  %v276_v45 = vld [vmem:[#allocation5 + $0x628] sm:$0xff]  ;;  %v282_v13 = vld [vmem:[#allocation5 + $0x658] sm:$0xff]  ;;  %v279_v27 = vld [vmem:[#allocation5 + $0x640] sm:$0xff] }
  0x91   :  { %5600 = vst [vmem:[#allocation61_spill] sm:$0xff] %v4340_v37  ;;  %v280_v10 = vld [vmem:[#allocation5 + $0x648] sm:$0xff]  ;;  %v4356_v60 = vpack.c.bf16 %v276_v45, %v271_v47  ;;  %v4361_v54 = vpack.c.bf16 %v287_v28, %v282_v13  ;;  %v294_v47 = vld [vmem:[#allocation5 + $0x6b8] sm:$0xff]  ;;  %v291_v13 = vld [vmem:[#allocation5 + $0x6a0] sm:$0xff]  ;;  %469 = vmatprep.mubr.f32.mxu0 %v4375_v36  ;;  %623 = vmatprep.mubr.f32.mxu1 %v4375_v36 }
  0x92   :  { %5601 = vst [vmem:[#allocation62_spill] sm:$0xff] %v4344_v44  ;;  %v284_v24 = vld [vmem:[#allocation5 + $0x668] sm:$0xff] }
  0x93   :  { %2719 = vmatpush1.bf16.msra.mxu0 %v4328_v2  ;;  %2847 = vmatpush1.bf16.msra.mxu1 %v4332_v46  ;;  %v285_v2 = vld [vmem:[#allocation5 + $0x670] sm:$0xff]  ;;  %v4352_v46 = vpack.c.bf16 %v274_v55, %v269_v11  ;;  %5605 = vst [vmem:[#allocation66_spill] sm:$0xff] %v4356_v60  ;;  %5607 = vst [vmem:[#allocation68_spill] sm:$0xff] %v4361_v54  ;;  %v292_v11 = vld [vmem:[#allocation5 + $0x6a8] sm:$0xff] }
  0x94   :  { %2721 = vmatprep.subr.bf16.mxu0 %v4334_v1  ;;  %2849 = vmatprep.subr.bf16.mxu1 %v4337_v20  ;;  %v4358_v40 = vpack.c.bf16 %v285_v2, %v280_v10  ;;  %v286_v20 = vld [vmem:[#allocation5 + $0x678] sm:$0xff]  ;;  %v297_v55 = vld [vmem:[#allocation5 + $0x6d0] sm:$0xff] }
  0x95   :  { %5604 = vst [vmem:[#allocation65_spill] sm:$0xff] %v4352_v46  ;;  %v290_v1 = vld [vmem:[#allocation5 + $0x698] sm:$0xff]  ;;  %v4368_v45 = vpack.c.bf16 %v286_v20, %v281_v42  ;;  %v289_v2 = vld [vmem:[#allocation5 + $0x690] sm:$0xff]  ;;  %v4373_v28 = vpack.c.bf16 %v297_v55, %v292_v11 }
  0x96   :  { %5606 = vst [vmem:[#allocation67_spill] sm:$0xff] %v4358_v40  ;;  %v4378_v20 = vpack.c.bf16 %v294_v47, %v289_v2  ;;  %v301_v55 = vld [vmem:[#allocation5 + $0x6f0] sm:$0xff]  ;;  %v310_v47 = vld [vmem:[#allocation5 + $0x738] sm:$0xff] }
  0x97   :  { %2723 = vmatpush1.bf16.msra.mxu0 %v4340_v37  ;;  %2851 = vmatpush1.bf16.msra.mxu1 %v4344_v44  ;;  %v295_v37 = vld [vmem:[#allocation5 + $0x6c0] sm:$0xff]  ;;  %v4364_v44 = vpack.c.bf16 %v284_v24, %v279_v27  ;;  %5609 = vst [vmem:[#allocation70_spill] sm:$0xff] %v4368_v45  ;;  %5611 = vst [vmem:[#allocation72_spill] sm:$0xff] %v4373_v28  ;;  %v302_v27 = vld [vmem:[#allocation5 + $0x6f8] sm:$0xff] }
  0x98   :  { %2725 = vmatprep.subr.bf16.mxu0 %v4346_v57  ;;  %2853 = vmatprep.subr.bf16.mxu1 %v4349_v59  ;;  %v4370_v10 = vpack.c.bf16 %v295_v37, %v290_v1  ;;  %v296_v59 = vld [vmem:[#allocation5 + $0x6c8] sm:$0xff]  ;;  %v307_v24 = vld [vmem:[#allocation5 + $0x720] sm:$0xff]  ;;  %5612 = vst [vmem:[#allocation73_spill] sm:$0xff] %v4378_v20 }
  0x99   :  { %5608 = vst [vmem:[#allocation69_spill] sm:$0xff] %v4364_v44  ;;  %v300_v57 = vld [vmem:[#allocation5 + $0x6e8] sm:$0xff]  ;;  %v299_v37 = vld [vmem:[#allocation5 + $0x6e0] sm:$0xff]  ;;  %v4383_v42 = vpack.c.bf16 %v296_v59, %v291_v13  ;;  %v4390_v2 = vpack.c.bf16 %v307_v24, %v302_v27  ;;  %v309_v13 = vld [vmem:[#allocation5 + $0x730] sm:$0xff] }
  0x9a   :  { %5610 = vst [vmem:[#allocation71_spill] sm:$0xff] %v4370_v10  ;;  %v304_v1 = vld [vmem:[#allocation5 + $0x708] sm:$0xff]  ;;  %v314_v27 = vld [vmem:[#allocation5 + $0x758] sm:$0xff]  ;;  %v311_v24 = vld [vmem:[#allocation5 + $0x740] sm:$0xff] }
  0x9b   :  { %2727 = vmatpush1.bf16.msra.mxu0 %v4352_v46  ;;  %2855 = vmatpush1.bf16.msra.mxu1 %v4356_v60  ;;  %v305_v46 = vld [vmem:[#allocation5 + $0x710] sm:$0xff]  ;;  %5613 = vst [vmem:[#allocation74_spill] sm:$0xff] %v4383_v42  ;;  %5615 = vst [vmem:[#allocation76_spill] sm:$0xff] %v4390_v2  ;;  %v4393_v60 = vld [vmem:[#allocation2 + $0x18] sm:$0xff] }
  0x9c   :  { %2729 = vmatprep.subr.bf16.mxu0 %v4358_v40  ;;  %2857 = vmatprep.subr.bf16.mxu1 %v4361_v54  ;;  %v4385_v11 = vpack.c.bf16 %v305_v46, %v300_v57  ;;  %v306_v54 = vld [vmem:[#allocation5 + $0x718] sm:$0xff]  ;;  %v4387_v40 = vld [vmem:[#allocation2 + $0x20] sm:$0xff]  ;;  %v4398_v46 = vpack.c.bf16 %v304_v1, %v299_v37  ;;  %v320_v37 = vld [vmem:[#allocation5 + $0x788] sm:$0xff] }
  0x9d   :  { %470 = vmatmul.mubr.f32.gmra.mrb[2].mxu0 %v4387_v40  ;;  %624 = vmatmul.mubr.f32.gmra.mrb[2].mxu1 %v4387_v40  ;;  %v4403_v57 = vpack.c.bf16 %v306_v54, %v301_v55  ;;  %v325_v1 = vld [vmem:[#allocation5 + $0x7b0] sm:$0xff]  ;;  %v4412_v54 = vpack.c.bf16 %v314_v27, %v309_v13  ;;  %v332_v13 = vld [vmem:[#allocation5 + $0x7e8] sm:$0xff] }
  0x9e   :  { %5614 = vst [vmem:[#allocation75_spill] sm:$0xff] %v4385_v11  ;;  %5616 = vst [vmem:[#allocation77_spill] sm:$0xff] %v4398_v46  ;;  %540 = vmatprep.mubr.f32.mxu0 %v4393_v60  ;;  %694 = vmatprep.mubr.f32.mxu1 %v4393_v60  ;;  %v4418_v55 = vpack.c.bf16 %v325_v1, %v320_v37  ;;  %v337_v27 = vld [vmem:[#allocation5 + $0x810] sm:$0xff] }
  0x9f   :  { %2731 = vmatpush1.bf16.msra.mxu0 %v4364_v44  ;;  %2859 = vmatpush1.bf16.msra.mxu1 %v4368_v45  ;;  %v315_v44 = vld [vmem:[#allocation5 + $0x760] sm:$0xff]  ;;  %v312_v45 = vld [vmem:[#allocation5 + $0x748] sm:$0xff]  ;;  %5617 = vst [vmem:[#allocation78_spill] sm:$0xff] %v4403_v57  ;;  %5620 = vst [vmem:[#allocation81_spill] sm:$0xff] %v4412_v54  ;;  %v4433_v1 = vpack.c.bf16 %v337_v27, %v332_v13 }
  0xa0   :  { %2733 = vmatprep.subr.bf16.mxu0 %v4370_v10  ;;  %2861 = vmatprep.subr.bf16.mxu1 %v4373_v28  ;;  %v317_v10 = vld [vmem:[#allocation5 + $0x770] sm:$0xff]  ;;  %v4405_v59 = vpack.c.bf16 %v315_v44, %v310_v47  ;;  %5622 = vst [vmem:[#allocation83_spill] sm:$0xff] %v4418_v55 }
  0xa1   :  { %v4408_v28 = vpack.c.bf16 %v317_v10, %v312_v45  ;;  %v319_v45 = vld [vmem:[#allocation5 + $0x780] sm:$0xff]  ;;  %v324_v10 = vld [vmem:[#allocation5 + $0x7a8] sm:$0xff]  ;;  %v321_v47 = vld [vmem:[#allocation5 + $0x790] sm:$0xff]  ;;  %5627 = vst [vmem:[#allocation88_spill] sm:$0xff] %v4433_v1 }
  0xa2   :  { %5618 = vst [vmem:[#allocation79_spill] sm:$0xff] %v4405_v59  ;;  %v329_v37 = vld [vmem:[#allocation5 + $0x7d0] sm:$0xff] }
  0xa3   :  { %2735 = vmatpush1.bf16.msra.mxu0 %v4378_v20  ;;  %2863 = vmatpush1.bf16.msra.mxu1 %v4383_v42  ;;  %5619 = vst [vmem:[#allocation80_spill] sm:$0xff] %v4408_v28  ;;  %v316_v20 = vld [vmem:[#allocation5 + $0x768] sm:$0xff]  ;;  %v327_v42 = vld [vmem:[#allocation5 + $0x7c0] sm:$0xff]  ;;  %v341_v13 = vld [vmem:[#allocation5 + $0x830] sm:$0xff] }
  0xa4   :  { %2737 = vmatprep.subr.bf16.mxu0 %v4385_v11  ;;  %2865 = vmatprep.subr.bf16.mxu1 %v4390_v2  ;;  %v4416_v44 = vpack.c.bf16 %v316_v20, %v311_v24  ;;  %v4421_v2 = vpack.c.bf16 %v327_v42, %v322_v31  ;;  %v326_v11 = vld [vmem:[#allocation5 + $0x7b8] sm:$0xff]  ;;  %v331_v42 = vld [vmem:[#allocation5 + $0x7e0] sm:$0xff] }
  0xa5   :  { %v4428_v20 = vpack.c.bf16 %v326_v11, %v321_v47  ;;  %v334_v31 = vld [vmem:[#allocation5 + $0x7f8] sm:$0xff]  ;;  %v344_v47 = vld [vmem:[#allocation5 + $0x848] sm:$0xff] }
  0xa6   :  { %5621 = vst [vmem:[#allocation82_spill] sm:$0xff] %v4416_v44  ;;  %5623 = vst [vmem:[#allocation84_spill] sm:$0xff] %v4421_v2 }
  0xa7   :  { %2739 = vmatpush1.bf16.msra.mxu0 %v4398_v46  ;;  %2867 = vmatpush1.bf16.msra.mxu1 %v4403_v57  ;;  %v335_v46 = vld [vmem:[#allocation5 + $0x800] sm:$0xff]  ;;  %v4424_v57 = vpack.c.bf16 %v324_v10, %v319_v45  ;;  %5625 = vst [vmem:[#allocation86_spill] sm:$0xff] %v4428_v20  ;;  %v342_v45 = vld [vmem:[#allocation5 + $0x838] sm:$0xff] }
  0xa8   :  { %2741 = vmatprep.subr.bf16.mxu0 %v4405_v59  ;;  %2869 = vmatprep.subr.bf16.mxu1 %v4408_v28  ;;  %v4430_v24 = vpack.c.bf16 %v335_v46, %v330_v29  ;;  %v336_v28 = vld [vmem:[#allocation5 + $0x808] sm:$0xff]  ;;  %v347_v10 = vld [vmem:[#allocation5 + $0x860] sm:$0xff] }
  0xa9   :  { %5624 = vst [vmem:[#allocation85_spill] sm:$0xff] %v4424_v57  ;;  %v340_v59 = vld [vmem:[#allocation5 + $0x828] sm:$0xff]  ;;  %v4440_v29 = vpack.c.bf16 %v336_v28, %v331_v42  ;;  %v339_v46 = vld [vmem:[#allocation5 + $0x820] sm:$0xff]  ;;  %v4445_v27 = vpack.c.bf16 %v347_v10, %v342_v45  ;;  %v354_v42 = vld [vmem:[#allocation5 + $0x898] sm:$0xff] }
  0xaa   :  { %5626 = vst [vmem:[#allocation87_spill] sm:$0xff] %v4430_v24  ;;  %v351_v45 = vld [vmem:[#allocation5 + $0x880] sm:$0xff] }
  0xab   :  { %2743 = vmatpush1.bf16.msra.mxu0 %v4412_v54  ;;  %2871 = vmatpush1.bf16.msra.mxu1 %v4416_v44  ;;  %v345_v54 = vld [vmem:[#allocation5 + $0x850] sm:$0xff]  ;;  %v4436_v44 = vpack.c.bf16 %v334_v31, %v329_v37  ;;  %5629 = vst [vmem:[#allocation90_spill] sm:$0xff] %v4440_v29  ;;  %5631 = vst [vmem:[#allocation92_spill] sm:$0xff] %v4445_v27  ;;  %v352_v37 = vld [vmem:[#allocation5 + $0x888] sm:$0xff] }
  0xac   :  { %2745 = vmatprep.subr.bf16.mxu0 %v4418_v55  ;;  %2873 = vmatprep.subr.bf16.mxu1 %v4421_v2  ;;  %v4442_v11 = vpack.c.bf16 %v345_v54, %v340_v59  ;;  %v346_v2 = vld [vmem:[#allocation5 + $0x858] sm:$0xff]  ;;  %v357_v31 = vld [vmem:[#allocation5 + $0x8b0] sm:$0xff] }
  0xad   :  { %5628 = vst [vmem:[#allocation89_spill] sm:$0xff] %v4436_v44  ;;  %v350_v55 = vld [vmem:[#allocation5 + $0x878] sm:$0xff]  ;;  %v4452_v28 = vpack.c.bf16 %v346_v2, %v341_v13  ;;  %v349_v54 = vld [vmem:[#allocation5 + $0x870] sm:$0xff]  ;;  %v4457_v10 = vpack.c.bf16 %v357_v31, %v352_v37  ;;  %v364_v13 = vld [vmem:[#allocation5 + $0x8e8] sm:$0xff] }
  0xae   :  { %5630 = vst [vmem:[#allocation91_spill] sm:$0xff] %v4442_v11  ;;  %v361_v37 = vld [vmem:[#allocation5 + $0x8d0] sm:$0xff] }
  0xaf   :  { %2747 = vmatpush1.bf16.msra.mxu0 %v4424_v57  ;;  %2875 = vmatpush1.bf16.msra.mxu1 %v4428_v20  ;;  %v355_v57 = vld [vmem:[#allocation5 + $0x8a0] sm:$0xff]  ;;  %v4448_v20 = vpack.c.bf16 %v344_v47, %v339_v46  ;;  %5633 = vst [vmem:[#allocation94_spill] sm:$0xff] %v4452_v28  ;;  %5635 = vst [vmem:[#allocation96_spill] sm:$0xff] %v4457_v10  ;;  %v362_v46 = vld [vmem:[#allocation5 + $0x8d8] sm:$0xff] }
  0xb0   :  { %2749 = vmatprep.subr.bf16.mxu0 %v4430_v24  ;;  %2877 = vmatprep.subr.bf16.mxu1 %v4433_v1  ;;  %v4454_v59 = vpack.c.bf16 %v355_v57, %v350_v55  ;;  %v356_v1 = vld [vmem:[#allocation5 + $0x8a8] sm:$0xff]  ;;  %v367_v47 = vld [vmem:[#allocation5 + $0x900] sm:$0xff] }
  0xb1   :  { %5632 = vst [vmem:[#allocation93_spill] sm:$0xff] %v4448_v20  ;;  %v360_v24 = vld [vmem:[#allocation5 + $0x8c8] sm:$0xff]  ;;  %v4464_v2 = vpack.c.bf16 %v356_v1, %v351_v45  ;;  %v359_v55 = vld [vmem:[#allocation5 + $0x8c0] sm:$0xff]  ;;  %v4469_v31 = vpack.c.bf16 %v367_v47, %v362_v46  ;;  %v369_v1 = vld [vmem:[#allocation5 + $0x910] sm:$0xff] }
  0xb2   :  { %5634 = vst [vmem:[#allocation95_spill] sm:$0xff] %v4454_v59  ;;  %v374_v45 = vld [vmem:[#allocation5 + $0x938] sm:$0xff]  ;;  %v371_v46 = vld [vmem:[#allocation5 + $0x920] sm:$0xff] }
  0xb3   :  { %2751 = vmatpush1.bf16.msra.mxu0 %v4436_v44  ;;  %2879 = vmatpush1.bf16.msra.mxu1 %v4440_v29  ;;  %v365_v44 = vld [vmem:[#allocation5 + $0x8f0] sm:$0xff]  ;;  %v4460_v29 = vpack.c.bf16 %v354_v42, %v349_v54  ;;  %5637 = vst [vmem:[#allocation98_spill] sm:$0xff] %v4464_v2  ;;  %5639 = vst [vmem:[#allocation100_spill] sm:$0xff] %v4469_v31  ;;  %v372_v54 = vld [vmem:[#allocation5 + $0x928] sm:$0xff] }
  0xb4   :  { %2753 = vmatprep.subr.bf16.mxu0 %v4442_v11  ;;  %2881 = vmatprep.subr.bf16.mxu1 %v4445_v27  ;;  %v4466_v57 = vpack.c.bf16 %v365_v44, %v360_v24  ;;  %v366_v27 = vld [vmem:[#allocation5 + $0x8f8] sm:$0xff]  ;;  %v377_v42 = vld [vmem:[#allocation5 + $0x950] sm:$0xff] }
  0xb5   :  { %5636 = vst [vmem:[#allocation97_spill] sm:$0xff] %v4460_v29  ;;  %v370_v11 = vld [vmem:[#allocation5 + $0x918] sm:$0xff]  ;;  %v4476_v44 = vpack.c.bf16 %v366_v27, %v361_v37  ;;  %v4481_v47 = vpack.c.bf16 %v377_v42, %v372_v54  ;;  %v379_v27 = vld [vmem:[#allocation5 + $0x960] sm:$0xff]  ;;  %v384_v37 = vld [vmem:[#allocation5 + $0x988] sm:$0xff] }
  0xb6   :  { %5638 = vst [vmem:[#allocation99_spill] sm:$0xff] %v4466_v57  ;;  %v381_v54 = vld [vmem:[#allocation5 + $0x970] sm:$0xff] }
  0xb7   :  { %2755 = vmatpush1.bf16.msra.mxu0 %v4448_v20  ;;  %2883 = vmatpush1.bf16.msra.mxu1 %v4452_v28  ;;  %v375_v20 = vld [vmem:[#allocation5 + $0x940] sm:$0xff]  ;;  %v4472_v28 = vpack.c.bf16 %v364_v13, %v359_v55  ;;  %5641 = vst [vmem:[#allocation102_spill] sm:$0xff] %v4476_v44  ;;  %5643 = vst [vmem:[#allocation104_spill] sm:$0xff] %v4481_v47  ;;  %v382_v55 = vld [vmem:[#allocation5 + $0x978] sm:$0xff] }
  0xb8   :  { %2757 = vmatprep.subr.bf16.mxu0 %v4454_v59  ;;  %2885 = vmatprep.subr.bf16.mxu1 %v4457_v10  ;;  %v4478_v24 = vpack.c.bf16 %v375_v20, %v370_v11  ;;  %v376_v10 = vld [vmem:[#allocation5 + $0x948] sm:$0xff]  ;;  %v387_v13 = vld [vmem:[#allocation5 + $0x9a0] sm:$0xff] }
  0xb9   :  { %5640 = vst [vmem:[#allocation101_spill] sm:$0xff] %v4472_v28  ;;  %v380_v59 = vld [vmem:[#allocation5 + $0x968] sm:$0xff]  ;;  %v4488_v20 = vpack.c.bf16 %v376_v10, %v371_v46  ;;  %v4493_v42 = vpack.c.bf16 %v387_v13, %v382_v55  ;;  %v389_v10 = vld [vmem:[#allocation5 + $0x9b0] sm:$0xff]  ;;  %v394_v46 = vld [vmem:[#allocation5 + $0x9d8] sm:$0xff] }
  0xba   :  { %5642 = vst [vmem:[#allocation103_spill] sm:$0xff] %v4478_v24  ;;  %v391_v55 = vld [vmem:[#allocation5 + $0x9c0] sm:$0xff] }
  0xbb   :  { %2759 = vmatpush1.bf16.msra.mxu0 %v4460_v29  ;;  %2887 = vmatpush1.bf16.msra.mxu1 %v4464_v2  ;;  %v385_v29 = vld [vmem:[#allocation5 + $0x990] sm:$0xff]  ;;  %v4484_v2 = vpack.c.bf16 %v374_v45, %v369_v1  ;;  %5645 = vst [vmem:[#allocation106_spill] sm:$0xff] %v4488_v20  ;;  %5647 = vst [vmem:[#allocation108_spill] sm:$0xff] %v4493_v42  ;;  %v392_v1 = vld [vmem:[#allocation5 + $0x9c8] sm:$0xff] }
  0xbc   :  { %2761 = vmatprep.subr.bf16.mxu0 %v4466_v57  ;;  %2889 = vmatprep.subr.bf16.mxu1 %v4469_v31  ;;  %v4490_v11 = vpack.c.bf16 %v385_v29, %v380_v59  ;;  %v386_v31 = vld [vmem:[#allocation5 + $0x998] sm:$0xff]  ;;  %v397_v45 = vld [vmem:[#allocation5 + $0x9f0] sm:$0xff] }
  0xbd   :  { %5644 = vst [vmem:[#allocation105_spill] sm:$0xff] %v4484_v2  ;;  %v390_v57 = vld [vmem:[#allocation5 + $0x9b8] sm:$0xff]  ;;  %v4500_v29 = vpack.c.bf16 %v386_v31, %v381_v54  ;;  %v4505_v13 = vpack.c.bf16 %v397_v45, %v392_v1  ;;  %v83_v31 = vld [vmem:[#allocation5 + $0x20] sm:$0xff]  ;;  %v88_v54 = vld [vmem:[#allocation5 + $0x48] sm:$0xff] }
  0xbe   :  { %5646 = vst [vmem:[#allocation107_spill] sm:$0xff] %v4490_v11  ;;  %v243_v1 = vld [vmem:[#allocation5 + $0x520] sm:$0xff] }
  0xbf   :  { %2763 = vmatpush1.bf16.msra.mxu0 %v4472_v28  ;;  %2891 = vmatpush1.bf16.msra.mxu1 %v4476_v44  ;;  %v395_v28 = vld [vmem:[#allocation5 + $0x9e0] sm:$0xff]  ;;  %v4496_v44 = vpack.c.bf16 %v384_v37, %v379_v27  ;;  %5649 = vst [vmem:[#allocation110_spill] sm:$0xff] %v4500_v29  ;;  %5651 = vst [vmem:[#allocation112_spill] sm:$0xff] %v4505_v13  ;;  %v328_v37 = vld [vmem:[#allocation5 + $0x7c8] sm:$0xff] }
  0xc0   :  { %2765 = vmatprep.subr.bf16.mxu0 %v4478_v24  ;;  %2893 = vmatprep.subr.bf16.mxu1 %v4481_v47  ;;  %v4502_v59 = vpack.c.bf16 %v395_v28, %v390_v57  ;;  %v396_v47 = vld [vmem:[#allocation5 + $0x9e8] sm:$0xff]  ;;  %v163_v24 = vld [vmem:[#allocation5 + $0x2a0] sm:$0xff] }
  0xc1   :  { %5648 = vst [vmem:[#allocation109_spill] sm:$0xff] %v4496_v44  ;;  %v323_v27 = vld [vmem:[#allocation5 + $0x7a0] sm:$0xff]  ;;  %v4512_v28 = vpack.c.bf16 %v396_v47, %v391_v55  ;;  %v4522_v47 = vpack.c.bf16 %v88_v54, %v83_v31  ;;  %v93_v55 = vld [vmem:[#allocation5 + $0x70] sm:$0xff]  ;;  %v348_v54 = vld [vmem:[#allocation5 + $0x868] sm:$0xff] }
  0xc2   :  { %5650 = vst [vmem:[#allocation111_spill] sm:$0xff] %v4502_v59  ;;  %v4517_v45 = vpack.c.bf16 %v328_v37, %v323_v27  ;;  %v98_v27 = vld [vmem:[#allocation5 + $0x98] sm:$0xff]  ;;  %v253_v37 = vld [vmem:[#allocation5 + $0x570] sm:$0xff]  ;;  %v343_v31 = vld [vmem:[#allocation5 + $0x840] sm:$0xff] }
  0xc3   :  { %2767 = vmatpush1.bf16.msra.mxu0 %v4484_v2  ;;  %2895 = vmatpush1.bf16.msra.mxu1 %v4488_v20  ;;  %v168_v2 = vld [vmem:[#allocation5 + $0x2c8] sm:$0xff]  ;;  %v4508_v20 = vpack.c.bf16 %v394_v46, %v389_v10  ;;  %5653 = vst [vmem:[#allocation114_spill] sm:$0xff] %v4512_v28  ;;  %v333_v10 = vld [vmem:[#allocation5 + $0x7f0] sm:$0xff]  ;;  %v338_v46 = vld [vmem:[#allocation5 + $0x818] sm:$0xff] }
  0xc4   :  { %2769 = vmatprep.subr.bf16.mxu0 %v4490_v11  ;;  %2897 = vmatprep.subr.bf16.mxu1 %v4493_v42  ;;  %v4514_v57 = vpack.c.bf16 %v168_v2, %v163_v24  ;;  %5655 = vst [vmem:[#allocation116_spill] sm:$0xff] %v4517_v45  ;;  %v248_v42 = vld [vmem:[#allocation5 + $0x548] sm:$0xff]  ;;  %v173_v11 = vld [vmem:[#allocation5 + $0x2f0] sm:$0xff]  ;;  %5656 = vst [vmem:[#allocation117_spill] sm:$0xff] %v4522_v47 }
  0xc5   :  { %5652 = vst [vmem:[#allocation113_spill] sm:$0xff] %v4508_v20  ;;  %v4526_v2 = vpack.c.bf16 %v248_v42, %v243_v1 }
  0xc6   :  { %5654 = vst [vmem:[#allocation115_spill] sm:$0xff] %v4514_v57 }
  0xc7   :  { %2771 = vmatpush1.bf16.msra.mxu0 %v4496_v44  ;;  %2899 = vmatpush1.bf16.msra.mxu1 %v4500_v29  ;;  %v178_v44 = vld [vmem:[#allocation5 + $0x318] sm:$0xff]  ;;  %v4520_v29 = vld [vmem:[#allocation2 + $0x10] sm:$0xff]  ;;  %5657 = vst [vmem:[#allocation118_spill] sm:$0xff] %v4526_v2 }
  0xc8   :  { %2773 = vmatprep.subr.bf16.mxu0 %v4502_v59  ;;  %2901 = vmatprep.subr.bf16.mxu1 %v4505_v13  ;;  %v4528_v24 = vpack.c.bf16 %v178_v44, %v173_v11  ;;  %v4531_v13 = vpack.c.bf16 %v338_v46, %v333_v10  ;;  %v183_v59 = vld [vmem:[#allocation5 + $0x340] sm:$0xff]  ;;  %v4538_v44 = vpack.c.bf16 %v98_v27, %v93_v55  ;;  %v4540_v11 = vld [vmem:[#allocation2 + $0x30] sm:$0xff]  ;;  %v108_v46 = vld [vmem:[#allocation5 + $0xe8] sm:$0xff] }
  0xc9   :  { %v4546_v1 = vpack.c.bf16 %v188_v19, %v183_v59  ;;  %v103_v10 = vld [vmem:[#allocation5 + $0xc0] sm:$0xff]  ;;  %v193_v55 = vld [vmem:[#allocation5 + $0x390] sm:$0xff]  ;;  %v198_v27 = vld [vmem:[#allocation5 + $0x3b8] sm:$0xff] }
  0xca   :  { %5658 = vst [vmem:[#allocation119_spill] sm:$0xff] %v4528_v24  ;;  %5659 = vst [vmem:[#allocation120_spill] sm:$0xff] %v4531_v13  ;;  %v4555_v19 = vpack.c.bf16 %v108_v46, %v103_v10  ;;  %v4562_v59 = vpack.c.bf16 %v198_v27, %v193_v55  ;;  %v203_v10 = vld [vmem:[#allocation5 + $0x3e0] sm:$0xff]  ;;  %v208_v46 = vld [vmem:[#allocation5 + $0x408] sm:$0xff] }
  0xcb   :  { %2775 = vmatpush1.bf16.msra.mxu0 %v4508_v20  ;;  %2903 = vmatpush1.bf16.msra.mxu1 %v4512_v28  ;;  %v258_v20 = vld [vmem:[#allocation5 + $0x598] sm:$0xff]  ;;  %5660 = vst [vmem:[#allocation121_spill] sm:$0xff] %v4538_v44  ;;  %5662 = vst [vmem:[#allocation123_spill] sm:$0xff] %v4546_v1  ;;  %v128_v55 = vld [vmem:[#allocation5 + $0x188] sm:$0xff] }
  0xcc   :  { %2905 = vmatprep.subr.bf16.mxu0 %v4514_v57  ;;  %2937 = vmatprep.subr.bf16.mxu1 %v4517_v45  ;;  %v4534_v28 = vld [vmem:[#allocation2 + $0x38] sm:$0xff]  ;;  %v4544_v42 = vpack.c.bf16 %v258_v20, %v253_v37  ;;  %v263_v45 = vld [vmem:[#allocation5 + $0x5c0] sm:$0xff]  ;;  %v4549_v57 = vpack.c.bf16 %v348_v54, %v343_v31  ;;  %5664 = vst [vmem:[#allocation125_spill] sm:$0xff] %v4555_v19  ;;  %5666 = vst [vmem:[#allocation127_spill] sm:$0xff] %v4562_v59 }
  0xcd   :  { %v113_v37 = vld [vmem:[#allocation5 + $0x110] sm:$0xff]  ;;  %v118_v31 = vld [vmem:[#allocation5 + $0x138] sm:$0xff]  ;;  %v283_v27 = vld [vmem:[#allocation5 + $0x660] sm:$0xff] }
  0xce   :  { %541 = vmatmul.mubr.f32.vlgmr.msra.gmra.mrb[0].mxu0 %v4520_v29  ;;  %695 = vmatmul.mubr.f32.vlgmr.msra.gmra.mrb[0].mxu1 %v4520_v29  ;;  %5661 = vst [vmem:[#allocation122_spill] sm:$0xff] %v4544_v42  ;;  %5663 = vst [vmem:[#allocation124_spill] sm:$0xff] %v4549_v57  ;;  %v273_v54 = vld [vmem:[#allocation5 + $0x610] sm:$0xff] }
  0xcf   :  { %2907 = vmatpush3.bf16.msra.mxu0 %v4522_v47  ;;  %2939 = vmatpush3.bf16.msra.mxu1 %v4526_v2  ;;  %v268_v47 = vld [vmem:[#allocation5 + $0x5e8] sm:$0xff]  ;;  %v358_v2 = vld [vmem:[#allocation5 + $0x8b8] sm:$0xff] }
  0xd0   :  { %2909 = vmatprep.subr.bf16.mxu0 %v4528_v24  ;;  %2941 = vmatprep.subr.bf16.mxu1 %v4531_v13  ;;  %v4560_v20 = vpack.c.bf16 %v268_v47, %v263_v45  ;;  %v4565_v13 = vpack.c.bf16 %v358_v2, %v353_v9  ;;  %v363_v24 = vld [vmem:[#allocation5 + $0x8e0] sm:$0xff]  ;;  %v4570_v45 = vpack.c.bf16 %v118_v31, %v113_v37  ;;  %v373_v37 = vld [vmem:[#allocation5 + $0x930] sm:$0xff]  ;;  %v378_v31 = vld [vmem:[#allocation5 + $0x958] sm:$0xff] }
  0xd1   :  { %546 = vmatprep.mubr.f32.mxu0 %v4534_v28  ;;  %700 = vmatprep.mubr.f32.mxu1 %v4534_v28  ;;  %v4576_v9 = vpack.c.bf16 %v208_v46, %v203_v10  ;;  %v123_v2 = vld [vmem:[#allocation5 + $0x160] sm:$0xff]  ;;  %v133_v10 = vld [vmem:[#allocation5 + $0x1b0] sm:$0xff]  ;;  %v4591_v46 = vpack.c.bf16 %v378_v31, %v373_v37 }
  0xd2   :  { %547 = vmatmul.mubr.f32.gmra.mrb[2].mxu0 %v4540_v11  ;;  %701 = vmatmul.mubr.f32.gmra.mrb[2].mxu1 %v4540_v11  ;;  %5665 = vst [vmem:[#allocation126_spill] sm:$0xff] %v4560_v20  ;;  %5667 = vst [vmem:[#allocation128_spill] sm:$0xff] %v4565_v13  ;;  %v303_v37 = vld [vmem:[#allocation5 + $0x700] sm:$0xff] }
  0xd3   :  { %2911 = vmatpush3.bf16.msra.mxu0 %v4538_v44  ;;  %2943 = vmatpush3.bf16.msra.mxu1 %v4544_v42  ;;  %v278_v44 = vld [vmem:[#allocation5 + $0x638] sm:$0xff]  ;;  %v368_v42 = vld [vmem:[#allocation5 + $0x908] sm:$0xff]  ;;  %5668 = vst [vmem:[#allocation129_spill] sm:$0xff] %v4570_v45  ;;  %5670 = vst [vmem:[#allocation131_spill] sm:$0xff] %v4576_v9 }
  0xd4   :  { %2913 = vmatprep.subr.bf16.mxu0 %v4546_v1  ;;  %2945 = vmatprep.subr.bf16.mxu1 %v4549_v57  ;;  %v4574_v47 = vpack.c.bf16 %v278_v44, %v273_v54  ;;  %v213_v57 = vld [vmem:[#allocation5 + $0x430] sm:$0xff]  ;;  %5675 = vst [vmem:[#allocation136_spill] sm:$0xff] %v4591_v46 }
  0xd5   :  { %771 = vmatprep.mubr.f32.mxu0 %v4247_v22  ;;  %846 = vmatprep.mubr.f32.mxu1 %v4393_v60  ;;  %v4579_v22 = vpack.c.bf16 %v368_v42, %v363_v24  ;;  %v288_v60 = vld [vmem:[#allocation5 + $0x688] sm:$0xff]  ;;  %v138_v24 = vld [vmem:[#allocation5 + $0x1d8] sm:$0xff]  ;;  %v293_v42 = vld [vmem:[#allocation5 + $0x6b0] sm:$0xff] }
  0xd6   :  { %5669 = vst [vmem:[#allocation130_spill] sm:$0xff] %v4574_v47  ;;  %v4586_v44 = vpack.c.bf16 %v288_v60, %v283_v27  ;;  %v143_v27 = vld [vmem:[#allocation5 + $0x200] sm:$0xff]  ;;  %v148_v60 = vld [vmem:[#allocation5 + $0x228] sm:$0xff] }
  0xd7   :  { %2915 = vmatpush3.bf16.msra.mxu0 %v4555_v19  ;;  %2947 = vmatpush3.bf16.msra.mxu1 %v4560_v20  ;;  %5671 = vst [vmem:[#allocation132_spill] sm:$0xff] %v4579_v22  ;;  %v218_v19 = vld [vmem:[#allocation5 + $0x458] sm:$0xff]  ;;  %v4582_v20 = vpack.c.bf16 %v128_v55, %v123_v2  ;;  %v383_v2 = vld [vmem:[#allocation5 + $0x980] sm:$0xff]  ;;  %v388_v55 = vld [vmem:[#allocation5 + $0x9a8] sm:$0xff] }
  0xd8   :  { %2917 = vmatprep.subr.bf16.mxu0 %v4562_v59  ;;  %2949 = vmatprep.subr.bf16.mxu1 %v4565_v13  ;;  %5673 = vst [vmem:[#allocation134_spill] sm:$0xff] %v4586_v44  ;;  %v4588_v54 = vpack.c.bf16 %v218_v19, %v213_v57  ;;  %v298_v13 = vld [vmem:[#allocation5 + $0x6d8] sm:$0xff]  ;;  %v223_v59 = vld [vmem:[#allocation5 + $0x480] sm:$0xff]  ;;  %v4603_v31 = vpack.c.bf16 %v388_v55, %v383_v2  ;;  %v313_v2 = vld [vmem:[#allocation5 + $0x750] sm:$0xff] }
  0xd9   :  { %5672 = vst [vmem:[#allocation133_spill] sm:$0xff] %v4582_v20  ;;  %v4598_v57 = vpack.c.bf16 %v298_v13, %v293_v42  ;;  %v158_v42 = vld [vmem:[#allocation5 + $0x278] sm:$0xff] }
  0xda   :  { %5674 = vst [vmem:[#allocation135_spill] sm:$0xff] %v4588_v54  ;;  %5679 = vst [vmem:[#allocation140_spill] sm:$0xff] %v4603_v31 }
  0xdb   :  { %2919 = vmatpush3.bf16.msra.mxu0 %v4570_v45  ;;  %2951 = vmatpush3.bf16.msra.mxu1 %v4574_v47  ;;  %v228_v45 = vld [vmem:[#allocation5 + $0x4a8] sm:$0xff]  ;;  %v4594_v47 = vpack.c.bf16 %v138_v24, %v133_v10  ;;  %5677 = vst [vmem:[#allocation138_spill] sm:$0xff] %v4598_v57  ;;  %v393_v10 = vld [vmem:[#allocation5 + $0x9d0] sm:$0xff]  ;;  %v398_v24 = vld [vmem:[#allocation5 + $0x9f8] sm:$0xff] }
  0xdc   :  { %2921 = vmatprep.subr.bf16.mxu0 %v4576_v9  ;;  %2953 = vmatprep.subr.bf16.mxu1 %v4579_v22  ;;  %v4600_v19 = vpack.c.bf16 %v228_v45, %v223_v59  ;;  %v308_v22 = vld [vmem:[#allocation5 + $0x728] sm:$0xff]  ;;  %v233_v9 = vld [vmem:[#allocation5 + $0x4d0] sm:$0xff]  ;;  %v4615_v55 = vpack.c.bf16 %v398_v24, %v393_v10  ;;  %v861_v10 = vld [vmem:[#allocation7 + $0x20] sm:$0xff] }
  0xdd   :  { %5676 = vst [vmem:[#allocation137_spill] sm:$0xff] %v4594_v47  ;;  %v4610_v13 = vpack.c.bf16 %v308_v22, %v303_v37  ;;  %v153_v45 = vld [vmem:[#allocation5 + $0x250] sm:$0xff]  ;;  %v857_v37 = vld [vmem:[#allocation7] sm:$0xff] }
  0xde   :  { %5678 = vst [vmem:[#allocation139_spill] sm:$0xff] %v4600_v19  ;;  %5682 = vst [vmem:[#allocation143_spill] sm:$0xff] %v4615_v55  ;;  %v859_v24 = vld [vmem:[#allocation7 + $0x10] sm:$0xff] }
  0xdf   :  { %2923 = vmatpush3.bf16.msra.mxu0 %v4582_v20  ;;  %2955 = vmatpush3.bf16.msra.mxu1 %v4586_v44  ;;  %v238_v20 = vld [vmem:[#allocation5 + $0x4f8] sm:$0xff]  ;;  %v4606_v44 = vpack.c.bf16 %v148_v60, %v143_v27 }
  0xe0   :  { %2925 = vmatprep.subr.bf16.mxu0 %v4588_v54  ;;  %2957 = vmatprep.subr.bf16.mxu1 %v4591_v46  ;;  %v4612_v59 = vpack.c.bf16 %v238_v20, %v233_v9  ;;  %v318_v46 = vld [vmem:[#allocation5 + $0x778] sm:$0xff]  ;;  %v858_v54 = vld [vmem:[#allocation7 + $0x8] sm:$0xff] }
  0xe1   :  { %5680 = vst [vmem:[#allocation141_spill] sm:$0xff] %v4606_v44  ;;  %v860_v27 = vld [vmem:[#allocation7 + $0x18] sm:$0xff]  ;;  %v4622_v20 = vpack.c.bf16 %v318_v46, %v313_v2  ;;  %v865_v2 = vld [vmem:[#allocation7 + $0x40] sm:$0xff] }
  0xe2   :  { %5681 = vst [vmem:[#allocation142_spill] sm:$0xff] %v4612_v59  ;;  %v864_v60 = vld [vmem:[#allocation7 + $0x38] sm:$0xff] }
  0xe3   :  { %2927 = vmatpush3.bf16.msra.mxu0 %v4594_v47  ;;  %2959 = vmatpush3.bf16.msra.mxu1 %v4598_v57  ;;  %v862_v47 = vld [vmem:[#allocation7 + $0x28] sm:$0xff]  ;;  %v4618_v57 = vpack.c.bf16 %v158_v42, %v153_v45  ;;  %5684 = vst [vmem:[#allocation145_spill] sm:$0xff] %v4622_v20  ;;  %v4627_v22 = vpack.c.bf16 %v864_v60, %v860_v27  ;;  %v868_v45 = vld [vmem:[#allocation7 + $0x58] sm:$0xff]  ;;  %v869_v27 = vld [vmem:[#allocation7 + $0x60] sm:$0xff] }
  0xe4   :  { %2929 = vmatprep.subr.bf16.mxu0 %v4600_v19  ;;  %2961 = vmatprep.subr.bf16.mxu1 %v4603_v31  ;;  %v4624_v9 = vpack.c.bf16 %v862_v47, %v858_v54  ;;  %v863_v31 = vld [vmem:[#allocation7 + $0x30] sm:$0xff]  ;;  %v866_v19 = vld [vmem:[#allocation7 + $0x48] sm:$0xff]  ;;  %v872_v42 = vld [vmem:[#allocation7 + $0x78] sm:$0xff]  ;;  %v4632_v47 = vpack.c.bf16 %v861_v10, %v857_v37 }
  0xe5   :  { %5683 = vst [vmem:[#allocation144_spill] sm:$0xff] %v4618_v57  ;;  %v4635_v54 = vpack.c.bf16 %v863_v31, %v859_v24  ;;  %v867_v60 = vld [vmem:[#allocation7 + $0x50] sm:$0xff]  ;;  %v876_v37 = vld [vmem:[#allocation7 + $0x98] sm:$0xff]  ;;  %v873_v31 = vld [vmem:[#allocation7 + $0x80] sm:$0xff] }
  0xe6   :  { %5685 = vst [vmem:[#allocation146_spill] sm:$0xff] %v4624_v9  ;;  %5686 = vst [vmem:[#allocation147_spill] sm:$0xff] %v4632_v47  ;;  %v880_v10 = vld [vmem:[#allocation7 + $0xb8] sm:$0xff]  ;;  %v875_v24 = vld [vmem:[#allocation7 + $0x90] sm:$0xff] }
  0xe7   :  { %2931 = vmatpush3.bf16.msra.mxu0 %v4606_v44  ;;  %2963 = vmatpush3.bf16.msra.mxu1 %v4610_v13  ;;  %v870_v44 = vld [vmem:[#allocation7 + $0x68] sm:$0xff]  ;;  %5687 = vst [vmem:[#allocation148_spill] sm:$0xff] %v4635_v54 }
  0xe8   :  { %2933 = vmatprep.subr.bf16.mxu0 %v4612_v59  ;;  %2965 = vmatprep.subr.bf16.mxu1 %v4615_v55  ;;  %v4637_v46 = vpack.c.bf16 %v870_v44, %v866_v19  ;;  %v871_v55 = vld [vmem:[#allocation7 + $0x70] sm:$0xff]  ;;  %v874_v59 = vld [vmem:[#allocation7 + $0x88] sm:$0xff]  ;;  %v4646_v44 = vpack.c.bf16 %v869_v27, %v865_v2  ;;  %v884_v2 = vld [vmem:[#allocation7 + $0xd8] sm:$0xff] }
  0xe9   :  { %v888_v27 = vld [vmem:[#allocation7 + $0xf8] sm:$0xff] }
  0xea   :  { %5688 = vst [vmem:[#allocation149_spill] sm:$0xff] %v4637_v46  ;;  %5690 = vst [vmem:[#allocation151_spill] sm:$0xff] %v4646_v44 }
  0xeb   :  { %2935 = vmatpush3.bf16.msra.mxu0 %v4618_v57  ;;  %2967 = vmatpush3.bf16.msra.mxu1 %v4622_v20  ;;  %v4640_v57 = vpack.c.bf16 %v872_v42, %v868_v45  ;;  %v878_v20 = vld [vmem:[#allocation7 + $0xa8] sm:$0xff] }
  0xec   :  { %2969 = vmatprep.subr.bf16.mxu0 %v4624_v9  ;;  %3001 = vmatprep.subr.bf16.mxu1 %v4627_v22  ;;  %v4652_v19 = vpack.c.bf16 %v878_v20, %v874_v59  ;;  %v882_v45 = vld [vmem:[#allocation7 + $0xc8] sm:$0xff]  ;;  %v881_v20 = vld [vmem:[#allocation7 + $0xc0] sm:$0xff] }
  0xed   :  { %5689 = vst [vmem:[#allocation150_spill] sm:$0xff] %v4640_v57  ;;  %v886_v42 = vld [vmem:[#allocation7 + $0xe8] sm:$0xff] }
  0xee   :  { %772 = vmatmul.mubr.f32.vlgmr.msra.gmra.mrb[4].mxu0 %v4312_v61  ;;  %847 = vmatmul.mubr.f32.vlgmr.msra.gmra.mrb[4].mxu1 %v4520_v29  ;;  %v4650_v61 = vpack.c.bf16 %v871_v55, %v867_v60  ;;  %5692 = vst [vmem:[#allocation153_spill] sm:$0xff] %v4652_v19  ;;  %v877_v29 = vld [vmem:[#allocation7 + $0xa0] sm:$0xff]  ;;  %v4666_v55 = vpack.c.bf16 %v886_v42, %v882_v45 }
  0xef   :  { %776 = vmatprep.mubr.f32.mxu0 %v4375_v36  ;;  %851 = vmatprep.mubr.f32.mxu1 %v4534_v28  ;;  %v4656_v36 = vpack.c.bf16 %v880_v10, %v876_v37  ;;  %v879_v28 = vld [vmem:[#allocation7 + $0xb0] sm:$0xff]  ;;  %v4660_v59 = vpack.c.bf16 %v877_v29, %v873_v31  ;;  %v885_v60 = vld [vmem:[#allocation7 + $0xe0] sm:$0xff]  ;;  %v892_v31 = vld [vmem:[#allocation7 + $0x118] sm:$0xff] }
  0xf0   :  { %2971 = vmatpush1.bf16.msra.mxu0 %v4632_v47  ;;  %3003 = vmatpush1.bf16.msra.mxu1 %v4635_v54  ;;  %5691 = vst [vmem:[#allocation152_spill] sm:$0xff] %v4650_v61  ;;  %5696 = vst [vmem:[#allocation157_spill] sm:$0xff] %v4666_v55  ;;  %v883_v37 = vld [vmem:[#allocation7 + $0xd0] sm:$0xff]  ;;  %v896_v29 = vld [vmem:[#allocation7 + $0x138] sm:$0xff] }
  0xf1   :  { %2973 = vmatprep.subr.bf16.mxu0 %v4637_v46  ;;  %3005 = vmatprep.subr.bf16.mxu1 %v4640_v57  ;;  %5693 = vst [vmem:[#allocation154_spill] sm:$0xff] %v4656_v36  ;;  %5694 = vst [vmem:[#allocation155_spill] sm:$0xff] %v4660_v59  ;;  %v887_v10 = vld [vmem:[#allocation7 + $0xf0] sm:$0xff]  ;;  %v890_v57 = vld [vmem:[#allocation7 + $0x108] sm:$0xff] }
  0xf2   :  { %777 = vmatmul.mubr.f32.gmra.mrb[6].mxu0 %v4387_v40  ;;  %852 = vmatmul.mubr.f32.gmra.mrb[6].mxu1 %v4540_v11  ;;  %v4664_v40 = vpack.c.bf16 %v879_v28, %v875_v24  ;;  %v4669_v11 = vpack.c.bf16 %v888_v27, %v884_v2  ;;  %v4676_v24 = vpack.c.bf16 %v887_v10, %v883_v37  ;;  %v889_v45 = vld [vmem:[#allocation7 + $0x100] sm:$0xff]  ;;  %v891_v2 = vld [vmem:[#allocation7 + $0x110] sm:$0xff] }
  0xf3   :  { %v893_v42 = vld [vmem:[#allocation7 + $0x120] sm:$0xff]  ;;  %v4681_v27 = vpack.c.bf16 %v896_v29, %v892_v31  ;;  %v899_v31 = vld [vmem:[#allocation7 + $0x150] sm:$0xff] }
  0xf4   :  { %2975 = vmatpush1.bf16.msra.mxu0 %v4646_v44  ;;  %3007 = vmatpush1.bf16.msra.mxu1 %v4650_v61  ;;  %5695 = vst [vmem:[#allocation156_spill] sm:$0xff] %v4664_v40  ;;  %5697 = vst [vmem:[#allocation158_spill] sm:$0xff] %v4669_v11  ;;  %v894_v44 = vld [vmem:[#allocation7 + $0x128] sm:$0xff]  ;;  %v4672_v61 = vpack.c.bf16 %v885_v60, %v881_v20  ;;  %v900_v20 = vld [vmem:[#allocation7 + $0x158] sm:$0xff] }
  0xf5   :  { %2977 = vmatprep.subr.bf16.mxu0 %v4652_v19  ;;  %3009 = vmatprep.subr.bf16.mxu1 %v4656_v36  ;;  %5699 = vst [vmem:[#allocation160_spill] sm:$0xff] %v4676_v24  ;;  %v4678_v28 = vpack.c.bf16 %v894_v44, %v890_v57  ;;  %5701 = vst [vmem:[#allocation162_spill] sm:$0xff] %v4681_v27  ;;  %v895_v36 = vld [vmem:[#allocation7 + $0x130] sm:$0xff]  ;;  %v898_v19 = vld [vmem:[#allocation7 + $0x148] sm:$0xff] }
  0xf6   :  { %5698 = vst [vmem:[#allocation159_spill] sm:$0xff] %v4672_v61  ;;  %v904_v60 = vld [vmem:[#allocation7 + $0x178] sm:$0xff]  ;;  %v4688_v57 = vpack.c.bf16 %v895_v36, %v891_v2  ;;  %v897_v37 = vld [vmem:[#allocation7 + $0x140] sm:$0xff] }
  0xf7   :  { %5700 = vst [vmem:[#allocation161_spill] sm:$0xff] %v4678_v28  ;;  %v901_v10 = vld [vmem:[#allocation7 + $0x160] sm:$0xff]  ;;  %v4693_v29 = vpack.c.bf16 %v904_v60, %v900_v20  ;;  %v907_v60 = vld [vmem:[#allocation7 + $0x190] sm:$0xff] }
  0xf8   :  { %2979 = vmatpush1.bf16.msra.mxu0 %v4660_v59  ;;  %3011 = vmatpush1.bf16.msra.mxu1 %v4664_v40  ;;  %v902_v59 = vld [vmem:[#allocation7 + $0x168] sm:$0xff]  ;;  %v4684_v40 = vpack.c.bf16 %v893_v42, %v889_v45  ;;  %5703 = vst [vmem:[#allocation164_spill] sm:$0xff] %v4688_v57  ;;  %v908_v45 = vld [vmem:[#allocation7 + $0x198] sm:$0xff]  ;;  %v909_v2 = vld [vmem:[#allocation7 + $0x1a0] sm:$0xff] }
  0xf9   :  { %2981 = vmatprep.subr.bf16.mxu0 %v4666_v55  ;;  %3013 = vmatprep.subr.bf16.mxu1 %v4669_v11  ;;  %v4690_v44 = vpack.c.bf16 %v902_v59, %v898_v19  ;;  %5705 = vst [vmem:[#allocation166_spill] sm:$0xff] %v4693_v29  ;;  %v903_v11 = vld [vmem:[#allocation7 + $0x170] sm:$0xff]  ;;  %v906_v55 = vld [vmem:[#allocation7 + $0x188] sm:$0xff]  ;;  %v912_v42 = vld [vmem:[#allocation7 + $0x1b8] sm:$0xff] }
  0xfa   :  { %5702 = vst [vmem:[#allocation163_spill] sm:$0xff] %v4684_v40  ;;  %v4700_v19 = vpack.c.bf16 %v903_v11, %v899_v31  ;;  %v905_v59 = vld [vmem:[#allocation7 + $0x180] sm:$0xff]  ;;  %v4705_v20 = vpack.c.bf16 %v912_v42, %v908_v45  ;;  %v920_v45 = vld [vmem:[#allocation7 + $0x1f8] sm:$0xff] }
  0xfb   :  { %5704 = vst [vmem:[#allocation165_spill] sm:$0xff] %v4690_v44  ;;  %v913_v42 = vld [vmem:[#allocation7 + $0x1c0] sm:$0xff] }
  0xfc   :  { %2983 = vmatpush1.bf16.msra.mxu0 %v4672_v61  ;;  %3015 = vmatpush1.bf16.msra.mxu1 %v4676_v24  ;;  %v910_v61 = vld [vmem:[#allocation7 + $0x1a8] sm:$0xff]  ;;  %v4696_v24 = vpack.c.bf16 %v901_v10, %v897_v37  ;;  %5707 = vst [vmem:[#allocation168_spill] sm:$0xff] %v4700_v19  ;;  %5709 = vst [vmem:[#allocation170_spill] sm:$0xff] %v4705_v20  ;;  %v4708_v37 = vpack.c.bf16 %v909_v2, %v905_v59  ;;  %v916_v10 = vld [vmem:[#allocation7 + $0x1d8] sm:$0xff] }
  0xfd   :  { %2985 = vmatprep.subr.bf16.mxu0 %v4678_v28  ;;  %3017 = vmatprep.subr.bf16.mxu1 %v4681_v27  ;;  %v4702_v36 = vpack.c.bf16 %v910_v61, %v906_v55  ;;  %v911_v27 = vld [vmem:[#allocation7 + $0x1b0] sm:$0xff]  ;;  %v914_v61 = vld [vmem:[#allocation7 + $0x1c8] sm:$0xff]  ;;  %v917_v59 = vld [vmem:[#allocation7 + $0x1e0] sm:$0xff]  ;;  %v4719_v2 = vpack.c.bf16 %v920_v45, %v916_v10 }
  0xfe   :  { %5706 = vst [vmem:[#allocation167_spill] sm:$0xff] %v4696_v24  ;;  %5710 = vst [vmem:[#allocation171_spill] sm:$0xff] %v4708_v37  ;;  %v4712_v11 = vpack.c.bf16 %v911_v27, %v907_v60  ;;  %v918_v55 = vld [vmem:[#allocation7 + $0x1e8] sm:$0xff]  ;;  %v915_v27 = vld [vmem:[#allocation7 + $0x1d0] sm:$0xff] }
  0xff   :  { %5708 = vst [vmem:[#allocation169_spill] sm:$0xff] %v4702_v36  ;;  %v4717_v31 = vpack.c.bf16 %v918_v55, %v914_v61  ;;  %5713 = vst [vmem:[#allocation174_spill] sm:$0xff] %v4719_v2  ;;  %v919_v60 = vld [vmem:[#allocation7 + $0x1f0] sm:$0xff]  ;;  %v5529_v61 = vmov 0.0  }
 0x100   :  { %2987 = vmatpush1.bf16.msra.mxu0 %v4684_v40  ;;  %3019 = vmatpush1.bf16.msra.mxu1 %v4688_v57  ;;  %5711 = vst [vmem:[#allocation172_spill] sm:$0xff] %v4712_v11 }
 0x101   :  { %2989 = vmatprep.subr.bf16.mxu0 %v4690_v44  ;;  %3021 = vmatprep.subr.bf16.mxu1 %v4693_v29  ;;  %5712 = vst [vmem:[#allocation173_spill] sm:$0xff] %v4717_v31 }
 0x102   :  { %985 = vmatprep.mubr.f32.mxu0 %v5529_v61  ;;  %1062 = vmatprep.mubr.f32.mxu1 %v5529_v61 }
 0x104   :  { %2991 = vmatpush1.bf16.msra.mxu0 %v4696_v24  ;;  %3023 = vmatpush1.bf16.msra.mxu1 %v4700_v19  ;;  %v4721_v19 = vpack.c.bf16 %v917_v59, %v913_v42 }
 0x105   :  { %2993 = vmatprep.subr.bf16.mxu0 %v4702_v36  ;;  %3025 = vmatprep.subr.bf16.mxu1 %v4705_v20  ;;  %v4724_v20 = vpack.c.bf16 %v919_v60, %v915_v27 }
 0x106   :  { %5714 = vst [vmem:[#allocation175_spill] sm:$0xff] %v4721_v19 }
 0x107   :  { %5715 = vst [vmem:[#allocation176_spill] sm:$0xff] %v4724_v20 }
 0x108   :  { %2995 = vmatpush1.bf16.msra.mxu0 %v4708_v37  ;;  %3027 = vmatpush1.bf16.msra.mxu1 %v4712_v11 }
 0x109   :  { %2997 = vmatprep.subr.bf16.mxu0 %v4717_v31  ;;  %3029 = vmatprep.subr.bf16.mxu1 %v4719_v2 }
 0x10c   :  { %2999 = vmatpush1.bf16.msra.mxu0 %v4721_v19  ;;  %3031 = vmatpush1.bf16.msra.mxu1 %v4724_v20 }
 0x10d   :  { %3033 = vmatprep.subr.bf16.mxu0 %v4113_v3  ;;  %3161 = vmatprep.subr.bf16.mxu1 %v4115_v7 }
 0x1c1   :  { %v2452_v55 = vpop.f32.mrb[4].mxu0  ;;  %v2490_v10 = vpop.f32.mrb[4].mxu1 }
 0x1c2   :  { %v2453_v45 = vpop.f32.mrb[5].mxu0  ;;  %v2491_v59 = vpop.f32.mrb[5].mxu1 }
 0x1c3   :  { %v2454_v42 = vadd.f32 %v2453_v45, %v2452_v55  ;;  %v2492_v27 = vadd.f32 %v2491_v59, %v2490_v10  ;;  %v5723_v55 = vld [vmem:[#allocation30_spill] sm:$0xff]  ;;  %v5724_v10 = vld [vmem:[#allocation31_spill] sm:$0xff]  ;;  %v5725_v45 = vld [vmem:[#allocation32_spill] sm:$0xff] }
 0x1c4   :  { %v5727_v59 = vld [vmem:[#allocation34_spill] sm:$0xff] }
 0x1c5   :  { %v2455_v60 = vpop.f32.mrb[6].mxu0  ;;  %v849_v2 = vadd.f32 %v2492_v27, %v2454_v42  ;;  %v2493_v19 = vpop.f32.mrb[6].mxu1  ;;  %v5726_v42 = vld [vmem:[#allocation33_spill] sm:$0xff]  ;;  %v5728_v27 = vld [vmem:[#allocation35_spill] sm:$0xff] }
 0x1c6   :  { %v2456_v31 = vpop.f32.mrb[7].mxu0  ;;  %v2494_v11 = vpop.f32.mrb[7].mxu1 }
 0x1c7   :  { %v2457_v20 = vadd.f32 %v2456_v31, %v2455_v60  ;;  %v2495_v3 = vadd.f32 %v2494_v11, %v2493_v19  ;;  %986 = vmatmul.mubr.f32.vlgmr.msra.gmra.mrb[0].mxu0 %v849_v2  ;;  %1063 = vmatmul.mubr.f32.vlgmr.msra.gmra.mrb[0].mxu1 %v849_v2  ;;  %v5718_v19 = vld [vmem:[#allocation25_spill] sm:$0xff]  ;;  %v5720_v11 = vld [vmem:[#allocation27_spill] sm:$0xff]  ;;  %v5721_v31 = vld [vmem:[#allocation28_spill] sm:$0xff] }
 0x1c8   :  { %991 = vmatprep.mubr.f32.mxu0 %v5529_v61  ;;  %1068 = vmatprep.mubr.f32.mxu1 %v5529_v61  ;;  %v5722_v2 = vld [vmem:[#allocation29_spill] sm:$0xff]  ;;  %v5729_v60 = vld [vmem:[#allocation36_spill] sm:$0xff] }
 0x1c9   :  { %v854_v7 = vadd.f32 %v2495_v3, %v2457_v20  ;;  %3035 = vmatpush1.bf16.msra.mxu0 %v4117_v8  ;;  %3163 = vmatpush1.bf16.msra.mxu1 %v4120_v12  ;;  %v5716_v3 = vld [vmem:[#allocation23_spill] sm:$0xff]  ;;  %v5719_v20 = vld [vmem:[#allocation26_spill] sm:$0xff]  ;;  %v5730_v61 = vld [vmem:[#allocation37_spill] sm:$0xff] }
 0x1ca   :  { %3037 = vmatprep.subr.bf16.mxu0 %v4124_v16  ;;  %3165 = vmatprep.subr.bf16.mxu1 %v4126_v17 }
 0x1cb   :  { %992 = vmatmul.mubr.f32.gmra.mrb[2].mxu0 %v854_v7  ;;  %1069 = vmatmul.mubr.f32.gmra.mrb[2].mxu1 %v854_v7  ;;  %v5717_v7 = vld [vmem:[#allocation24_spill] sm:$0xff] }
 0x1cd   :  { %3039 = vmatpush1.bf16.msra.mxu0 %v4129_v21  ;;  %3167 = vmatpush1.bf16.msra.mxu1 %v4133_v25 }
 0x1ce   :  { %3041 = vmatprep.subr.bf16.mxu0 %v4135_v26  ;;  %3169 = vmatprep.subr.bf16.mxu1 %v4137_v30 }
 0x1d1   :  { %3043 = vmatpush1.bf16.msra.mxu0 %v4140_v34  ;;  %3171 = vmatpush1.bf16.msra.mxu1 %v4144_v38 }
 0x1d2   :  { %3045 = vmatprep.subr.bf16.mxu0 %v4146_v39  ;;  %3173 = vmatprep.subr.bf16.mxu1 %v4149_v43 }
 0x1d5   :  { %3047 = vmatpush1.bf16.msra.mxu0 %v4152_v50  ;;  %3175 = vmatpush1.bf16.msra.mxu1 %v4156_v51 }
 0x1d6   :  { %3049 = vmatprep.subr.bf16.mxu0 %v4158_v52  ;;  %3177 = vmatprep.subr.bf16.mxu1 %v4161_v56 }
 0x1d9   :  { %3051 = vmatpush1.bf16.msra.mxu0 %v4164_v62  ;;  %3179 = vmatpush1.bf16.msra.mxu1 %v4168_v63 }
 0x1da   :  { %3053 = vmatprep.subr.bf16.mxu0 %v4170_v0  ;;  %3181 = vmatprep.subr.bf16.mxu1 %v4173_v5 }
 0x1dd   :  { %3055 = vmatpush1.bf16.msra.mxu0 %v4176_v14  ;;  %3183 = vmatpush1.bf16.msra.mxu1 %v4180_v15 }
 0x1de   :  { %3057 = vmatprep.subr.bf16.mxu0 %v4182_v18  ;;  %3185 = vmatprep.subr.bf16.mxu1 %v4185_v23 }
 0x1e1   :  { %3059 = vmatpush1.bf16.msra.mxu0 %v4188_v32  ;;  %3187 = vmatpush1.bf16.msra.mxu1 %v4192_v33 }
 0x1e2   :  { %3061 = vmatprep.subr.bf16.mxu0 %v4194_v35  ;;  %3189 = vmatprep.subr.bf16.mxu1 %v4197_v41 }
 0x1e5   :  { %3063 = vmatpush1.bf16.msra.mxu0 %v4200_v48  ;;  %3191 = vmatpush1.bf16.msra.mxu1 %v4204_v49  ;;  %v5763_v49 = vld [vmem:[#allocation68_spill] sm:$0xff]  ;;  %v5764_v48 = vld [vmem:[#allocation69_spill] sm:$0xff] }
 0x1e6   :  { %3065 = vmatprep.subr.bf16.mxu0 %v4206_v53  ;;  %3193 = vmatprep.subr.bf16.mxu1 %v4209_v58 }
 0x1e9   :  { %3067 = vmatpush1.bf16.msra.mxu0 %v4212_v4  ;;  %3195 = vmatpush1.bf16.msra.mxu1 %v4216_v6 }
 0x1ea   :  { %3069 = vmatprep.subr.bf16.mxu0 %v5716_v3  ;;  %3197 = vmatprep.subr.bf16.mxu1 %v5717_v7 }
 0x1ed   :  { %3071 = vmatpush1.bf16.msra.mxu0 %v5718_v19  ;;  %3199 = vmatpush1.bf16.msra.mxu1 %v5719_v20 }
 0x1ee   :  { %3073 = vmatprep.subr.bf16.mxu0 %v5720_v11  ;;  %3201 = vmatprep.subr.bf16.mxu1 %v5721_v31  ;;  %v5731_v11 = vld [vmem:[#allocation38_spill] sm:$0xff]  ;;  %v5732_v31 = vld [vmem:[#allocation39_spill] sm:$0xff] }
 0x1f1   :  { %3075 = vmatpush1.bf16.msra.mxu0 %v5722_v2  ;;  %3203 = vmatpush1.bf16.msra.mxu1 %v5723_v55  ;;  %v5733_v2 = vld [vmem:[#allocation40_spill] sm:$0xff]  ;;  %v5734_v55 = vld [vmem:[#allocation41_spill] sm:$0xff] }
 0x1f2   :  { %3077 = vmatprep.subr.bf16.mxu0 %v5724_v10  ;;  %3205 = vmatprep.subr.bf16.mxu1 %v5725_v45  ;;  %v5735_v10 = vld [vmem:[#allocation42_spill] sm:$0xff]  ;;  %v5736_v45 = vld [vmem:[#allocation43_spill] sm:$0xff] }
 0x1f5   :  { %3079 = vmatpush1.bf16.msra.mxu0 %v5726_v42  ;;  %3207 = vmatpush1.bf16.msra.mxu1 %v5727_v59  ;;  %v5737_v42 = vld [vmem:[#allocation44_spill] sm:$0xff]  ;;  %v5738_v59 = vld [vmem:[#allocation45_spill] sm:$0xff] }
 0x1f6   :  { %3081 = vmatprep.subr.bf16.mxu0 %v5728_v27  ;;  %3209 = vmatprep.subr.bf16.mxu1 %v5729_v60  ;;  %v5739_v27 = vld [vmem:[#allocation46_spill] sm:$0xff]  ;;  %v5740_v60 = vld [vmem:[#allocation47_spill] sm:$0xff] }
 0x1f9   :  { %3083 = vmatpush1.bf16.msra.mxu0 %v5730_v61  ;;  %3211 = vmatpush1.bf16.msra.mxu1 %v5731_v11  ;;  %v5741_v61 = vld [vmem:[#allocation48_spill] sm:$0xff]  ;;  %v5742_v11 = vld [vmem:[#allocation49_spill] sm:$0xff] }
 0x1fa   :  { %3085 = vmatprep.subr.bf16.mxu0 %v5732_v31  ;;  %3213 = vmatprep.subr.bf16.mxu1 %v5733_v2  ;;  %v5743_v31 = vld [vmem:[#allocation50_spill] sm:$0xff]  ;;  %v5744_v2 = vld [vmem:[#allocation51_spill] sm:$0xff] }
 0x1fd   :  { %3087 = vmatpush1.bf16.msra.mxu0 %v5734_v55  ;;  %3215 = vmatpush1.bf16.msra.mxu1 %v5735_v10  ;;  %v5745_v55 = vld [vmem:[#allocation52_spill] sm:$0xff]  ;;  %v1085_v10 = vlaneseq }
 0x1fe   :  { %3089 = vmatprep.subr.bf16.mxu0 %v5736_v45  ;;  %3217 = vmatprep.subr.bf16.mxu1 %v5737_v42  ;;  %v1083_v42 = vld [vmem:[#allocation8] sm:$0xf] }
 0x1ff   :  { %v1086_v45 = vshrl.u32 %v1085_v10, 7 }
 0x201   :  { %3091 = vmatpush1.bf16.msra.mxu0 %v5738_v59  ;;  %3219 = vmatpush1.bf16.msra.mxu1 %v5739_v27  ;;  %v1095_v20 = vsub.s32 2, %v1086_v45  ;;  %v1087_v59 = vsub.s32 0, %v1086_v45  ;;  %v1091_v27 = vsub.s32 1, %v1086_v45 }
 0x202   :  { %3093 = vmatprep.subr.bf16.mxu0 %v5740_v60  ;;  %3221 = vmatprep.subr.bf16.mxu1 %v5741_v61 }
 0x203   :  { %v4799_v19 = vrot.slane %v1083_v42, %v1095_v20  ;;  %v4801_v7 = vrot.slane %v1083_v42, %v1087_v59  ;;  %v4803_v60 = vrot.slane %v1083_v42, %v1091_v27 }
 0x205   :  { %3095 = vmatpush1.bf16.msra.mxu0 %v5742_v11  ;;  %3223 = vmatpush1.bf16.msra.mxu1 %v5743_v31  ;;  %5746 = vst [vmem:[#allocation177_spill] sm:$0xff] %v4801_v7  ;;  %5747 = vst [vmem:[#allocation178_spill] sm:$0xff] %v4803_v60  ;;  %v1099_v31 = vsub.s32 3, %v1086_v45 }
 0x206   :  { %3097 = vmatprep.subr.bf16.mxu0 %v5744_v2  ;;  %3225 = vmatprep.subr.bf16.mxu1 %v5745_v55 }
 0x207   :  { %v4809_v6 = vrot.slane %v1083_v42, %v1099_v31  ;;  %v5748_v31 = vld [vmem:[#allocation53_spill] sm:$0xff]  ;;  %v5750_v42 = vld [vmem:[#allocation55_spill] sm:$0xff] }
 0x29a   :  { %v987_v61 = vpop.f32.mrb[0].mxu0  ;;  %v4805_v11 = vpop.f32.mrb[0].mxu1 }
 0x29b   :  { %v989_v3 = vpop.f32.mrb[1].mxu0  ;;  %v1066_v2 = vpop.f32.mrb[1].mxu1  ;;  %v1105_v55 = vadd.f32 %v4801_v7, %v987_v61 }
 0x29c   :  { %v1106_v10 = vadd.f32 %v4803_v60, %v989_v3  ;;  %v1108_v53 = vadd.f32 %v4809_v6, %v1066_v2 }
 0x29e   :  { %v993_v20 = vpop.f32.mrb[2].mxu0  ;;  %v4811_v4 = vpop.f32.mrb[2].mxu1  ;;  %3858 = vtanh.f32 %v1106_v10 }
 0x29f   :  { %v995_v59 = vpop.f32.mrb[3].mxu0  ;;  %v4813_v58 = vpop.f32.mrb[3].mxu1  ;;  %3860 = vtanh.f32 %v1105_v55  ;;  %v1109_v27 = vadd.f32 %v4801_v7, %v993_v20  ;;  %v5749_v55 = vld [vmem:[#allocation54_spill] sm:$0xff]  ;;  %v5760_v7 = vld [vmem:[#allocation65_spill] sm:$0xff] }
 0x2a0   :  { %v1110_v45 = vadd.f32 %v4803_v60, %v995_v59  ;;  %v5752_v59 = vld [vmem:[#allocation57_spill] sm:$0xff]  ;;  %v5759_v60 = vld [vmem:[#allocation64_spill] sm:$0xff] }
 0x2a2   :  { %3862 = vtanh.f32 %v1110_v45  ;;  %v5754_v45 = vld [vmem:[#allocation59_spill] sm:$0xff] }
 0x2a3   :  { %3864 = vtanh.f32 %v1109_v27  ;;  %v5753_v27 = vld [vmem:[#allocation58_spill] sm:$0xff] }
 0x2a4   :  { %3866 = vtanh.f32 %v1108_v53  ;;  %v5751_v53 = vld [vmem:[#allocation56_spill] sm:$0xff] }
 0x2a8   :  { %v4818_v61 = vpop.eup %3858 }
 0x2a9   :  { %v4820_v3 = vpop.eup %3860  ;;  %1185 = vmatprep.mubr.f32.mxu0 %v4818_v61  ;;  %1339 = vmatprep.mubr.f32.mxu1 %v4818_v61 }
 0x2aa   :  { %1186 = vmatmul.mubr.f32.vlgmr.msra.gmra.mrb[8].mxu0 %v4820_v3  ;;  %1340 = vmatmul.mubr.f32.vlgmr.msra.gmra.mrb[8].mxu1 %v4820_v3 }
 0x2ab   :  { %3099 = vmatpush1.bf16.msra.mxu0 %v5748_v31  ;;  %3227 = vmatpush1.bf16.msra.mxu1 %v5749_v55  ;;  %v5757_v55 = vld [vmem:[#allocation62_spill] sm:$0xff]  ;;  %v5758_v31 = vld [vmem:[#allocation63_spill] sm:$0xff] }
 0x2ac   :  { %v4828_v2 = vpop.eup %3862  ;;  %3101 = vmatprep.subr.bf16.mxu0 %v5750_v42  ;;  %3229 = vmatprep.subr.bf16.mxu1 %v5751_v53  ;;  %v5755_v53 = vld [vmem:[#allocation60_spill] sm:$0xff]  ;;  %v5756_v42 = vld [vmem:[#allocation61_spill] sm:$0xff] }
 0x2ad   :  { %v4832_v10 = vpop.eup %3864  ;;  %1191 = vmatprep.mubr.f32.mxu0 %v4828_v2  ;;  %1345 = vmatprep.mubr.f32.mxu1 %v4828_v2 }
 0x2ae   :  { %1192 = vmatmul.mubr.f32.gmra.mrb[10].mxu0 %v4832_v10  ;;  %1346 = vmatmul.mubr.f32.gmra.mrb[10].mxu1 %v4832_v10  ;;  %v4838_v20 = vpop.eup %3866 }
 0x2af   :  { %3103 = vmatpush1.bf16.msra.mxu0 %v5752_v59  ;;  %3231 = vmatpush1.bf16.msra.mxu1 %v5753_v27  ;;  %v5761_v59 = vld [vmem:[#allocation66_spill] sm:$0xff]  ;;  %v5762_v27 = vld [vmem:[#allocation67_spill] sm:$0xff] }
 0x2b0   :  { %1262 = vmatprep.mubr.f32.mxu0 %v4838_v20  ;;  %1416 = vmatprep.mubr.f32.mxu1 %v4838_v20 }
 0x2b1   :  { %3105 = vmatprep.subr.bf16.mxu0 %v5754_v45  ;;  %3233 = vmatprep.subr.bf16.mxu1 %v5755_v53  ;;  %v5765_v45 = vld [vmem:[#allocation70_spill] sm:$0xff]  ;;  %v5766_v53 = vld [vmem:[#allocation71_spill] sm:$0xff] }
 0x2b3   :  { %3107 = vmatpush1.bf16.msra.mxu0 %v5756_v42  ;;  %3235 = vmatpush1.bf16.msra.mxu1 %v5757_v55  ;;  %v5767_v42 = vld [vmem:[#allocation72_spill] sm:$0xff]  ;;  %v5768_v55 = vld [vmem:[#allocation73_spill] sm:$0xff] }
 0x2b4   :  { %3109 = vmatprep.subr.bf16.mxu0 %v5758_v31  ;;  %3237 = vmatprep.subr.bf16.mxu1 %v5759_v60  ;;  %v5769_v31 = vld [vmem:[#allocation74_spill] sm:$0xff]  ;;  %v5770_v60 = vld [vmem:[#allocation75_spill] sm:$0xff] }
 0x2b7   :  { %3111 = vmatpush1.bf16.msra.mxu0 %v5760_v7  ;;  %3239 = vmatpush1.bf16.msra.mxu1 %v5761_v59  ;;  %v5771_v7 = vld [vmem:[#allocation76_spill] sm:$0xff]  ;;  %v5772_v59 = vld [vmem:[#allocation77_spill] sm:$0xff] }
 0x2b8   :  { %3113 = vmatprep.subr.bf16.mxu0 %v5762_v27  ;;  %3241 = vmatprep.subr.bf16.mxu1 %v5763_v49  ;;  %v5773_v27 = vld [vmem:[#allocation78_spill] sm:$0xff]  ;;  %v5774_v49 = vld [vmem:[#allocation79_spill] sm:$0xff] }
 0x2bb   :  { %3115 = vmatpush1.bf16.msra.mxu0 %v5764_v48  ;;  %3243 = vmatpush1.bf16.msra.mxu1 %v5765_v45  ;;  %v5775_v48 = vld [vmem:[#allocation80_spill] sm:$0xff]  ;;  %v5776_v45 = vld [vmem:[#allocation81_spill] sm:$0xff] }
 0x2bc   :  { %3117 = vmatprep.subr.bf16.mxu0 %v5766_v53  ;;  %3245 = vmatprep.subr.bf16.mxu1 %v5767_v42  ;;  %v5777_v53 = vld [vmem:[#allocation82_spill] sm:$0xff]  ;;  %v5778_v42 = vld [vmem:[#allocation83_spill] sm:$0xff] }
 0x2bf   :  { %3119 = vmatpush1.bf16.msra.mxu0 %v5768_v55  ;;  %3247 = vmatpush1.bf16.msra.mxu1 %v5769_v31  ;;  %v5779_v55 = vld [vmem:[#allocation84_spill] sm:$0xff]  ;;  %v5780_v31 = vld [vmem:[#allocation85_spill] sm:$0xff] }
 0x2c0   :  { %3121 = vmatprep.subr.bf16.mxu0 %v5770_v60  ;;  %3249 = vmatprep.subr.bf16.mxu1 %v5771_v7  ;;  %v5781_v60 = vld [vmem:[#allocation86_spill] sm:$0xff]  ;;  %v5782_v7 = vld [vmem:[#allocation87_spill] sm:$0xff] }
 0x2c3   :  { %3123 = vmatpush1.bf16.msra.mxu0 %v5772_v59  ;;  %3251 = vmatpush1.bf16.msra.mxu1 %v5773_v27  ;;  %v5783_v59 = vld [vmem:[#allocation88_spill] sm:$0xff]  ;;  %v5784_v27 = vld [vmem:[#allocation89_spill] sm:$0xff] }
 0x2c4   :  { %3125 = vmatprep.subr.bf16.mxu0 %v5774_v49  ;;  %3253 = vmatprep.subr.bf16.mxu1 %v5775_v48  ;;  %v5785_v49 = vld [vmem:[#allocation90_spill] sm:$0xff]  ;;  %v5786_v48 = vld [vmem:[#allocation91_spill] sm:$0xff] }
 0x2c7   :  { %3127 = vmatpush1.bf16.msra.mxu0 %v5776_v45  ;;  %3255 = vmatpush1.bf16.msra.mxu1 %v5777_v53  ;;  %v5787_v45 = vld [vmem:[#allocation92_spill] sm:$0xff]  ;;  %v5788_v53 = vld [vmem:[#allocation93_spill] sm:$0xff] }
 0x2c8   :  { %3129 = vmatprep.subr.bf16.mxu0 %v5778_v42  ;;  %3257 = vmatprep.subr.bf16.mxu1 %v5779_v55  ;;  %v5789_v42 = vld [vmem:[#allocation94_spill] sm:$0xff]  ;;  %v5790_v55 = vld [vmem:[#allocation95_spill] sm:$0xff] }
 0x2cb   :  { %3131 = vmatpush1.bf16.msra.mxu0 %v5780_v31  ;;  %3259 = vmatpush1.bf16.msra.mxu1 %v5781_v60  ;;  %v5791_v31 = vld [vmem:[#allocation96_spill] sm:$0xff]  ;;  %v5792_v60 = vld [vmem:[#allocation97_spill] sm:$0xff] }
 0x2cc   :  { %3133 = vmatprep.subr.bf16.mxu0 %v5782_v7  ;;  %3261 = vmatprep.subr.bf16.mxu1 %v5783_v59  ;;  %v5793_v7 = vld [vmem:[#allocation98_spill] sm:$0xff]  ;;  %v5794_v59 = vld [vmem:[#allocation99_spill] sm:$0xff] }
 0x2cf   :  { %3135 = vmatpush1.bf16.msra.mxu0 %v5784_v27  ;;  %3263 = vmatpush1.bf16.msra.mxu1 %v5785_v49  ;;  %v5795_v27 = vld [vmem:[#allocation100_spill] sm:$0xff] }
 0x2d0   :  { %3137 = vmatprep.subr.bf16.mxu0 %v5786_v48  ;;  %3265 = vmatprep.subr.bf16.mxu1 %v5787_v45  ;;  %v1107_v48 = vadd.f32 %v4799_v19, %v4805_v11  ;;  %v5796_v45 = vld [vmem:[#allocation101_spill] sm:$0xff]  ;;  %v5802_v11 = vld [vmem:[#allocation107_spill] sm:$0xff] }
 0x2d2   :  { %3868 = vtanh.f32 %v1107_v48  ;;  %v5807_v48 = vld [vmem:[#allocation112_spill] sm:$0xff] }
 0x2d3   :  { %3139 = vmatpush1.bf16.msra.mxu0 %v5788_v53  ;;  %3267 = vmatpush1.bf16.msra.mxu1 %v5789_v42  ;;  %v5797_v53 = vld [vmem:[#allocation102_spill] sm:$0xff]  ;;  %v5798_v42 = vld [vmem:[#allocation103_spill] sm:$0xff] }
 0x2d4   :  { %3141 = vmatprep.subr.bf16.mxu0 %v5790_v55  ;;  %3269 = vmatprep.subr.bf16.mxu1 %v5791_v31  ;;  %v1112_v55 = vadd.f32 %v4809_v6, %v4813_v58  ;;  %v5799_v31 = vld [vmem:[#allocation104_spill] sm:$0xff]  ;;  %v5805_v58 = vld [vmem:[#allocation110_spill] sm:$0xff] }
 0x2d6   :  { %3870 = vtanh.f32 %v1112_v55  ;;  %v5811_v55 = vld [vmem:[#allocation116_spill] sm:$0xff] }
 0x2d7   :  { %3143 = vmatpush1.bf16.msra.mxu0 %v5792_v60  ;;  %3271 = vmatpush1.bf16.msra.mxu1 %v5793_v7  ;;  %v5800_v7 = vld [vmem:[#allocation105_spill] sm:$0xff] }
 0x2d8   :  { %3145 = vmatprep.subr.bf16.mxu0 %v5794_v59  ;;  %3273 = vmatprep.subr.bf16.mxu1 %v5795_v27  ;;  %v1111_v59 = vadd.f32 %v4799_v19, %v4811_v4  ;;  %v5801_v27 = vld [vmem:[#allocation106_spill] sm:$0xff] }
 0x2d9   :  { %v5809_v4 = vld [vmem:[#allocation114_spill] sm:$0xff] }
 0x2da   :  { %3872 = vtanh.f32 %v1111_v59  ;;  %v5812_v59 = vld [vmem:[#allocation117_spill] sm:$0xff] }
 0x2db   :  { %3147 = vmatpush1.bf16.msra.mxu0 %v5796_v45  ;;  %3275 = vmatpush1.bf16.msra.mxu1 %v5797_v53  ;;  %v5803_v45 = vld [vmem:[#allocation108_spill] sm:$0xff]  ;;  %v5804_v53 = vld [vmem:[#allocation109_spill] sm:$0xff] }
 0x2dc   :  { %3149 = vmatprep.subr.bf16.mxu0 %v5798_v42  ;;  %3277 = vmatprep.subr.bf16.mxu1 %v5799_v31  ;;  %v5806_v42 = vld [vmem:[#allocation111_spill] sm:$0xff]  ;;  %v5808_v31 = vld [vmem:[#allocation113_spill] sm:$0xff] }
 0x2df   :  { %3151 = vmatpush1.bf16.msra.mxu0 %v5800_v7  ;;  %3279 = vmatpush1.bf16.msra.mxu1 %v5801_v27  ;;  %v5810_v7 = vld [vmem:[#allocation115_spill] sm:$0xff] }
 0x2e0   :  { %3153 = vmatprep.subr.bf16.mxu0 %v5802_v11  ;;  %3281 = vmatprep.subr.bf16.mxu1 %v5803_v45  ;;  %v3869_v11 = vpop.eup %3868 }
 0x2e1   :  { %v3871_v27 = vpop.eup %3870 }
 0x2e3   :  { %3155 = vmatpush1.bf16.msra.mxu0 %v5804_v53  ;;  %3283 = vmatpush1.bf16.msra.mxu1 %v5805_v58  ;;  %v5813_v58 = vld [vmem:[#allocation118_spill] sm:$0xff]  ;;  %v5823_v53 = vld [vmem:[#allocation129_spill] sm:$0xff] }
 0x2e4   :  { %3157 = vmatprep.subr.bf16.mxu0 %v5806_v42  ;;  %3285 = vmatprep.subr.bf16.mxu1 %v5807_v48  ;;  %v3873_v42 = vpop.eup %3872  ;;  %v5814_v48 = vld [vmem:[#allocation119_spill] sm:$0xff] }
 0x2e7   :  { %3159 = vmatpush1.bf16.msra.mxu0 %v5808_v31  ;;  %3287 = vmatpush1.bf16.msra.mxu1 %v5809_v4  ;;  %v5815_v31 = vld [vmem:[#allocation120_spill] sm:$0xff]  ;;  %v5820_v4 = vld [vmem:[#allocation126_spill] sm:$0xff] }
 0x2e8   :  { %3289 = vmatprep.subr.bf16.mxu0 %v5810_v7  ;;  %3321 = vmatprep.subr.bf16.mxu1 %v5811_v55  ;;  %v5816_v55 = vld [vmem:[#allocation121_spill] sm:$0xff]  ;;  %v5817_v7 = vld [vmem:[#allocation122_spill] sm:$0xff] }
 0x2ea   :  { %1263 = vmatmul.mubr.f32.vlgmr.msra.gmra.mrb[8].mxu0 %v3869_v11  ;;  %1417 = vmatmul.mubr.f32.vlgmr.msra.gmra.mrb[8].mxu1 %v3869_v11 }
 0x2eb   :  { %1268 = vmatprep.mubr.f32.mxu0 %v3871_v27  ;;  %1422 = vmatprep.mubr.f32.mxu1 %v3871_v27 }
 0x2ec   :  { %3291 = vmatpush3.bf16.msra.mxu0 %v5812_v59  ;;  %3323 = vmatpush3.bf16.msra.mxu1 %v5813_v58  ;;  %v5818_v59 = vld [vmem:[#allocation124_spill] sm:$0xff]  ;;  %v5819_v58 = vld [vmem:[#allocation125_spill] sm:$0xff] }
 0x2ed   :  { %3293 = vmatprep.subr.bf16.mxu0 %v5814_v48  ;;  %3325 = vmatprep.subr.bf16.mxu1 %v5815_v31  ;;  %v5821_v48 = vld [vmem:[#allocation127_spill] sm:$0xff]  ;;  %v5822_v31 = vld [vmem:[#allocation128_spill] sm:$0xff] }
 0x2ee   :  { %1269 = vmatmul.mubr.f32.gmra.mrb[10].mxu0 %v3873_v42  ;;  %1423 = vmatmul.mubr.f32.gmra.mrb[10].mxu1 %v3873_v42 }
 0x2ef   :  { %1493 = vmatprep.mubr.f32.mxu0 %v4818_v61  ;;  %1568 = vmatprep.mubr.f32.mxu1 %v4838_v20  ;;  %v5824_v61 = vld [vmem:[#allocation130_spill] sm:$0xff]  ;;  %v5825_v20 = vld [vmem:[#allocation131_spill] sm:$0xff] }
 0x2f0   :  { %3295 = vmatpush3.bf16.msra.mxu0 %v5816_v55  ;;  %3327 = vmatpush3.bf16.msra.mxu1 %v5817_v7  ;;  %v5826_v55 = vld [vmem:[#allocation132_spill] sm:$0xff]  ;;  %v5827_v7 = vld [vmem:[#allocation133_spill] sm:$0xff] }
 0x2f1   :  { %3297 = vmatprep.subr.bf16.mxu0 %v4546_v1  ;;  %3329 = vmatprep.subr.bf16.mxu1 %v5818_v59  ;;  %v5828_v1 = vld [vmem:[#allocation134_spill] sm:$0xff]  ;;  %v5829_v59 = vld [vmem:[#allocation135_spill] sm:$0xff] }
 0x2f4   :  { %3299 = vmatpush3.bf16.msra.mxu0 %v5819_v58  ;;  %3331 = vmatpush3.bf16.msra.mxu1 %v5820_v4  ;;  %v5830_v58 = vld [vmem:[#allocation136_spill] sm:$0xff]  ;;  %v5831_v4 = vld [vmem:[#allocation137_spill] sm:$0xff] }
 0x2f5   :  { %3301 = vmatprep.subr.bf16.mxu0 %v5821_v48  ;;  %3333 = vmatprep.subr.bf16.mxu1 %v5822_v31  ;;  %v5832_v48 = vld [vmem:[#allocation138_spill] sm:$0xff]  ;;  %v5833_v31 = vld [vmem:[#allocation139_spill] sm:$0xff] }
 0x2f8   :  { %3303 = vmatpush3.bf16.msra.mxu0 %v5823_v53  ;;  %3335 = vmatpush3.bf16.msra.mxu1 %v5824_v61  ;;  %v5834_v53 = vld [vmem:[#allocation140_spill] sm:$0xff]  ;;  %v5835_v61 = vld [vmem:[#allocation141_spill] sm:$0xff] }
 0x2f9   :  { %3305 = vmatprep.subr.bf16.mxu0 %v5825_v20  ;;  %3337 = vmatprep.subr.bf16.mxu1 %v5826_v55  ;;  %v5836_v55 = vld [vmem:[#allocation142_spill] sm:$0xff] }
 0x2fc   :  { %3307 = vmatpush3.bf16.msra.mxu0 %v5827_v7  ;;  %3339 = vmatpush3.bf16.msra.mxu1 %v5828_v1  ;;  %v5837_v7 = vld [vmem:[#allocation143_spill] sm:$0xff]  ;;  %v5838_v1 = vld [vmem:[#allocation144_spill] sm:$0xff] }
 0x2fd   :  { %3309 = vmatprep.subr.bf16.mxu0 %v5829_v59  ;;  %3341 = vmatprep.subr.bf16.mxu1 %v5830_v58  ;;  %v5839_v59 = vld [vmem:[#allocation145_spill] sm:$0xff] }
 0x300   :  { %3311 = vmatpush3.bf16.msra.mxu0 %v5831_v4  ;;  %3343 = vmatpush3.bf16.msra.mxu1 %v5832_v48 }
 0x301   :  { %3313 = vmatprep.subr.bf16.mxu0 %v5833_v31  ;;  %3345 = vmatprep.subr.bf16.mxu1 %v5834_v53 }
 0x304   :  { %3315 = vmatpush3.bf16.msra.mxu0 %v5835_v61  ;;  %3347 = vmatpush3.bf16.msra.mxu1 %v4610_v13 }
 0x305   :  { %3317 = vmatprep.subr.bf16.mxu0 %v5836_v55  ;;  %3349 = vmatprep.subr.bf16.mxu1 %v5837_v7  ;;  %v5840_v7 = vld [vmem:[#allocation150_spill] sm:$0xff] }
 0x308   :  { %3319 = vmatpush3.bf16.msra.mxu0 %v5838_v1  ;;  %3351 = vmatpush3.bf16.msra.mxu1 %v5839_v59 }
 0x309   :  { %3353 = vmatprep.subr.bf16.mxu0 %v4624_v9  ;;  %3385 = vmatprep.subr.bf16.mxu1 %v4627_v22  ;;  %v5841_v9 = vmov 0.0  }
 0x30b   :  { %1494 = vmatmul.mubr.f32.vlgmr.msra.gmra.mrb[12].mxu0 %v4820_v3  ;;  %1569 = vmatmul.mubr.f32.vlgmr.msra.gmra.mrb[12].mxu1 %v3869_v11  ;;  %v5842_v3 = vld [vmem:[#allocation151_spill] sm:$0xff]  ;;  %v5843_v11 = vld [vmem:[#allocation152_spill] sm:$0xff] }
 0x30c   :  { %1498 = vmatprep.mubr.f32.mxu0 %v4828_v2  ;;  %1573 = vmatprep.mubr.f32.mxu1 %v3871_v27  ;;  %v5844_v2 = vld [vmem:[#allocation153_spill] sm:$0xff]  ;;  %v5845_v27 = vld [vmem:[#allocation154_spill] sm:$0xff] }
 0x30d   :  { %3355 = vmatpush1.bf16.msra.mxu0 %v4632_v47  ;;  %3387 = vmatpush1.bf16.msra.mxu1 %v4635_v54  ;;  %v5846_v54 = vld [vmem:[#allocation155_spill] sm:$0xff]  ;;  %v5851_v47 = vld [vmem:[#allocation160_spill] sm:$0xff] }
 0x30e   :  { %3357 = vmatprep.subr.bf16.mxu0 %v4637_v46  ;;  %3389 = vmatprep.subr.bf16.mxu1 %v5840_v7  ;;  %v5847_v46 = vld [vmem:[#allocation156_spill] sm:$0xff]  ;;  %v5848_v7 = vld [vmem:[#allocation157_spill] sm:$0xff] }
 0x30f   :  { %1499 = vmatmul.mubr.f32.gmra.mrb[14].mxu0 %v4832_v10  ;;  %1574 = vmatmul.mubr.f32.gmra.mrb[14].mxu1 %v3873_v42  ;;  %v5849_v10 = vld [vmem:[#allocation158_spill] sm:$0xff]  ;;  %v5850_v42 = vld [vmem:[#allocation159_spill] sm:$0xff] }
 0x310   :  { %1643 = vmatprep.mubr.f32.mxu0 %v5841_v9  ;;  %1720 = vmatprep.mubr.f32.mxu1 %v5841_v9 }
 0x311   :  { %3359 = vmatpush1.bf16.msra.mxu0 %v5842_v3  ;;  %3391 = vmatpush1.bf16.msra.mxu1 %v5843_v11  ;;  %v5852_v3 = vld [vmem:[#allocation162_spill] sm:$0xff] }
 0x312   :  { %3361 = vmatprep.subr.bf16.mxu0 %v5844_v2  ;;  %3393 = vmatprep.subr.bf16.mxu1 %v5845_v27 }
 0x315   :  { %3363 = vmatpush1.bf16.msra.mxu0 %v5846_v54  ;;  %3395 = vmatpush1.bf16.msra.mxu1 %v5847_v46 }
 0x316   :  { %3365 = vmatprep.subr.bf16.mxu0 %v5848_v7  ;;  %3397 = vmatprep.subr.bf16.mxu1 %v5849_v10  ;;  %v5853_v7 = vld [vmem:[#allocation168_spill] sm:$0xff] }
 0x319   :  { %3367 = vmatpush1.bf16.msra.mxu0 %v5850_v42  ;;  %3399 = vmatpush1.bf16.msra.mxu1 %v5851_v47  ;;  %v5854_v42 = vld [vmem:[#allocation170_spill] sm:$0xff] }
 0x31a   :  { %3369 = vmatprep.subr.bf16.mxu0 %v4678_v28  ;;  %3401 = vmatprep.subr.bf16.mxu1 %v5852_v3  ;;  %v5855_v28 = vld [vmem:[#allocation172_spill] sm:$0xff]  ;;  %v5856_v3 = vld [vmem:[#allocation173_spill] sm:$0xff] }
 0x31d   :  { %3371 = vmatpush1.bf16.msra.mxu0 %v4684_v40  ;;  %3403 = vmatpush1.bf16.msra.mxu1 %v4688_v57  ;;  %v5857_v40 = vld [vmem:[#allocation174_spill] sm:$0xff]  ;;  %v5858_v57 = vld [vmem:[#allocation175_spill] sm:$0xff] }
 0x31e   :  { %3373 = vmatprep.subr.bf16.mxu0 %v4690_v44  ;;  %3405 = vmatprep.subr.bf16.mxu1 %v4693_v29  ;;  %v5859_v44 = vld [vmem:[#allocation176_spill] sm:$0xff]  ;;  %v5860_v29 = vld [vmem:[#allocation15_spill] sm:$0xff] }
 0x321   :  { %3375 = vmatpush1.bf16.msra.mxu0 %v4696_v24  ;;  %3407 = vmatpush1.bf16.msra.mxu1 %v5853_v7  ;;  %v5861_v24 = vld [vmem:[#allocation16_spill] sm:$0xff] }
 0x322   :  { %3377 = vmatprep.subr.bf16.mxu0 %v4702_v36  ;;  %3409 = vmatprep.subr.bf16.mxu1 %v5854_v42 }
 0x325   :  { %3379 = vmatpush1.bf16.msra.mxu0 %v4708_v37  ;;  %3411 = vmatpush1.bf16.msra.mxu1 %v5855_v28 }
 0x326   :  { %3381 = vmatprep.subr.bf16.mxu0 %v5856_v3  ;;  %3413 = vmatprep.subr.bf16.mxu1 %v5857_v40 }
 0x329   :  { %3383 = vmatpush1.bf16.msra.mxu0 %v5858_v57  ;;  %3415 = vmatpush1.bf16.msra.mxu1 %v5859_v44 }
 0x32a   :  { %3417 = vmatprep.subr.bf16.mxu0 %v5860_v29  ;;  %3545 = vmatprep.subr.bf16.mxu1 %v5861_v24  ;;  %v5895_v29 = vld [vmem:[#allocation50_spill] sm:$0xff] }
 0x3de   :  { %v2528_v7 = vpop.f32.mrb[12].mxu0  ;;  %v2566_v36 = vpop.f32.mrb[12].mxu1 }
 0x3df   :  { %v2529_v47 = vpop.f32.mrb[13].mxu0  ;;  %v2567_v42 = vpop.f32.mrb[13].mxu1 }
 0x3e0   :  { %v2530_v10 = vadd.f32 %v2529_v47, %v2528_v7  ;;  %v2568_v37 = vadd.f32 %v2567_v42, %v2566_v36  ;;  %v5890_v47 = vld [vmem:[#allocation45_spill] sm:$0xff]  ;;  %v5896_v36 = vld [vmem:[#allocation51_spill] sm:$0xff] }
 0x3e2   :  { %v1571_v46 = vadd.f32 %v2568_v37, %v2530_v10  ;;  %v2531_v28 = vpop.f32.mrb[14].mxu0  ;;  %v2569_v54 = vpop.f32.mrb[14].mxu1  ;;  %v5897_v37 = vld [vmem:[#allocation52_spill] sm:$0xff]  ;;  %v5898_v10 = vld [vmem:[#allocation177_spill] sm:$0xff] }
 0x3e3   :  { %v2532_v3 = vpop.f32.mrb[15].mxu0  ;;  %v2570_v27 = vpop.f32.mrb[15].mxu1 }
 0x3e4   :  { %v2533_v40 = vadd.f32 %v2532_v3, %v2531_v28  ;;  %v2571_v2 = vadd.f32 %v2570_v27, %v2569_v54  ;;  %1644 = vmatmul.mubr.f32.vlgmr.msra.gmra.mrb[8].mxu0 %v1571_v46  ;;  %1721 = vmatmul.mubr.f32.vlgmr.msra.gmra.mrb[8].mxu1 %v1571_v46  ;;  %v5891_v54 = vld [vmem:[#allocation46_spill] sm:$0xff]  ;;  %v5892_v46 = vld [vmem:[#allocation47_spill] sm:$0xff]  ;;  %v5894_v28 = vld [vmem:[#allocation49_spill] sm:$0xff] }
 0x3e5   :  { %1649 = vmatprep.mubr.f32.mxu0 %v5841_v9  ;;  %1726 = vmatprep.mubr.f32.mxu1 %v5841_v9 }
 0x3e6   :  { %v1576_v24 = vadd.f32 %v2571_v2, %v2533_v40  ;;  %3419 = vmatpush1.bf16.msra.mxu0 %v4117_v8  ;;  %3547 = vmatpush1.bf16.msra.mxu1 %v4120_v12  ;;  %v5862_v8 = vld [vmem:[#allocation17_spill] sm:$0xff]  ;;  %v5863_v12 = vld [vmem:[#allocation18_spill] sm:$0xff]  ;;  %v5893_v40 = vld [vmem:[#allocation48_spill] sm:$0xff] }
 0x3e7   :  { %3421 = vmatprep.subr.bf16.mxu0 %v4124_v16  ;;  %3549 = vmatprep.subr.bf16.mxu1 %v4126_v17  ;;  %v5864_v16 = vld [vmem:[#allocation19_spill] sm:$0xff]  ;;  %v5865_v17 = vld [vmem:[#allocation20_spill] sm:$0xff] }
 0x3e8   :  { %1650 = vmatmul.mubr.f32.gmra.mrb[10].mxu0 %v1576_v24  ;;  %1727 = vmatmul.mubr.f32.gmra.mrb[10].mxu1 %v1576_v24  ;;  %v5899_v24 = vld [vmem:[#allocation178_spill] sm:$0xff] }
 0x3ea   :  { %3423 = vmatpush1.bf16.msra.mxu0 %v4129_v21  ;;  %3551 = vmatpush1.bf16.msra.mxu1 %v4133_v25  ;;  %v5866_v21 = vld [vmem:[#allocation21_spill] sm:$0xff]  ;;  %v5867_v25 = vld [vmem:[#allocation22_spill] sm:$0xff] }
 0x3eb   :  { %3425 = vmatprep.subr.bf16.mxu0 %v4135_v26  ;;  %3553 = vmatprep.subr.bf16.mxu1 %v4137_v30  ;;  %v5868_v26 = vld [vmem:[#allocation23_spill] sm:$0xff]  ;;  %v5869_v30 = vld [vmem:[#allocation24_spill] sm:$0xff] }
 0x3ee   :  { %3427 = vmatpush1.bf16.msra.mxu0 %v4140_v34  ;;  %3555 = vmatpush1.bf16.msra.mxu1 %v4144_v38  ;;  %v5870_v34 = vld [vmem:[#allocation25_spill] sm:$0xff]  ;;  %v5871_v38 = vld [vmem:[#allocation26_spill] sm:$0xff] }
 0x3ef   :  { %3429 = vmatprep.subr.bf16.mxu0 %v4146_v39  ;;  %3557 = vmatprep.subr.bf16.mxu1 %v4149_v43  ;;  %v5872_v39 = vld [vmem:[#allocation27_spill] sm:$0xff]  ;;  %v5873_v43 = vld [vmem:[#allocation28_spill] sm:$0xff] }
 0x3f2   :  { %3431 = vmatpush1.bf16.msra.mxu0 %v4152_v50  ;;  %3559 = vmatpush1.bf16.msra.mxu1 %v4156_v51  ;;  %v5874_v50 = vld [vmem:[#allocation29_spill] sm:$0xff]  ;;  %v5875_v51 = vld [vmem:[#allocation30_spill] sm:$0xff] }
 0x3f3   :  { %3433 = vmatprep.subr.bf16.mxu0 %v4158_v52  ;;  %3561 = vmatprep.subr.bf16.mxu1 %v4161_v56  ;;  %v5876_v52 = vld [vmem:[#allocation31_spill] sm:$0xff]  ;;  %v5877_v56 = vld [vmem:[#allocation32_spill] sm:$0xff] }
 0x3f6   :  { %3435 = vmatpush1.bf16.msra.mxu0 %v4164_v62  ;;  %3563 = vmatpush1.bf16.msra.mxu1 %v4168_v63  ;;  %v5878_v62 = vld [vmem:[#allocation33_spill] sm:$0xff]  ;;  %v5879_v63 = vld [vmem:[#allocation34_spill] sm:$0xff] }
 0x3f7   :  { %3437 = vmatprep.subr.bf16.mxu0 %v4170_v0  ;;  %3565 = vmatprep.subr.bf16.mxu1 %v4173_v5  ;;  %v5880_v0 = vld [vmem:[#allocation35_spill] sm:$0xff]  ;;  %v5881_v5 = vld [vmem:[#allocation36_spill] sm:$0xff] }
 0x3fa   :  { %3439 = vmatpush1.bf16.msra.mxu0 %v4176_v14  ;;  %3567 = vmatpush1.bf16.msra.mxu1 %v4180_v15  ;;  %v5882_v14 = vld [vmem:[#allocation37_spill] sm:$0xff]  ;;  %v5883_v15 = vld [vmem:[#allocation38_spill] sm:$0xff] }
 0x3fb   :  { %3441 = vmatprep.subr.bf16.mxu0 %v4182_v18  ;;  %3569 = vmatprep.subr.bf16.mxu1 %v4185_v23  ;;  %v5884_v18 = vld [vmem:[#allocation39_spill] sm:$0xff]  ;;  %v5885_v23 = vld [vmem:[#allocation40_spill] sm:$0xff] }
 0x3fe   :  { %3443 = vmatpush1.bf16.msra.mxu0 %v4188_v32  ;;  %3571 = vmatpush1.bf16.msra.mxu1 %v4192_v33  ;;  %v5886_v32 = vld [vmem:[#allocation41_spill] sm:$0xff]  ;;  %v5887_v33 = vld [vmem:[#allocation42_spill] sm:$0xff] }
 0x3ff   :  { %3445 = vmatprep.subr.bf16.mxu0 %v4194_v35  ;;  %3573 = vmatprep.subr.bf16.mxu1 %v4197_v41  ;;  %v5888_v35 = vld [vmem:[#allocation43_spill] sm:$0xff]  ;;  %v5889_v41 = vld [vmem:[#allocation44_spill] sm:$0xff] }
 0x402   :  { %3447 = vmatpush1.bf16.msra.mxu0 %v5862_v8  ;;  %3575 = vmatpush1.bf16.msra.mxu1 %v5863_v12 }
 0x403   :  { %3449 = vmatprep.subr.bf16.mxu0 %v5864_v16  ;;  %3577 = vmatprep.subr.bf16.mxu1 %v5865_v17 }
 0x406   :  { %3451 = vmatpush1.bf16.msra.mxu0 %v5866_v21  ;;  %3579 = vmatpush1.bf16.msra.mxu1 %v5867_v25 }
 0x407   :  { %3453 = vmatprep.subr.bf16.mxu0 %v5868_v26  ;;  %3581 = vmatprep.subr.bf16.mxu1 %v5869_v30 }
 0x40a   :  { %3455 = vmatpush1.bf16.msra.mxu0 %v5870_v34  ;;  %3583 = vmatpush1.bf16.msra.mxu1 %v5871_v38 }
 0x40b   :  { %3457 = vmatprep.subr.bf16.mxu0 %v5872_v39  ;;  %3585 = vmatprep.subr.bf16.mxu1 %v5873_v43  ;;  %v5900_v39 = vld [vmem:[#allocation53_spill] sm:$0xff]  ;;  %v5901_v43 = vld [vmem:[#allocation54_spill] sm:$0xff] }
 0x40e   :  { %3459 = vmatpush1.bf16.msra.mxu0 %v5874_v50  ;;  %3587 = vmatpush1.bf16.msra.mxu1 %v5875_v51  ;;  %v5902_v51 = vld [vmem:[#allocation55_spill] sm:$0xff] }
 0x40f   :  { %3461 = vmatprep.subr.bf16.mxu0 %v5876_v52  ;;  %3589 = vmatprep.subr.bf16.mxu1 %v5877_v56  ;;  %v5903_v52 = vld [vmem:[#allocation56_spill] sm:$0xff] }
 0x412   :  { %3463 = vmatpush1.bf16.msra.mxu0 %v5878_v62  ;;  %3591 = vmatpush1.bf16.msra.mxu1 %v5879_v63  ;;  %v5904_v63 = vld [vmem:[#allocation57_spill] sm:$0xff] }
 0x413   :  { %3465 = vmatprep.subr.bf16.mxu0 %v5880_v0  ;;  %3593 = vmatprep.subr.bf16.mxu1 %v5881_v5  ;;  %v5905_v0 = vld [vmem:[#allocation58_spill] sm:$0xff]  ;;  %v5906_v5 = vld [vmem:[#allocation59_spill] sm:$0xff] }
 0x416   :  { %3467 = vmatpush1.bf16.msra.mxu0 %v5882_v14  ;;  %3595 = vmatpush1.bf16.msra.mxu1 %v5883_v15  ;;  %v5907_v14 = vld [vmem:[#allocation60_spill] sm:$0xff]  ;;  %v5908_v15 = vld [vmem:[#allocation61_spill] sm:$0xff] }
 0x417   :  { %3469 = vmatprep.subr.bf16.mxu0 %v5884_v18  ;;  %3597 = vmatprep.subr.bf16.mxu1 %v5885_v23  ;;  %v5909_v18 = vld [vmem:[#allocation62_spill] sm:$0xff]  ;;  %v5910_v23 = vld [vmem:[#allocation63_spill] sm:$0xff] }
 0x41a   :  { %3471 = vmatpush1.bf16.msra.mxu0 %v5886_v32  ;;  %3599 = vmatpush1.bf16.msra.mxu1 %v5887_v33  ;;  %v5911_v32 = vld [vmem:[#allocation64_spill] sm:$0xff]  ;;  %v5912_v33 = vld [vmem:[#allocation65_spill] sm:$0xff] }
 0x41b   :  { %3473 = vmatprep.subr.bf16.mxu0 %v5888_v35  ;;  %3601 = vmatprep.subr.bf16.mxu1 %v5889_v41  ;;  %v5913_v35 = vld [vmem:[#allocation66_spill] sm:$0xff]  ;;  %v5914_v41 = vld [vmem:[#allocation67_spill] sm:$0xff] }
 0x41e   :  { %3475 = vmatpush1.bf16.msra.mxu0 %v5890_v47  ;;  %3603 = vmatpush1.bf16.msra.mxu1 %v5891_v54  ;;  %v5915_v47 = vld [vmem:[#allocation68_spill] sm:$0xff]  ;;  %v5916_v54 = vld [vmem:[#allocation69_spill] sm:$0xff] }
 0x41f   :  { %3477 = vmatprep.subr.bf16.mxu0 %v5892_v46  ;;  %3605 = vmatprep.subr.bf16.mxu1 %v5893_v40  ;;  %v5917_v46 = vld [vmem:[#allocation70_spill] sm:$0xff]  ;;  %v5918_v40 = vld [vmem:[#allocation71_spill] sm:$0xff] }
 0x422   :  { %3479 = vmatpush1.bf16.msra.mxu0 %v5894_v28  ;;  %3607 = vmatpush1.bf16.msra.mxu1 %v5895_v29  ;;  %v5919_v28 = vld [vmem:[#allocation72_spill] sm:$0xff]  ;;  %v5920_v29 = vld [vmem:[#allocation73_spill] sm:$0xff] }
 0x423   :  { %3481 = vmatprep.subr.bf16.mxu0 %v5896_v36  ;;  %3609 = vmatprep.subr.bf16.mxu1 %v5897_v37  ;;  %v5921_v36 = vld [vmem:[#allocation74_spill] sm:$0xff]  ;;  %v5922_v37 = vld [vmem:[#allocation75_spill] sm:$0xff] }
 0x4b7   :  { %v1645_v7 = vpop.f32.mrb[8].mxu0  ;;  %v5045_v3 = vpop.f32.mrb[8].mxu1 }
 0x4b8   :  { %v1647_v2 = vpop.f32.mrb[9].mxu0  ;;  %v1724_v27 = vpop.f32.mrb[9].mxu1  ;;  %v1741_v42 = vadd.f32 %v1645_v7, %v5898_v10  ;;  %v5923_v7 = vld [vmem:[#allocation76_spill] sm:$0xff] }
 0x4b9   :  { %v1742_v8 = vadd.f32 %v1647_v2, %v5899_v24  ;;  %v1744_v30 = vadd.f32 %v1724_v27, %v4809_v6  ;;  %v5924_v2 = vld [vmem:[#allocation77_spill] sm:$0xff]  ;;  %v5925_v27 = vld [vmem:[#allocation78_spill] sm:$0xff] }
 0x4bb   :  { %v1651_v12 = vpop.f32.mrb[10].mxu0  ;;  %v5049_v16 = vpop.f32.mrb[10].mxu1  ;;  %3874 = vtanh.f32 %v1742_v8  ;;  %v5927_v8 = vld [vmem:[#allocation80_spill] sm:$0xff] }
 0x4bc   :  { %v1653_v17 = vpop.f32.mrb[11].mxu0  ;;  %v5051_v21 = vpop.f32.mrb[11].mxu1  ;;  %3876 = vtanh.f32 %v1741_v42  ;;  %v1745_v25 = vadd.f32 %v1651_v12, %v5898_v10  ;;  %v5926_v42 = vld [vmem:[#allocation79_spill] sm:$0xff]  ;;  %v5928_v12 = vld [vmem:[#allocation81_spill] sm:$0xff] }
 0x4bd   :  { %v1746_v26 = vadd.f32 %v1653_v17, %v5899_v24  ;;  %v5929_v17 = vld [vmem:[#allocation82_spill] sm:$0xff] }
 0x4bf   :  { %3878 = vtanh.f32 %v1746_v26  ;;  %v5931_v26 = vld [vmem:[#allocation84_spill] sm:$0xff] }
 0x4c0   :  { %3880 = vtanh.f32 %v1745_v25  ;;  %v5930_v25 = vld [vmem:[#allocation83_spill] sm:$0xff] }
 0x4c1   :  { %3882 = vtanh.f32 %v1744_v30  ;;  %v5932_v30 = vld [vmem:[#allocation85_spill] sm:$0xff] }
 0x4c5   :  { %v5056_v34 = vpop.eup %3874 }
 0x4c6   :  { %v5058_v38 = vpop.eup %3876  ;;  %1821 = vmatprep.mubr.f32.mxu0 %v5056_v34  ;;  %1975 = vmatprep.mubr.f32.mxu1 %v5056_v34 }
 0x4c7   :  { %1822 = vmatmul.mubr.f32.vlgmr.msra.gmra.mrb[16].mxu0 %v5058_v38  ;;  %1976 = vmatmul.mubr.f32.vlgmr.msra.gmra.mrb[16].mxu1 %v5058_v38 }
 0x4c8   :  { %3483 = vmatpush1.bf16.msra.mxu0 %v5900_v39  ;;  %3611 = vmatpush1.bf16.msra.mxu1 %v5901_v43  ;;  %v5933_v39 = vld [vmem:[#allocation86_spill] sm:$0xff]  ;;  %v5934_v43 = vld [vmem:[#allocation87_spill] sm:$0xff] }
 0x4c9   :  { %v5066_v50 = vpop.eup %3878  ;;  %3485 = vmatprep.subr.bf16.mxu0 %v5902_v51  ;;  %3613 = vmatprep.subr.bf16.mxu1 %v5903_v52  ;;  %v5935_v51 = vld [vmem:[#allocation88_spill] sm:$0xff]  ;;  %v5936_v52 = vld [vmem:[#allocation89_spill] sm:$0xff] }
 0x4ca   :  { %v5070_v56 = vpop.eup %3880  ;;  %1827 = vmatprep.mubr.f32.mxu0 %v5066_v50  ;;  %1981 = vmatprep.mubr.f32.mxu1 %v5066_v50 }
 0x4cb   :  { %1828 = vmatmul.mubr.f32.gmra.mrb[18].mxu0 %v5070_v56  ;;  %1982 = vmatmul.mubr.f32.gmra.mrb[18].mxu1 %v5070_v56  ;;  %v5076_v62 = vpop.eup %3882 }
 0x4cc   :  { %3487 = vmatpush1.bf16.msra.mxu0 %v5904_v63  ;;  %3615 = vmatpush1.bf16.msra.mxu1 %v5905_v0  ;;  %v5937_v63 = vld [vmem:[#allocation91_spill] sm:$0xff]  ;;  %v5938_v0 = vld [vmem:[#allocation92_spill] sm:$0xff] }
 0x4cd   :  { %1898 = vmatprep.mubr.f32.mxu0 %v5076_v62  ;;  %2052 = vmatprep.mubr.f32.mxu1 %v5076_v62 }
 0x4ce   :  { %3489 = vmatprep.subr.bf16.mxu0 %v5906_v5  ;;  %3617 = vmatprep.subr.bf16.mxu1 %v5907_v14  ;;  %v5939_v5 = vld [vmem:[#allocation93_spill] sm:$0xff]  ;;  %v5940_v14 = vld [vmem:[#allocation94_spill] sm:$0xff] }
 0x4d0   :  { %3491 = vmatpush1.bf16.msra.mxu0 %v5908_v15  ;;  %3619 = vmatpush1.bf16.msra.mxu1 %v5909_v18  ;;  %v5941_v15 = vld [vmem:[#allocation95_spill] sm:$0xff]  ;;  %v5942_v18 = vld [vmem:[#allocation96_spill] sm:$0xff] }
 0x4d1   :  { %3493 = vmatprep.subr.bf16.mxu0 %v5910_v23  ;;  %3621 = vmatprep.subr.bf16.mxu1 %v5911_v32  ;;  %v5943_v23 = vld [vmem:[#allocation98_spill] sm:$0xff]  ;;  %v5944_v32 = vld [vmem:[#allocation99_spill] sm:$0xff] }
 0x4d4   :  { %3495 = vmatpush1.bf16.msra.mxu0 %v5912_v33  ;;  %3623 = vmatpush1.bf16.msra.mxu1 %v5913_v35  ;;  %v5945_v33 = vld [vmem:[#allocation100_spill] sm:$0xff]  ;;  %v5946_v35 = vld [vmem:[#allocation101_spill] sm:$0xff] }
 0x4d5   :  { %3497 = vmatprep.subr.bf16.mxu0 %v5914_v41  ;;  %3625 = vmatprep.subr.bf16.mxu1 %v5915_v47  ;;  %v5947_v41 = vld [vmem:[#allocation102_spill] sm:$0xff]  ;;  %v1748_v47 = vadd.f32 %v5051_v21, %v4809_v6 }
 0x4d6   :  { %v5954_v21 = vld [vmem:[#allocation110_spill] sm:$0xff] }
 0x4d8   :  { %3499 = vmatpush1.bf16.msra.mxu0 %v5916_v54  ;;  %3627 = vmatpush1.bf16.msra.mxu1 %v5917_v46  ;;  %v5948_v54 = vld [vmem:[#allocation103_spill] sm:$0xff]  ;;  %v5949_v46 = vld [vmem:[#allocation104_spill] sm:$0xff] }
 0x4d9   :  { %3501 = vmatprep.subr.bf16.mxu0 %v5918_v40  ;;  %3629 = vmatprep.subr.bf16.mxu1 %v5919_v28  ;;  %v5950_v40 = vld [vmem:[#allocation105_spill] sm:$0xff]  ;;  %v5951_v28 = vld [vmem:[#allocation106_spill] sm:$0xff] }
 0x4dc   :  { %3503 = vmatpush1.bf16.msra.mxu0 %v5920_v29  ;;  %3631 = vmatpush1.bf16.msra.mxu1 %v5921_v36  ;;  %v5953_v29 = vld [vmem:[#allocation109_spill] sm:$0xff]  ;;  %v5955_v36 = vld [vmem:[#allocation111_spill] sm:$0xff] }
 0x4dd   :  { %3505 = vmatprep.subr.bf16.mxu0 %v5922_v37  ;;  %3633 = vmatprep.subr.bf16.mxu1 %v5923_v7  ;;  %v5956_v37 = vld [vmem:[#allocation112_spill] sm:$0xff]  ;;  %v5957_v7 = vld [vmem:[#allocation113_spill] sm:$0xff] }
 0x4e0   :  { %3507 = vmatpush1.bf16.msra.mxu0 %v5924_v2  ;;  %3635 = vmatpush1.bf16.msra.mxu1 %v5925_v27  ;;  %v5959_v2 = vld [vmem:[#allocation115_spill] sm:$0xff]  ;;  %v5960_v27 = vld [vmem:[#allocation116_spill] sm:$0xff] }
 0x4e1   :  { %3509 = vmatprep.subr.bf16.mxu0 %v5926_v42  ;;  %3637 = vmatprep.subr.bf16.mxu1 %v5927_v8 }
 0x4e4   :  { %3511 = vmatpush1.bf16.msra.mxu0 %v5928_v12  ;;  %3639 = vmatpush1.bf16.msra.mxu1 %v5929_v17  ;;  %v5962_v12 = vld [vmem:[#allocation118_spill] sm:$0xff] }
 0x4e5   :  { %3513 = vmatprep.subr.bf16.mxu0 %v5930_v25  ;;  %3641 = vmatprep.subr.bf16.mxu1 %v5931_v26  ;;  %v5963_v25 = vld [vmem:[#allocation119_spill] sm:$0xff]  ;;  %v5964_v26 = vld [vmem:[#allocation120_spill] sm:$0xff] }
 0x4e8   :  { %3515 = vmatpush1.bf16.msra.mxu0 %v5932_v30  ;;  %3643 = vmatpush1.bf16.msra.mxu1 %v5933_v39  ;;  %v5965_v30 = vld [vmem:[#allocation121_spill] sm:$0xff]  ;;  %v5966_v39 = vld [vmem:[#allocation122_spill] sm:$0xff] }
 0x4e9   :  { %3517 = vmatprep.subr.bf16.mxu0 %v5934_v43  ;;  %3645 = vmatprep.subr.bf16.mxu1 %v5935_v51  ;;  %v5967_v43 = vld [vmem:[#allocation123_spill] sm:$0xff]  ;;  %v5968_v51 = vld [vmem:[#allocation124_spill] sm:$0xff] }
 0x4ec   :  { %3519 = vmatpush1.bf16.msra.mxu0 %v5936_v52  ;;  %3647 = vmatpush1.bf16.msra.mxu1 %v5785_v49  ;;  %v1743_v49 = vadd.f32 %v5045_v3, %v4799_v19  ;;  %v5952_v3 = vld [vmem:[#allocation107_spill] sm:$0xff]  ;;  %v5969_v52 = vld [vmem:[#allocation125_spill] sm:$0xff] }
 0x4ed   :  { %3521 = vmatprep.subr.bf16.mxu0 %v5937_v63  ;;  %3649 = vmatprep.subr.bf16.mxu1 %v5938_v0  ;;  %v5970_v63 = vld [vmem:[#allocation126_spill] sm:$0xff]  ;;  %v5971_v0 = vld [vmem:[#allocation127_spill] sm:$0xff] }
 0x4ee   :  { %3884 = vtanh.f32 %v1743_v49  ;;  %v5997_v49 = vld [vmem:[#allocation164_spill] sm:$0xff] }
 0x4ef   :  { %3886 = vtanh.f32 %v1748_v47  ;;  %v6000_v47 = vld [vmem:[#allocation167_spill] sm:$0xff] }
 0x4f0   :  { %3523 = vmatpush1.bf16.msra.mxu0 %v5939_v5  ;;  %3651 = vmatpush1.bf16.msra.mxu1 %v5940_v14  ;;  %v5972_v5 = vld [vmem:[#allocation128_spill] sm:$0xff]  ;;  %v5973_v14 = vld [vmem:[#allocation129_spill] sm:$0xff] }
 0x4f1   :  { %3525 = vmatprep.subr.bf16.mxu0 %v5941_v15  ;;  %3653 = vmatprep.subr.bf16.mxu1 %v5942_v18  ;;  %v5976_v15 = vld [vmem:[#allocation133_spill] sm:$0xff]  ;;  %v5977_v18 = vld [vmem:[#allocation134_spill] sm:$0xff] }
 0x4f4   :  { %3527 = vmatpush1.bf16.msra.mxu0 %v5792_v60  ;;  %3655 = vmatpush1.bf16.msra.mxu1 %v5943_v23  ;;  %v1747_v60 = vadd.f32 %v5049_v16, %v4799_v19  ;;  %v5958_v16 = vld [vmem:[#allocation114_spill] sm:$0xff]  ;;  %v5978_v23 = vld [vmem:[#allocation135_spill] sm:$0xff] }
 0x4f5   :  { %3529 = vmatprep.subr.bf16.mxu0 %v5944_v32  ;;  %3657 = vmatprep.subr.bf16.mxu1 %v5945_v33  ;;  %v5994_v32 = vld [vmem:[#allocation161_spill] sm:$0xff]  ;;  %v5995_v33 = vld [vmem:[#allocation162_spill] sm:$0xff] }
 0x4f6   :  { %3888 = vtanh.f32 %v1747_v60  ;;  %v6003_v60 = vld [vmem:[#allocation170_spill] sm:$0xff] }
 0x4f8   :  { %3531 = vmatpush1.bf16.msra.mxu0 %v5946_v35  ;;  %3659 = vmatpush1.bf16.msra.mxu1 %v5947_v41  ;;  %v3885_v42 = vpop.eup %3884  ;;  %v5998_v35 = vld [vmem:[#allocation165_spill] sm:$0xff]  ;;  %v5999_v41 = vld [vmem:[#allocation166_spill] sm:$0xff] }
 0x4f9   :  { %3533 = vmatprep.subr.bf16.mxu0 %v5948_v54  ;;  %3661 = vmatprep.subr.bf16.mxu1 %v5949_v46  ;;  %v3887_v8 = vpop.eup %3886  ;;  %v6001_v54 = vld [vmem:[#allocation168_spill] sm:$0xff]  ;;  %v6002_v46 = vld [vmem:[#allocation169_spill] sm:$0xff] }
 0x4fc   :  { %3535 = vmatpush1.bf16.msra.mxu0 %v5950_v40  ;;  %3663 = vmatpush1.bf16.msra.mxu1 %v5951_v28  ;;  %v6004_v40 = vld [vmem:[#allocation171_spill] sm:$0xff]  ;;  %v6005_v28 = vld [vmem:[#allocation172_spill] sm:$0xff] }
 0x4fd   :  { %3537 = vmatprep.subr.bf16.mxu0 %v5952_v3  ;;  %3665 = vmatprep.subr.bf16.mxu1 %v5803_v45  ;;  %v5961_v45 = vld [vmem:[#allocation117_spill] sm:$0xff] }
 0x4fe   :  { %v6006_v3 = vld [vmem:[#allocation173_spill] sm:$0xff] }
 0x500   :  { %3539 = vmatpush1.bf16.msra.mxu0 %v5953_v29  ;;  %3667 = vmatpush1.bf16.msra.mxu1 %v5954_v21  ;;  %v3889_v17 = vpop.eup %3888  ;;  %v6007_v29 = vld [vmem:[#allocation174_spill] sm:$0xff] }
 0x501   :  { %3541 = vmatprep.subr.bf16.mxu0 %v5955_v36  ;;  %3669 = vmatprep.subr.bf16.mxu1 %v5956_v37 }
 0x504   :  { %3543 = vmatpush1.bf16.msra.mxu0 %v5957_v7  ;;  %3671 = vmatpush1.bf16.msra.mxu1 %v5958_v16 }
 0x505   :  { %3673 = vmatprep.subr.bf16.mxu0 %v5959_v2  ;;  %3705 = vmatprep.subr.bf16.mxu1 %v5960_v27 }
 0x507   :  { %1899 = vmatmul.mubr.f32.vlgmr.msra.gmra.mrb[16].mxu0 %v3885_v42  ;;  %2053 = vmatmul.mubr.f32.vlgmr.msra.gmra.mrb[16].mxu1 %v3885_v42 }
 0x508   :  { %1904 = vmatprep.mubr.f32.mxu0 %v3887_v8  ;;  %2058 = vmatprep.mubr.f32.mxu1 %v3887_v8 }
 0x509   :  { %3675 = vmatpush3.bf16.msra.mxu0 %v5961_v45  ;;  %3707 = vmatpush3.bf16.msra.mxu1 %v5962_v12 }
 0x50a   :  { %3677 = vmatprep.subr.bf16.mxu0 %v5963_v25  ;;  %3709 = vmatprep.subr.bf16.mxu1 %v5964_v26 }
 0x50b   :  { %1905 = vmatmul.mubr.f32.gmra.mrb[18].mxu0 %v3889_v17  ;;  %2059 = vmatmul.mubr.f32.gmra.mrb[18].mxu1 %v3889_v17 }
 0x50c   :  { %2129 = vmatprep.mubr.f32.mxu0 %v5056_v34  ;;  %2204 = vmatprep.mubr.f32.mxu1 %v5076_v62  ;;  %v5974_v34 = vld [vmem:[#allocation130_spill] sm:$0xff]  ;;  %v5975_v62 = vld [vmem:[#allocation132_spill] sm:$0xff] }
 0x50d   :  { %3679 = vmatpush3.bf16.msra.mxu0 %v5965_v30  ;;  %3711 = vmatpush3.bf16.msra.mxu1 %v5966_v39 }
 0x50e   :  { %3681 = vmatprep.subr.bf16.mxu0 %v5967_v43  ;;  %3713 = vmatprep.subr.bf16.mxu1 %v5968_v51 }
 0x511   :  { %3683 = vmatpush3.bf16.msra.mxu0 %v5969_v52  ;;  %3715 = vmatpush3.bf16.msra.mxu1 %v5970_v63 }
 0x512   :  { %3685 = vmatprep.subr.bf16.mxu0 %v5971_v0  ;;  %3717 = vmatprep.subr.bf16.mxu1 %v5972_v5 }
 0x515   :  { %3687 = vmatpush3.bf16.msra.mxu0 %v5973_v14  ;;  %3719 = vmatpush3.bf16.msra.mxu1 %v5974_v34 }
 0x516   :  { %3689 = vmatprep.subr.bf16.mxu0 %v5825_v20  ;;  %3721 = vmatprep.subr.bf16.mxu1 %v5975_v62  ;;  %v5979_v20 = vld [vmem:[#allocation143_spill] sm:$0xff] }
 0x519   :  { %3691 = vmatpush3.bf16.msra.mxu0 %v5976_v15  ;;  %3723 = vmatpush3.bf16.msra.mxu1 %v5977_v18 }
 0x51a   :  { %3693 = vmatprep.subr.bf16.mxu0 %v5978_v23  ;;  %3725 = vmatprep.subr.bf16.mxu1 %v5830_v58  ;;  %v5980_v58 = vld [vmem:[#allocation146_spill] sm:$0xff] }
 0x51d   :  { %3695 = vmatpush3.bf16.msra.mxu0 %v5831_v4  ;;  %3727 = vmatpush3.bf16.msra.mxu1 %v5832_v48  ;;  %v5984_v48 = vld [vmem:[#allocation150_spill] sm:$0xff] }
 0x51e   :  { %3697 = vmatprep.subr.bf16.mxu0 %v5833_v31  ;;  %3729 = vmatprep.subr.bf16.mxu1 %v5834_v53  ;;  %v5981_v31 = vld [vmem:[#allocation147_spill] sm:$0xff]  ;;  %v5983_v53 = vld [vmem:[#allocation149_spill] sm:$0xff]  ;;  %v5987_v4 = vld [vmem:[#allocation154_spill] sm:$0xff] }
 0x521   :  { %3699 = vmatpush3.bf16.msra.mxu0 %v5835_v61  ;;  %3731 = vmatpush3.bf16.msra.mxu1 %v4610_v13  ;;  %v5982_v13 = vld [vmem:[#allocation148_spill] sm:$0xff]  ;;  %v5990_v61 = vld [vmem:[#allocation157_spill] sm:$0xff] }
 0x522   :  { %3701 = vmatprep.subr.bf16.mxu0 %v5836_v55  ;;  %3733 = vmatprep.subr.bf16.mxu1 %v5979_v20  ;;  %v5988_v55 = vld [vmem:[#allocation155_spill] sm:$0xff] }
 0x525   :  { %3703 = vmatpush3.bf16.msra.mxu0 %v5838_v1  ;;  %3735 = vmatpush3.bf16.msra.mxu1 %v5839_v59  ;;  %v5985_v1 = vld [vmem:[#allocation151_spill] sm:$0xff]  ;;  %v5989_v59 = vld [vmem:[#allocation156_spill] sm:$0xff] }
 0x526   :  { %3737 = vmatprep.subr.bf16.mxu0 %v5980_v58  ;;  %3769 = vmatprep.subr.bf16.mxu1 %v4627_v22  ;;  %v5986_v22 = vld [vmem:[#allocation153_spill] sm:$0xff] }
 0x528   :  { %2130 = vmatmul.mubr.f32.vlgmr.msra.gmra.mrb[20].mxu0 %v5058_v38  ;;  %2205 = vmatmul.mubr.f32.vlgmr.msra.gmra.mrb[20].mxu1 %v3885_v42  ;;  %v5991_v38 = vld [vmem:[#allocation158_spill] sm:$0xff] }
 0x529   :  { %2134 = vmatprep.mubr.f32.mxu0 %v5066_v50  ;;  %2209 = vmatprep.mubr.f32.mxu1 %v3887_v8  ;;  %v5992_v50 = vld [vmem:[#allocation159_spill] sm:$0xff] }
 0x52a   :  { %3739 = vmatpush1.bf16.msra.mxu0 %v5981_v31  ;;  %3771 = vmatpush1.bf16.msra.mxu1 %v5982_v13 }
 0x52b   :  { %3741 = vmatprep.subr.bf16.mxu0 %v5983_v53  ;;  %3773 = vmatprep.subr.bf16.mxu1 %v5984_v48 }
 0x52c   :  { %2135 = vmatmul.mubr.f32.gmra.mrb[22].mxu0 %v5070_v56  ;;  %2210 = vmatmul.mubr.f32.gmra.mrb[22].mxu1 %v3889_v17  ;;  %v5993_v56 = vld [vmem:[#allocation160_spill] sm:$0xff] }
 0x52d   :  { %2279 = vmatprep.mubr.f32.mxu0 %v5841_v9  ;;  %2356 = vmatprep.mubr.f32.mxu1 %v5841_v9 }
 0x52e   :  { %3743 = vmatpush1.bf16.msra.mxu0 %v5985_v1  ;;  %3775 = vmatpush1.bf16.msra.mxu1 %v5843_v11  ;;  %v5996_v11 = vld [vmem:[#allocation163_spill] sm:$0xff] }
 0x52f   :  { %3745 = vmatprep.subr.bf16.mxu0 %v5986_v22  ;;  %3777 = vmatprep.subr.bf16.mxu1 %v5987_v4 }
 0x532   :  { %3747 = vmatpush1.bf16.msra.mxu0 %v5988_v55  ;;  %3779 = vmatpush1.bf16.msra.mxu1 %v5989_v59 }
 0x533   :  { %3749 = vmatprep.subr.bf16.mxu0 %v5990_v61  ;;  %3781 = vmatprep.subr.bf16.mxu1 %v5991_v38 }
 0x536   :  { %3751 = vmatpush1.bf16.msra.mxu0 %v5992_v50  ;;  %3783 = vmatpush1.bf16.msra.mxu1 %v5993_v56 }
 0x537   :  { %3753 = vmatprep.subr.bf16.mxu0 %v5994_v32  ;;  %3785 = vmatprep.subr.bf16.mxu1 %v5995_v33 }
 0x53a   :  { %3755 = vmatpush1.bf16.msra.mxu0 %v5996_v11  ;;  %3787 = vmatpush1.bf16.msra.mxu1 %v5997_v49 }
 0x53b   :  { %3757 = vmatprep.subr.bf16.mxu0 %v5998_v35  ;;  %3789 = vmatprep.subr.bf16.mxu1 %v5999_v41 }
 0x53e   :  { %3759 = vmatpush1.bf16.msra.mxu0 %v6000_v47  ;;  %3791 = vmatpush1.bf16.msra.mxu1 %v6001_v54 }
 0x53f   :  { %3761 = vmatprep.subr.bf16.mxu0 %v6002_v46  ;;  %3793 = vmatprep.subr.bf16.mxu1 %v6003_v60 }
 0x542   :  { %3763 = vmatpush1.bf16.msra.mxu0 %v6004_v40  ;;  %3795 = vmatpush1.bf16.msra.mxu1 %v6005_v28 }
 0x543   :  { %3765 = vmatprep.subr.bf16.mxu0 %v6006_v3  ;;  %3797 = vmatprep.subr.bf16.mxu1 %v6007_v29 }
 0x546   :  { %3767 = vmatpush1.bf16.msra.mxu0 %v5858_v57  ;;  %3799 = vmatpush1.bf16.msra.mxu1 %v5859_v44 }
 0x5fb   :  { %v2604_v21 = vpop.f32.mrb[20].mxu0  ;;  %v2642_v36 = vpop.f32.mrb[20].mxu1 }
 0x5fc   :  { %v2605_v37 = vpop.f32.mrb[21].mxu0  ;;  %v2643_v7 = vpop.f32.mrb[21].mxu1 }
 0x5fd   :  { %v2606_v16 = vadd.f32 %v2605_v37, %v2604_v21  ;;  %v2644_v2 = vadd.f32 %v2643_v7, %v2642_v36 }
 0x5ff   :  { %v2207_v27 = vadd.f32 %v2644_v2, %v2606_v16  ;;  %v2607_v42 = vpop.f32.mrb[22].mxu0  ;;  %v2645_v8 = vpop.f32.mrb[22].mxu1 }
 0x600   :  { %v2608_v45 = vpop.f32.mrb[23].mxu0  ;;  %v2646_v12 = vpop.f32.mrb[23].mxu1 }
 0x601   :  { %v2609_v17 = vadd.f32 %v2608_v45, %v2607_v42  ;;  %v2647_v25 = vadd.f32 %v2646_v12, %v2645_v8  ;;  %2280 = vmatmul.mubr.f32.vlgmr.msra.gmra.mrb[16].mxu0 %v2207_v27  ;;  %2357 = vmatmul.mubr.f32.vlgmr.msra.gmra.mrb[16].mxu1 %v2207_v27 }
 0x602   :  { %2285 = vmatprep.mubr.f32.mxu0 %v5841_v9  ;;  %2362 = vmatprep.mubr.f32.mxu1 %v5841_v9 }
 0x603   :  { %v2212_v57 = vadd.f32 %v2647_v25, %v2609_v17 }
 0x605   :  { %2286 = vmatmul.mubr.f32.gmra.mrb[18].mxu0 %v2212_v57  ;;  %2363 = vmatmul.mubr.f32.gmra.mrb[18].mxu1 %v2212_v57 }
 0x6d4   :  { %v2281_v44 = vpop.f32.mrb[16].mxu0  ;;  %v2358_v26 = vpop.f32.mrb[16].mxu1 }
 0x6d5   :  { %v2377_v30 = vadd.f32 %v2281_v44, %v5898_v10  ;;  %v2379_v39 = vadd.f32 %v2358_v26, %v4799_v19  ;;  %v2283_v43 = vpop.f32.mrb[17].mxu0  ;;  %v2360_v51 = vpop.f32.mrb[17].mxu1 }
 0x6d6   :  { %v2378_v52 = vadd.f32 %v2283_v43, %v5899_v24  ;;  %v2380_v63 = vadd.f32 %v2360_v51, %v4809_v6 }
 0x6d7   :  { %3890 = vtanh.f32 %v2377_v30 }
 0x6d8   :  { %3892 = vtanh.f32 %v2379_v39  ;;  %v2287_v0 = vpop.f32.mrb[18].mxu0  ;;  %v2364_v5 = vpop.f32.mrb[18].mxu1 }
 0x6d9   :  { %3894 = vtanh.f32 %v2378_v52  ;;  %v2381_v9 = vadd.f32 %v2287_v0, %v5898_v10  ;;  %v2383_v14 = vadd.f32 %v2364_v5, %v4799_v19  ;;  %v2289_v34 = vpop.f32.mrb[19].mxu0  ;;  %v2366_v62 = vpop.f32.mrb[19].mxu1 }
 0x6da   :  { %3896 = vtanh.f32 %v2380_v63  ;;  %v2382_v15 = vadd.f32 %v2289_v34, %v5899_v24  ;;  %v2384_v18 = vadd.f32 %v2366_v62, %v4809_v6 }
 0x6db   :  { %3898 = vtanh.f32 %v2381_v9 }
 0x6dc   :  { %3900 = vtanh.f32 %v2383_v14 }
 0x6dd   :  { %3902 = vtanh.f32 %v2382_v15 }
 0x6de   :  { %3904 = vtanh.f32 %v2384_v18 }
 0x6e1   :  { %v3891_v23 = vpop.eup %3890 }
 0x6e2   :  { %v3893_v20 = vpop.eup %3892  ;;  %2393 = vst [vmem:[#allocation10] sm:$0xff] %v3891_v23 }
 0x6e3   :  { %v3895_v58 = vpop.eup %3894  ;;  %2395 = vst [vmem:[#allocation10 + $0x10] sm:$0xff] %v3893_v20 }
 0x6e4   :  { %v3897_v31 = vpop.eup %3896  ;;  %2394 = vst [vmem:[#allocation10 + $0x8] sm:$0xff] %v3895_v58 }
 0x6e5   :  { %v3899_v19 = vpop.eup %3898  ;;  %2396 = vst [vmem:[#allocation10 + $0x18] sm:$0xff] %v3897_v31 }
 0x6e6   :  { %v3901_v10 = vpop.eup %3900  ;;  %2397 = vst [vmem:[#allocation10 + $0x20] sm:$0xff] %v3899_v19 }
 0x6e7   :  { %v3903_v24 = vpop.eup %3902  ;;  %2399 = vst [vmem:[#allocation10 + $0x30] sm:$0xff] %v3901_v10 }
 0x6e8   :  { %v3905_v6 = vpop.eup %3904  ;;  %2398 = vst [vmem:[#allocation10 + $0x28] sm:$0xff] %v3903_v24 }
 0x6e9   :  { %2400 = vst [vmem:[#allocation10 + $0x38] sm:$0xff] %v3905_v6 }
 0x6ea   :  { %4005 = shalt.err (!%p4002_p8)
}
 0x6eb   :  { %s4006_s17 = scalar_lea.hbm %s5244_s4, 1024 }
 0x6ec   :  { %p4007_p9 = scmp.ne.s32.totalorder %s5244_s4, %s4006_s17  ;;  %p4010_p10 = scmp.lt.u32.totalorder %s4006_s17, %s5244_s4 }
 0x6ee   :  { %p4012_p11 = pnand %p4010_p10, %p4007_p9 }
 0x6f0   :  { %4015 = shalt.err (!%p4012_p11)
}
 0x6f1   :  { %2412 = dma.vmem_to_hbm [thread:$0]  %s2407_s12, 1024, %s5244_s4, [#allocation4], %s4028_s1, %s4028_s1, %s4029_s13  }
 0x6f2   :  { %4022 = dma.done.wait [#allocation4], 1024  }
 0x6f3   :  { %4023 = vsyncadd [#allocation4], 4294966272 }
 0x6f4   :  { %2416 = vsyncpa [#allocation3], 1 }
 0x6f5   :  { %2417 = vsyncpa [#allocation6], 1 }
 0x6f6   :  { %2418 = vsyncpa [#allocation9], 1 }
 0x6f7   :  { %2419 = vsyncpa [#allocation4], 1 }

</bundles_post_ra>
